<compile_context>
chip_gen: v5e
topology: v5e:2x2
jax: 0.10.0
libtpu: 0.0.40
codegen_flags: <defaults>
</compile_context>

<pallas_src>
import math
from functools import partial

import jax
import jax.numpy as jnp
from jax import lax
from jax.experimental import pallas as pl
from jax.experimental.pallas import tpu as pltpu


def _gru_seq_kernel(seq_ref, h0_ref, w_h_ref, w_un_ref, w_i3_ref, b3_ref,
                    b_fg_ref, out_ref, pre_ref, *, unroll):
    """One invocation processes the whole sequence.

    seq_ref : (T, B, 2)   f32   [:, :, 0] = x, [:, :, 1] = theta
    h0_ref  : (B, H)      f32   initial hidden state
    w_h_ref : (H, 5H)     f32   [w_ha | w_hp1 | w_hp2 | 0.5*w_fh | w_gh]
    w_un_ref: (H, 2H)     f32   [0.5*w_fu | w_gu]
    w_i3_ref: (3, H)      f32   rows: w_ia, w_ip1, w_ip2
    b3_ref  : (1, 3H)     f32   folded biases [b_a | b_p1 | b_p2]
    b_fg_ref: (1, 2H)     f32   folded biases [0.5*b_f | b_g]
    out_ref : (T, B, H)   f32   hidden state after every step
    pre_ref : (T, B, 3H)  f32   VMEM scratch for h-independent contributions
    """
    T = seq_ref.shape[0]
    H = h0_ref.shape[1]

    # ---- one-time precompute of all h-independent terms (vectorised over T) ----
    seq = seq_ref[...]                              # (T, B, 2)
    x = seq[:, :, 0:1]                              # (T, B, 1)
    theta = seq[:, :, 1:2]                          # (T, B, 1)
    w_ia = w_i3_ref[0:1, :]                         # (1, H)
    w_ip1 = w_i3_ref[1:2, :]
    w_ip2 = w_i3_ref[2:3, :]
    pre = jnp.concatenate(
        [x * w_ia, jnp.cos(theta) * w_ip1, jnp.sin(theta) * w_ip2], axis=-1)
    pre_ref[...] = pre + b3_ref[...]                # (T, B, 3H)

    # Parameters loaded once; they stay on-chip across the whole time loop.
    w_h = w_h_ref[...]                              # (H, 5H)
    w_un = w_un_ref[...]                            # (H, 2H)
    b_fg = b_fg_ref[...]                            # (1, 2H)

    def step(t, h):
        # All five hidden->gate projections in ONE MXU matmul.
        h5 = jnp.dot(h, w_h, preferred_element_type=jnp.float32)      # (B, 5H)

        # a, p1, p2 share a single fused tanh pass over (B, 3H).
        g3 = jnp.tanh(h5[:, : 3 * H] + pre_ref[t])                    # (B, 3H)
        q3 = g3 * (1.0 - g3)                                          # g*(1-g)
        un = q3[:, 0:H] * q3[:, H:2 * H] * q3[:, 2 * H:3 * H]          # (B, H)

        # Both un-projections in ONE MXU matmul; sigmoid(f) folded into the
        # same tanh pass via sigmoid(z) = 0.5*(1 + tanh(z/2)) (weights/bias of
        # the f column were pre-scaled by 0.5 at pack time).
        u2 = jnp.dot(un, w_un, preferred_element_type=jnp.float32)     # (B, 2H)
        t2 = jnp.tanh(u2 + h5[:, 3 * H:] + b_fg)                       # (B, 2H)
        tf = t2[:, 0:H]                                                # tanh(z_f/2)
        g = t2[:, H:2 * H]

        # f = 0.5*(1+tf)  =>  f*h + (1-f)*g == 0.5*((h+g) + tf*(h-g))
        h_new = 0.5 * ((h + g) + tf * (h - g))
        out_ref[t] = h_new.astype(out_ref.dtype)
        return h_new

    lax.fori_loop(0, T, step, h0_ref[...].astype(jnp.float32), unroll=unroll)


def pack_params(p):
    """Fuse weights / fold biases once at param-prep time.

    The f-gate weights/bias are pre-scaled by 0.5 so that the in-kernel tanh
    computes tanh(z_f / 2), letting sigmoid be evaluated as 0.5*(1 + tanh)."""
    w_h = jnp.concatenate(
        [p["w_ha"], p["w_hp1"], p["w_hp2"], 0.5 * p["w_fh"], p["w_gh"]],
        axis=1)                                                       # (H, 5H)
    w_un = jnp.concatenate([0.5 * p["w_fu"], p["w_gu"]], axis=1)       # (H, 2H)
    w_i3 = jnp.concatenate([p["w_ia"], p["w_ip1"], p["w_ip2"]], axis=0)  # (3, H)
    b3 = jnp.concatenate(
        [p["b_ia"] + p["b_ha"],
         p["b_ip1"] + p["b_hp1"],
         p["b_ip2"] + p["b_hp2"]], axis=1)                             # (1, 3H)
    b_fg = jnp.concatenate(
        [0.5 * (p["b_fu"] + p["b_fh"]),
         p["b_gu"] + p["b_gh"]], axis=1)                               # (1, 2H)
    return w_h, w_un, w_i3, b3, b_fg


@jax.jit
def custom_gru_sequence(seq, h0, params):
    """seq: (T, B, 2), h0: (B, H)  ->  (T, B, H) hidden states for every step."""
    T, B, _ = seq.shape
    H = h0.shape[1]
    w_h, w_un, w_i3, b3, b_fg = pack_params(params)
    args = (seq, h0, w_h, w_un, w_i3, b3, b_fg)

    # Fully unroll short fixed sequences (LLO scheduler visibility across
    # steps); fall back to a rolled loop for long sequences.
    unroll = True if T <= 16 else False
    kernel = partial(_gru_seq_kernel, unroll=unroll)

    # Single grid point; the whole problem lives in VMEM.
    # NOTE: for many independent sequences, add a leading "parallel" grid axis
    # over sequences — a single sequence is inherently serial.
    return pl.pallas_call(
        kernel,
        out_shape=jax.ShapeDtypeStruct((T, B, H), jnp.float32),
        in_specs=[pl.BlockSpec(memory_space=pltpu.VMEM) for _ in args],
        out_specs=pl.BlockSpec(memory_space=pltpu.VMEM),
        scratch_shapes=[pltpu.VMEM((T, B, 3 * H), jnp.float32)],
    )(*args)


def xavier_uniform(key, fan_in, fan_out):
    # matches torch.nn.init.xavier_uniform_ (gain=1), stored as (in, out)
    bound = math.sqrt(6.0 / (fan_in + fan_out))
    return jax.random.uniform(key, (fan_in, fan_out), jnp.float32, -bound, bound)


def init_params(key, hidden_size):
    names_fanin = [
        ("ia", 1), ("ha", hidden_size),
        ("ip1", 1), ("hp1", hidden_size),
        ("ip2", 1), ("hp2", hidden_size),
        ("fu", hidden_size), ("fh", hidden_size),
        ("gu", hidden_size), ("gh", hidden_size),
    ]
    keys = jax.random.split(key, len(names_fanin))
    params = {}
    for k, (name, fan_in) in zip(keys, names_fanin):
        params[f"w_{name}"] = xavier_uniform(k, fan_in, hidden_size)
        params[f"b_{name}"] = jnp.zeros((1, hidden_size), jnp.float32)
    return params


def custom_gru_step_reference(inp, h, p):
    """Pure-JAX reference of the PyTorch forward (one step, unfused params)."""
    x = inp[:, 0:1]
    theta = inp[:, 1:2]
    a = jnp.tanh(x @ p["w_ia"] + p["b_ia"] + h @ p["w_ha"] + p["b_ha"])
    p1 = jnp.tanh(jnp.cos(theta) @ p["w_ip1"] + p["b_ip1"] + h @ p["w_hp1"] + p["b_hp1"])
    p2 = jnp.tanh(jnp.sin(theta) @ p["w_ip2"] + p["b_ip2"] + h @ p["w_hp2"] + p["b_hp2"])
    un = a * p1 * p2 * (1 - a) * (1 - p1) * (1 - p2)
    f = jax.nn.sigmoid(un @ p["w_fu"] + p["b_fu"] + h @ p["w_fh"] + p["b_fh"])
    g = jnp.tanh(un @ p["w_gu"] + p["b_gu"] + h @ p["w_gh"] + p["b_gh"])
    return f * h + (1 - f) * g


if __name__ == "__main__":
    T, B, H = 8, 8, 32
    root = jax.random.PRNGKey(0)
    k_seq, k_hid, k_par = jax.random.split(root, 3)

    seq = jax.random.normal(k_seq, (T, B, 2), jnp.float32)   # [:,:,0]=x, [:,:,1]=theta
    h0 = jax.random.normal(k_hid, (B, H), jnp.float32)
    params = init_params(k_par, H)

    out = custom_gru_sequence(seq, h0, params)
    out = jax.block_until_ready(out)

    # Reference: apply the original (unfused) single-step forward T times.
    h = h0
    refs = []
    for t in range(T):
        h = custom_gru_step_reference(seq[t], h, params)
        refs.append(h)
    ref = jnp.stack(refs, axis=0)

    assert out.shape == (T, B, H)
    assert jnp.allclose(out, ref, atol=1e-4, rtol=1e-4), float(jnp.max(jnp.abs(out - ref)))

    print("KERNEL_OK")
</pallas_src>

<mosaic_0001>
module attributes {stable_mosaic.version = 11 : i64} {
  func.func @_gru_seq_kernel(%arg0: memref<8x8x2xf32, #tpu.memory_space<vmem>>, %arg1: memref<8x32xf32, #tpu.memory_space<vmem>>, %arg2: memref<32x160xf32, #tpu.memory_space<vmem>>, %arg3: memref<32x64xf32, #tpu.memory_space<vmem>>, %arg4: memref<3x32xf32, #tpu.memory_space<vmem>>, %arg5: memref<1x96xf32, #tpu.memory_space<vmem>>, %arg6: memref<1x64xf32, #tpu.memory_space<vmem>>, %arg7: memref<8x8x32xf32, #tpu.memory_space<vmem>>, %arg8: memref<8x8x96xf32, #tpu.memory_space<vmem>>) attributes {dimension_semantics = [], scalar_prefetch = 0 : i64, scratch_operands = 1 : i64, tpu.core_type = #tpu.core_type<tc>} {
    %c0 = arith.constant 0 : index
    %c0_0 = arith.constant 0 : index
    %c0_1 = arith.constant 0 : index
    %0 = vector.load %arg0[%c0, %c0_0, %c0_1] : memref<8x8x2xf32, #tpu.memory_space<vmem>>, vector<8x8x2xf32>
    %1 = vector.extract_strided_slice %0 {offsets = [0, 0, 0], sizes = [8, 8, 1], strides = [1, 1, 1]} : vector<8x8x2xf32> to vector<8x8x1xf32>
    %2 = vector.extract_strided_slice %0 {offsets = [0, 0, 1], sizes = [8, 8, 1], strides = [1, 1, 1]} : vector<8x8x2xf32> to vector<8x8x1xf32>
    %c0_2 = arith.constant 0 : index
    %c0_3 = arith.constant 0 : index
    %3 = vector.load %arg4[%c0_2, %c0_3] : memref<3x32xf32, #tpu.memory_space<vmem>>, vector<1x32xf32>
    %c1 = arith.constant 1 : index
    %c0_4 = arith.constant 0 : index
    %4 = vector.load %arg4[%c1, %c0_4] : memref<3x32xf32, #tpu.memory_space<vmem>>, vector<1x32xf32>
    %c2 = arith.constant 2 : index
    %c0_5 = arith.constant 0 : index
    %5 = vector.load %arg4[%c2, %c0_5] : memref<3x32xf32, #tpu.memory_space<vmem>>, vector<1x32xf32>
    %6 = vector.shape_cast %3 : vector<1x32xf32> to vector<1x1x32xf32>
    %7 = vector.broadcast %1 : vector<8x8x1xf32> to vector<8x8x32xf32>
    %8 = vector.broadcast %6 : vector<1x1x32xf32> to vector<8x8x32xf32>
    %9 = arith.mulf %7, %8 : vector<8x8x32xf32>
    %10 = math.cos %2 : vector<8x8x1xf32>
    %11 = vector.shape_cast %4 : vector<1x32xf32> to vector<1x1x32xf32>
    %12 = vector.broadcast %10 : vector<8x8x1xf32> to vector<8x8x32xf32>
    %13 = vector.broadcast %11 : vector<1x1x32xf32> to vector<8x8x32xf32>
    %14 = arith.mulf %12, %13 : vector<8x8x32xf32>
    %15 = math.sin %2 : vector<8x8x1xf32>
    %16 = vector.shape_cast %5 : vector<1x32xf32> to vector<1x1x32xf32>
    %17 = vector.broadcast %15 : vector<8x8x1xf32> to vector<8x8x32xf32>
    %18 = vector.broadcast %16 : vector<1x1x32xf32> to vector<8x8x32xf32>
    %19 = arith.mulf %17, %18 : vector<8x8x32xf32>
    %20 = tpu.concatenate %9, %14, %19 in 2 : vector<8x8x32xf32>, vector<8x8x32xf32>, vector<8x8x32xf32> -> vector<8x8x96xf32>
    %c0_6 = arith.constant 0 : index
    %c0_7 = arith.constant 0 : index
    %21 = vector.load %arg5[%c0_6, %c0_7] : memref<1x96xf32, #tpu.memory_space<vmem>>, vector<1x96xf32>
    %22 = vector.shape_cast %21 : vector<1x96xf32> to vector<1x1x96xf32>
    %23 = vector.broadcast %22 : vector<1x1x96xf32> to vector<8x8x96xf32>
    %24 = arith.addf %20, %23 : vector<8x8x96xf32>
    %c0_8 = arith.constant 0 : index
    %c0_9 = arith.constant 0 : index
    %c0_10 = arith.constant 0 : index
    %25 = vector.load %arg8[%c0_8, %c0_9, %c0_10] : memref<8x8x96xf32, #tpu.memory_space<vmem>>, vector<8x8x96xf32>
    tpu.vector_store %arg8[%c0_8, %c0_9, %c0_10], %24 {strides = array<i32>} : memref<8x8x96xf32, #tpu.memory_space<vmem>>, vector<8x8x96xf32>,
    %c0_11 = arith.constant 0 : index
    %c0_12 = arith.constant 0 : index
    %26 = vector.load %arg2[%c0_11, %c0_12] : memref<32x160xf32, #tpu.memory_space<vmem>>, vector<32x160xf32>
    %c0_13 = arith.constant 0 : index
    %c0_14 = arith.constant 0 : index
    %27 = vector.load %arg3[%c0_13, %c0_14] : memref<32x64xf32, #tpu.memory_space<vmem>>, vector<32x64xf32>
    %c0_15 = arith.constant 0 : index
    %c0_16 = arith.constant 0 : index
    %28 = vector.load %arg6[%c0_15, %c0_16] : memref<1x64xf32, #tpu.memory_space<vmem>>, vector<1x64xf32>
    %c0_17 = arith.constant 0 : index
    %c0_18 = arith.constant 0 : index
    %29 = vector.load %arg1[%c0_17, %c0_18] : memref<8x32xf32, #tpu.memory_space<vmem>>, vector<8x32xf32>
    %c0_i32 = arith.constant 0 : i32
    %cst = arith.constant dense<0.000000e+00> : vector<8x160xf32>
    %30 = tpu.matmul %29, %26, %cst {dimension_numbers = #tpu.dot_dimension_numbers<[1], [0], [0], [1], [0, 0, 1, 1], [], []>} : vector<8x32xf32>, vector<32x160xf32>, vector<8x160xf32> -> vector<8x160xf32>
    %31 = vector.extract_strided_slice %30 {offsets = [0, 0], sizes = [8, 96], strides = [1, 1]} : vector<8x160xf32> to vector<8x96xf32>
    %32 = arith.index_cast %c0_i32 : i32 to index
    %c0_19 = arith.constant 0 : index
    %c0_20 = arith.constant 0 : index
    %33 = vector.load %arg8[%32, %c0_19, %c0_20] : memref<8x8x96xf32, #tpu.memory_space<vmem>>, vector<1x8x96xf32>
    %34 = vector.shape_cast %33 : vector<1x8x96xf32> to vector<8x96xf32>
    %35 = arith.addf %31, %34 : vector<8x96xf32>
    %36 = math.tanh %35 : vector<8x96xf32>
    %cst_21 = arith.constant 1.000000e+00 : f32
    %37 = vector.broadcast %cst_21 : f32 to vector<8x96xf32>
    %38 = arith.subf %37, %36 : vector<8x96xf32>
    %39 = arith.mulf %36, %38 : vector<8x96xf32>
    %40 = vector.extract_strided_slice %39 {offsets = [0, 0], sizes = [8, 32], strides = [1, 1]} : vector<8x96xf32> to vector<8x32xf32>
    %41 = vector.extract_strided_slice %39 {offsets = [0, 32], sizes = [8, 32], strides = [1, 1]} : vector<8x96xf32> to vector<8x32xf32>
    %42 = arith.mulf %40, %41 : vector<8x32xf32>
    %43 = vector.extract_strided_slice %39 {offsets = [0, 64], sizes = [8, 32], strides = [1, 1]} : vector<8x96xf32> to vector<8x32xf32>
    %44 = arith.mulf %42, %43 : vector<8x32xf32>
    %cst_22 = arith.constant dense<0.000000e+00> : vector<8x64xf32>
    %45 = tpu.matmul %44, %27, %cst_22 {dimension_numbers = #tpu.dot_dimension_numbers<[1], [0], [0], [1], [0, 0, 1, 1], [], []>} : vector<8x32xf32>, vector<32x64xf32>, vector<8x64xf32> -> vector<8x64xf32>
    %46 = vector.extract_strided_slice %30 {offsets = [0, 96], sizes = [8, 64], strides = [1, 1]} : vector<8x160xf32> to vector<8x64xf32>
    %47 = arith.addf %45, %46 : vector<8x64xf32>
    %48 = vector.broadcast %28 : vector<1x64xf32> to vector<8x64xf32>
    %49 = arith.addf %47, %48 : vector<8x64xf32>
    %50 = math.tanh %49 : vector<8x64xf32>
    %51 = vector.extract_strided_slice %50 {offsets = [0, 0], sizes = [8, 32], strides = [1, 1]} : vector<8x64xf32> to vector<8x32xf32>
    %52 = vector.extract_strided_slice %50 {offsets = [0, 32], sizes = [8, 32], strides = [1, 1]} : vector<8x64xf32> to vector<8x32xf32>
    %53 = arith.addf %29, %52 : vector<8x32xf32>
    %54 = arith.subf %29, %52 : vector<8x32xf32>
    %55 = arith.mulf %51, %54 : vector<8x32xf32>
    %56 = arith.addf %53, %55 : vector<8x32xf32>
    %cst_23 = arith.constant 5.000000e-01 : f32
    %57 = vector.broadcast %cst_23 : f32 to vector<8x32xf32>
    %58 = arith.mulf %57, %56 : vector<8x32xf32>
    %59 = arith.index_cast %c0_i32 : i32 to index
    %c0_24 = arith.constant 0 : index
    %c0_25 = arith.constant 0 : index
    %60 = vector.load %arg7[%59, %c0_24, %c0_25] : memref<8x8x32xf32, #tpu.memory_space<vmem>>, vector<1x8x32xf32>
    %61 = vector.shape_cast %60 : vector<1x8x32xf32> to vector<8x32xf32>
    %62 = vector.shape_cast %58 : vector<8x32xf32> to vector<1x8x32xf32>
    tpu.vector_store %arg7[%59, %c0_24, %c0_25], %62 {strides = array<i32>} : memref<8x8x32xf32, #tpu.memory_space<vmem>>, vector<1x8x32xf32>,
    %c1_i32 = arith.constant 1 : i32
    %cst_26 = arith.constant dense<0.000000e+00> : vector<8x160xf32>
    %63 = tpu.matmul %58, %26, %cst_26 {dimension_numbers = #tpu.dot_dimension_numbers<[1], [0], [0], [1], [0, 0, 1, 1], [], []>} : vector<8x32xf32>, vector<32x160xf32>, vector<8x160xf32> -> vector<8x160xf32>
    %64 = vector.extract_strided_slice %63 {offsets = [0, 0], sizes = [8, 96], strides = [1, 1]} : vector<8x160xf32> to vector<8x96xf32>
    %65 = arith.index_cast %c1_i32 : i32 to index
    %c0_27 = arith.constant 0 : index
    %c0_28 = arith.constant 0 : index
    %66 = vector.load %arg8[%65, %c0_27, %c0_28] : memref<8x8x96xf32, #tpu.memory_space<vmem>>, vector<1x8x96xf32>
    %67 = vector.shape_cast %66 : vector<1x8x96xf32> to vector<8x96xf32>
    %68 = arith.addf %64, %67 : vector<8x96xf32>
    %69 = math.tanh %68 : vector<8x96xf32>
    %cst_29 = arith.constant 1.000000e+00 : f32
    %70 = vector.broadcast %cst_29 : f32 to vector<8x96xf32>
    %71 = arith.subf %70, %69 : vector<8x96xf32>
    %72 = arith.mulf %69, %71 : vector<8x96xf32>
    %73 = vector.extract_strided_slice %72 {offsets = [0, 0], sizes = [8, 32], strides = [1, 1]} : vector<8x96xf32> to vector<8x32xf32>
    %74 = vector.extract_strided_slice %72 {offsets = [0, 32], sizes = [8, 32], strides = [1, 1]} : vector<8x96xf32> to vector<8x32xf32>
    %75 = arith.mulf %73, %74 : vector<8x32xf32>
    %76 = vector.extract_strided_slice %72 {offsets = [0, 64], sizes = [8, 32], strides = [1, 1]} : vector<8x96xf32> to vector<8x32xf32>
    %77 = arith.mulf %75, %76 : vector<8x32xf32>
    %cst_30 = arith.constant dense<0.000000e+00> : vector<8x64xf32>
    %78 = tpu.matmul %77, %27, %cst_30 {dimension_numbers = #tpu.dot_dimension_numbers<[1], [0], [0], [1], [0, 0, 1, 1], [], []>} : vector<8x32xf32>, vector<32x64xf32>, vector<8x64xf32> -> vector<8x64xf32>
    %79 = vector.extract_strided_slice %63 {offsets = [0, 96], sizes = [8, 64], strides = [1, 1]} : vector<8x160xf32> to vector<8x64xf32>
    %80 = arith.addf %78, %79 : vector<8x64xf32>
    %81 = vector.broadcast %28 : vector<1x64xf32> to vector<8x64xf32>
    %82 = arith.addf %80, %81 : vector<8x64xf32>
    %83 = math.tanh %82 : vector<8x64xf32>
    %84 = vector.extract_strided_slice %83 {offsets = [0, 0], sizes = [8, 32], strides = [1, 1]} : vector<8x64xf32> to vector<8x32xf32>
    %85 = vector.extract_strided_slice %83 {offsets = [0, 32], sizes = [8, 32], strides = [1, 1]} : vector<8x64xf32> to vector<8x32xf32>
    %86 = arith.addf %58, %85 : vector<8x32xf32>
    %87 = arith.subf %58, %85 : vector<8x32xf32>
    %88 = arith.mulf %84, %87 : vector<8x32xf32>
    %89 = arith.addf %86, %88 : vector<8x32xf32>
    %cst_31 = arith.constant 5.000000e-01 : f32
    %90 = vector.broadcast %cst_31 : f32 to vector<8x32xf32>
    %91 = arith.mulf %90, %89 : vector<8x32xf32>
    %92 = arith.index_cast %c1_i32 : i32 to index
    %c0_32 = arith.constant 0 : index
    %c0_33 = arith.constant 0 : index
    %93 = vector.load %arg7[%92, %c0_32, %c0_33] : memref<8x8x32xf32, #tpu.memory_space<vmem>>, vector<1x8x32xf32>
    %94 = vector.shape_cast %93 : vector<1x8x32xf32> to vector<8x32xf32>
    %95 = vector.shape_cast %91 : vector<8x32xf32> to vector<1x8x32xf32>
    tpu.vector_store %arg7[%92, %c0_32, %c0_33], %95 {strides = array<i32>} : memref<8x8x32xf32, #tpu.memory_space<vmem>>, vector<1x8x32xf32>,
    %c2_i32 = arith.constant 2 : i32
    %cst_34 = arith.constant dense<0.000000e+00> : vector<8x160xf32>
    %96 = tpu.matmul %91, %26, %cst_34 {dimension_numbers = #tpu.dot_dimension_numbers<[1], [0], [0], [1], [0, 0, 1, 1], [], []>} : vector<8x32xf32>, vector<32x160xf32>, vector<8x160xf32> -> vector<8x160xf32>
    %97 = vector.extract_strided_slice %96 {offsets = [0, 0], sizes = [8, 96], strides = [1, 1]} : vector<8x160xf32> to vector<8x96xf32>
    %98 = arith.index_cast %c2_i32 : i32 to index
    %c0_35 = arith.constant 0 : index
    %c0_36 = arith.constant 0 : index
    %99 = vector.load %arg8[%98, %c0_35, %c0_36] : memref<8x8x96xf32, #tpu.memory_space<vmem>>, vector<1x8x96xf32>
    %100 = vector.shape_cast %99 : vector<1x8x96xf32> to vector<8x96xf32>
    %101 = arith.addf %97, %100 : vector<8x96xf32>
    %102 = math.tanh %101 : vector<8x96xf32>
    %cst_37 = arith.constant 1.000000e+00 : f32
    %103 = vector.broadcast %cst_37 : f32 to vector<8x96xf32>
    %104 = arith.subf %103, %102 : vector<8x96xf32>
    %105 = arith.mulf %102, %104 : vector<8x96xf32>
    %106 = vector.extract_strided_slice %105 {offsets = [0, 0], sizes = [8, 32], strides = [1, 1]} : vector<8x96xf32> to vector<8x32xf32>
    %107 = vector.extract_strided_slice %105 {offsets = [0, 32], sizes = [8, 32], strides = [1, 1]} : vector<8x96xf32> to vector<8x32xf32>
    %108 = arith.mulf %106, %107 : vector<8x32xf32>
    %109 = vector.extract_strided_slice %105 {offsets = [0, 64], sizes = [8, 32], strides = [1, 1]} : vector<8x96xf32> to vector<8x32xf32>
    %110 = arith.mulf %108, %109 : vector<8x32xf32>
    %cst_38 = arith.constant dense<0.000000e+00> : vector<8x64xf32>
    %111 = tpu.matmul %110, %27, %cst_38 {dimension_numbers = #tpu.dot_dimension_numbers<[1], [0], [0], [1], [0, 0, 1, 1], [], []>} : vector<8x32xf32>, vector<32x64xf32>, vector<8x64xf32> -> vector<8x64xf32>
    %112 = vector.extract_strided_slice %96 {offsets = [0, 96], sizes = [8, 64], strides = [1, 1]} : vector<8x160xf32> to vector<8x64xf32>
    %113 = arith.addf %111, %112 : vector<8x64xf32>
    %114 = vector.broadcast %28 : vector<1x64xf32> to vector<8x64xf32>
    %115 = arith.addf %113, %114 : vector<8x64xf32>
    %116 = math.tanh %115 : vector<8x64xf32>
    %117 = vector.extract_strided_slice %116 {offsets = [0, 0], sizes = [8, 32], strides = [1, 1]} : vector<8x64xf32> to vector<8x32xf32>
    %118 = vector.extract_strided_slice %116 {offsets = [0, 32], sizes = [8, 32], strides = [1, 1]} : vector<8x64xf32> to vector<8x32xf32>
    %119 = arith.addf %91, %118 : vector<8x32xf32>
    %120 = arith.subf %91, %118 : vector<8x32xf32>
    %121 = arith.mulf %117, %120 : vector<8x32xf32>
    %122 = arith.addf %119, %121 : vector<8x32xf32>
    %cst_39 = arith.constant 5.000000e-01 : f32
    %123 = vector.broadcast %cst_39 : f32 to vector<8x32xf32>
    %124 = arith.mulf %123, %122 : vector<8x32xf32>
    %125 = arith.index_cast %c2_i32 : i32 to index
    %c0_40 = arith.constant 0 : index
    %c0_41 = arith.constant 0 : index
    %126 = vector.load %arg7[%125, %c0_40, %c0_41] : memref<8x8x32xf32, #tpu.memory_space<vmem>>, vector<1x8x32xf32>
    %127 = vector.shape_cast %126 : vector<1x8x32xf32> to vector<8x32xf32>
    %128 = vector.shape_cast %124 : vector<8x32xf32> to vector<1x8x32xf32>
    tpu.vector_store %arg7[%125, %c0_40, %c0_41], %128 {strides = array<i32>} : memref<8x8x32xf32, #tpu.memory_space<vmem>>, vector<1x8x32xf32>,
    %c3_i32 = arith.constant 3 : i32
    %cst_42 = arith.constant dense<0.000000e+00> : vector<8x160xf32>
    %129 = tpu.matmul %124, %26, %cst_42 {dimension_numbers = #tpu.dot_dimension_numbers<[1], [0], [0], [1], [0, 0, 1, 1], [], []>} : vector<8x32xf32>, vector<32x160xf32>, vector<8x160xf32> -> vector<8x160xf32>
    %130 = vector.extract_strided_slice %129 {offsets = [0, 0], sizes = [8, 96], strides = [1, 1]} : vector<8x160xf32> to vector<8x96xf32>
    %131 = arith.index_cast %c3_i32 : i32 to index
    %c0_43 = arith.constant 0 : index
    %c0_44 = arith.constant 0 : index
    %132 = vector.load %arg8[%131, %c0_43, %c0_44] : memref<8x8x96xf32, #tpu.memory_space<vmem>>, vector<1x8x96xf32>
    %133 = vector.shape_cast %132 : vector<1x8x96xf32> to vector<8x96xf32>
    %134 = arith.addf %130, %133 : vector<8x96xf32>
    %135 = math.tanh %134 : vector<8x96xf32>
    %cst_45 = arith.constant 1.000000e+00 : f32
    %136 = vector.broadcast %cst_45 : f32 to vector<8x96xf32>
    %137 = arith.subf %136, %135 : vector<8x96xf32>
    %138 = arith.mulf %135, %137 : vector<8x96xf32>
    %139 = vector.extract_strided_slice %138 {offsets = [0, 0], sizes = [8, 32], strides = [1, 1]} : vector<8x96xf32> to vector<8x32xf32>
    %140 = vector.extract_strided_slice %138 {offsets = [0, 32], sizes = [8, 32], strides = [1, 1]} : vector<8x96xf32> to vector<8x32xf32>
    %141 = arith.mulf %139, %140 : vector<8x32xf32>
    %142 = vector.extract_strided_slice %138 {offsets = [0, 64], sizes = [8, 32], strides = [1, 1]} : vector<8x96xf32> to vector<8x32xf32>
    %143 = arith.mulf %141, %142 : vector<8x32xf32>
    %cst_46 = arith.constant dense<0.000000e+00> : vector<8x64xf32>
    %144 = tpu.matmul %143, %27, %cst_46 {dimension_numbers = #tpu.dot_dimension_numbers<[1], [0], [0], [1], [0, 0, 1, 1], [], []>} : vector<8x32xf32>, vector<32x64xf32>, vector<8x64xf32> -> vector<8x64xf32>
    %145 = vector.extract_strided_slice %129 {offsets = [0, 96], sizes = [8, 64], strides = [1, 1]} : vector<8x160xf32> to vector<8x64xf32>
    %146 = arith.addf %144, %145 : vector<8x64xf32>
    %147 = vector.broadcast %28 : vector<1x64xf32> to vector<8x64xf32>
    %148 = arith.addf %146, %147 : vector<8x64xf32>
    %149 = math.tanh %148 : vector<8x64xf32>
    %150 = vector.extract_strided_slice %149 {offsets = [0, 0], sizes = [8, 32], strides = [1, 1]} : vector<8x64xf32> to vector<8x32xf32>
    %151 = vector.extract_strided_slice %149 {offsets = [0, 32], sizes = [8, 32], strides = [1, 1]} : vector<8x64xf32> to vector<8x32xf32>
    %152 = arith.addf %124, %151 : vector<8x32xf32>
    %153 = arith.subf %124, %151 : vector<8x32xf32>
    %154 = arith.mulf %150, %153 : vector<8x32xf32>
    %155 = arith.addf %152, %154 : vector<8x32xf32>
    %cst_47 = arith.constant 5.000000e-01 : f32
    %156 = vector.broadcast %cst_47 : f32 to vector<8x32xf32>
    %157 = arith.mulf %156, %155 : vector<8x32xf32>
    %158 = arith.index_cast %c3_i32 : i32 to index
    %c0_48 = arith.constant 0 : index
    %c0_49 = arith.constant 0 : index
    %159 = vector.load %arg7[%158, %c0_48, %c0_49] : memref<8x8x32xf32, #tpu.memory_space<vmem>>, vector<1x8x32xf32>
    %160 = vector.shape_cast %159 : vector<1x8x32xf32> to vector<8x32xf32>
    %161 = vector.shape_cast %157 : vector<8x32xf32> to vector<1x8x32xf32>
    tpu.vector_store %arg7[%158, %c0_48, %c0_49], %161 {strides = array<i32>} : memref<8x8x32xf32, #tpu.memory_space<vmem>>, vector<1x8x32xf32>,
    %c4_i32 = arith.constant 4 : i32
    %cst_50 = arith.constant dense<0.000000e+00> : vector<8x160xf32>
    %162 = tpu.matmul %157, %26, %cst_50 {dimension_numbers = #tpu.dot_dimension_numbers<[1], [0], [0], [1], [0, 0, 1, 1], [], []>} : vector<8x32xf32>, vector<32x160xf32>, vector<8x160xf32> -> vector<8x160xf32>
    %163 = vector.extract_strided_slice %162 {offsets = [0, 0], sizes = [8, 96], strides = [1, 1]} : vector<8x160xf32> to vector<8x96xf32>
    %164 = arith.index_cast %c4_i32 : i32 to index
    %c0_51 = arith.constant 0 : index
    %c0_52 = arith.constant 0 : index
    %165 = vector.load %arg8[%164, %c0_51, %c0_52] : memref<8x8x96xf32, #tpu.memory_space<vmem>>, vector<1x8x96xf32>
    %166 = vector.shape_cast %165 : vector<1x8x96xf32> to vector<8x96xf32>
    %167 = arith.addf %163, %166 : vector<8x96xf32>
    %168 = math.tanh %167 : vector<8x96xf32>
    %cst_53 = arith.constant 1.000000e+00 : f32
    %169 = vector.broadcast %cst_53 : f32 to vector<8x96xf32>
    %170 = arith.subf %169, %168 : vector<8x96xf32>
    %171 = arith.mulf %168, %170 : vector<8x96xf32>
    %172 = vector.extract_strided_slice %171 {offsets = [0, 0], sizes = [8, 32], strides = [1, 1]} : vector<8x96xf32> to vector<8x32xf32>
    %173 = vector.extract_strided_slice %171 {offsets = [0, 32], sizes = [8, 32], strides = [1, 1]} : vector<8x96xf32> to vector<8x32xf32>
    %174 = arith.mulf %172, %173 : vector<8x32xf32>
    %175 = vector.extract_strided_slice %171 {offsets = [0, 64], sizes = [8, 32], strides = [1, 1]} : vector<8x96xf32> to vector<8x32xf32>
    %176 = arith.mulf %174, %175 : vector<8x32xf32>
    %cst_54 = arith.constant dense<0.000000e+00> : vector<8x64xf32>
    %177 = tpu.matmul %176, %27, %cst_54 {dimension_numbers = #tpu.dot_dimension_numbers<[1], [0], [0], [1], [0, 0, 1, 1], [], []>} : vector<8x32xf32>, vector<32x64xf32>, vector<8x64xf32> -> vector<8x64xf32>
    %178 = vector.extract_strided_slice %162 {offsets = [0, 96], sizes = [8, 64], strides = [1, 1]} : vector<8x160xf32> to vector<8x64xf32>
    %179 = arith.addf %177, %178 : vector<8x64xf32>
    %180 = vector.broadcast %28 : vector<1x64xf32> to vector<8x64xf32>
    %181 = arith.addf %179, %180 : vector<8x64xf32>
    %182 = math.tanh %181 : vector<8x64xf32>
    %183 = vector.extract_strided_slice %182 {offsets = [0, 0], sizes = [8, 32], strides = [1, 1]} : vector<8x64xf32> to vector<8x32xf32>
    %184 = vector.extract_strided_slice %182 {offsets = [0, 32], sizes = [8, 32], strides = [1, 1]} : vector<8x64xf32> to vector<8x32xf32>
    %185 = arith.addf %157, %184 : vector<8x32xf32>
    %186 = arith.subf %157, %184 : vector<8x32xf32>
    %187 = arith.mulf %183, %186 : vector<8x32xf32>
    %188 = arith.addf %185, %187 : vector<8x32xf32>
    %cst_55 = arith.constant 5.000000e-01 : f32
    %189 = vector.broadcast %cst_55 : f32 to vector<8x32xf32>
    %190 = arith.mulf %189, %188 : vector<8x32xf32>
    %191 = arith.index_cast %c4_i32 : i32 to index
    %c0_56 = arith.constant 0 : index
    %c0_57 = arith.constant 0 : index
    %192 = vector.load %arg7[%191, %c0_56, %c0_57] : memref<8x8x32xf32, #tpu.memory_space<vmem>>, vector<1x8x32xf32>
    %193 = vector.shape_cast %192 : vector<1x8x32xf32> to vector<8x32xf32>
    %194 = vector.shape_cast %190 : vector<8x32xf32> to vector<1x8x32xf32>
    tpu.vector_store %arg7[%191, %c0_56, %c0_57], %194 {strides = array<i32>} : memref<8x8x32xf32, #tpu.memory_space<vmem>>, vector<1x8x32xf32>,
    %c5_i32 = arith.constant 5 : i32
    %cst_58 = arith.constant dense<0.000000e+00> : vector<8x160xf32>
    %195 = tpu.matmul %190, %26, %cst_58 {dimension_numbers = #tpu.dot_dimension_numbers<[1], [0], [0], [1], [0, 0, 1, 1], [], []>} : vector<8x32xf32>, vector<32x160xf32>, vector<8x160xf32> -> vector<8x160xf32>
    %196 = vector.extract_strided_slice %195 {offsets = [0, 0], sizes = [8, 96], strides = [1, 1]} : vector<8x160xf32> to vector<8x96xf32>
    %197 = arith.index_cast %c5_i32 : i32 to index
    %c0_59 = arith.constant 0 : index
    %c0_60 = arith.constant 0 : index
    %198 = vector.load %arg8[%197, %c0_59, %c0_60] : memref<8x8x96xf32, #tpu.memory_space<vmem>>, vector<1x8x96xf32>
    %199 = vector.shape_cast %198 : vector<1x8x96xf32> to vector<8x96xf32>
    %200 = arith.addf %196, %199 : vector<8x96xf32>
    %201 = math.tanh %200 : vector<8x96xf32>
    %cst_61 = arith.constant 1.000000e+00 : f32
    %202 = vector.broadcast %cst_61 : f32 to vector<8x96xf32>
    %203 = arith.subf %202, %201 : vector<8x96xf32>
    %204 = arith.mulf %201, %203 : vector<8x96xf32>
    %205 = vector.extract_strided_slice %204 {offsets = [0, 0], sizes = [8, 32], strides = [1, 1]} : vector<8x96xf32> to vector<8x32xf32>
    %206 = vector.extract_strided_slice %204 {offsets = [0, 32], sizes = [8, 32], strides = [1, 1]} : vector<8x96xf32> to vector<8x32xf32>
    %207 = arith.mulf %205, %206 : vector<8x32xf32>
    %208 = vector.extract_strided_slice %204 {offsets = [0, 64], sizes = [8, 32], strides = [1, 1]} : vector<8x96xf32> to vector<8x32xf32>
    %209 = arith.mulf %207, %208 : vector<8x32xf32>
    %cst_62 = arith.constant dense<0.000000e+00> : vector<8x64xf32>
    %210 = tpu.matmul %209, %27, %cst_62 {dimension_numbers = #tpu.dot_dimension_numbers<[1], [0], [0], [1], [0, 0, 1, 1], [], []>} : vector<8x32xf32>, vector<32x64xf32>, vector<8x64xf32> -> vector<8x64xf32>
    %211 = vector.extract_strided_slice %195 {offsets = [0, 96], sizes = [8, 64], strides = [1, 1]} : vector<8x160xf32> to vector<8x64xf32>
    %212 = arith.addf %210, %211 : vector<8x64xf32>
    %213 = vector.broadcast %28 : vector<1x64xf32> to vector<8x64xf32>
    %214 = arith.addf %212, %213 : vector<8x64xf32>
    %215 = math.tanh %214 : vector<8x64xf32>
    %216 = vector.extract_strided_slice %215 {offsets = [0, 0], sizes = [8, 32], strides = [1, 1]} : vector<8x64xf32> to vector<8x32xf32>
    %217 = vector.extract_strided_slice %215 {offsets = [0, 32], sizes = [8, 32], strides = [1, 1]} : vector<8x64xf32> to vector<8x32xf32>
    %218 = arith.addf %190, %217 : vector<8x32xf32>
    %219 = arith.subf %190, %217 : vector<8x32xf32>
    %220 = arith.mulf %216, %219 : vector<8x32xf32>
    %221 = arith.addf %218, %220 : vector<8x32xf32>
    %cst_63 = arith.constant 5.000000e-01 : f32
    %222 = vector.broadcast %cst_63 : f32 to vector<8x32xf32>
    %223 = arith.mulf %222, %221 : vector<8x32xf32>
    %224 = arith.index_cast %c5_i32 : i32 to index
    %c0_64 = arith.constant 0 : index
    %c0_65 = arith.constant 0 : index
    %225 = vector.load %arg7[%224, %c0_64, %c0_65] : memref<8x8x32xf32, #tpu.memory_space<vmem>>, vector<1x8x32xf32>
    %226 = vector.shape_cast %225 : vector<1x8x32xf32> to vector<8x32xf32>
    %227 = vector.shape_cast %223 : vector<8x32xf32> to vector<1x8x32xf32>
    tpu.vector_store %arg7[%224, %c0_64, %c0_65], %227 {strides = array<i32>} : memref<8x8x32xf32, #tpu.memory_space<vmem>>, vector<1x8x32xf32>,
    %c6_i32 = arith.constant 6 : i32
    %cst_66 = arith.constant dense<0.000000e+00> : vector<8x160xf32>
    %228 = tpu.matmul %223, %26, %cst_66 {dimension_numbers = #tpu.dot_dimension_numbers<[1], [0], [0], [1], [0, 0, 1, 1], [], []>} : vector<8x32xf32>, vector<32x160xf32>, vector<8x160xf32> -> vector<8x160xf32>
    %229 = vector.extract_strided_slice %228 {offsets = [0, 0], sizes = [8, 96], strides = [1, 1]} : vector<8x160xf32> to vector<8x96xf32>
    %230 = arith.index_cast %c6_i32 : i32 to index
    %c0_67 = arith.constant 0 : index
    %c0_68 = arith.constant 0 : index
    %231 = vector.load %arg8[%230, %c0_67, %c0_68] : memref<8x8x96xf32, #tpu.memory_space<vmem>>, vector<1x8x96xf32>
    %232 = vector.shape_cast %231 : vector<1x8x96xf32> to vector<8x96xf32>
    %233 = arith.addf %229, %232 : vector<8x96xf32>
    %234 = math.tanh %233 : vector<8x96xf32>
    %cst_69 = arith.constant 1.000000e+00 : f32
    %235 = vector.broadcast %cst_69 : f32 to vector<8x96xf32>
    %236 = arith.subf %235, %234 : vector<8x96xf32>
    %237 = arith.mulf %234, %236 : vector<8x96xf32>
    %238 = vector.extract_strided_slice %237 {offsets = [0, 0], sizes = [8, 32], strides = [1, 1]} : vector<8x96xf32> to vector<8x32xf32>
    %239 = vector.extract_strided_slice %237 {offsets = [0, 32], sizes = [8, 32], strides = [1, 1]} : vector<8x96xf32> to vector<8x32xf32>
    %240 = arith.mulf %238, %239 : vector<8x32xf32>
    %241 = vector.extract_strided_slice %237 {offsets = [0, 64], sizes = [8, 32], strides = [1, 1]} : vector<8x96xf32> to vector<8x32xf32>
    %242 = arith.mulf %240, %241 : vector<8x32xf32>
    %cst_70 = arith.constant dense<0.000000e+00> : vector<8x64xf32>
    %243 = tpu.matmul %242, %27, %cst_70 {dimension_numbers = #tpu.dot_dimension_numbers<[1], [0], [0], [1], [0, 0, 1, 1], [], []>} : vector<8x32xf32>, vector<32x64xf32>, vector<8x64xf32> -> vector<8x64xf32>
    %244 = vector.extract_strided_slice %228 {offsets = [0, 96], sizes = [8, 64], strides = [1, 1]} : vector<8x160xf32> to vector<8x64xf32>
    %245 = arith.addf %243, %244 : vector<8x64xf32>
    %246 = vector.broadcast %28 : vector<1x64xf32> to vector<8x64xf32>
    %247 = arith.addf %245, %246 : vector<8x64xf32>
    %248 = math.tanh %247 : vector<8x64xf32>
    %249 = vector.extract_strided_slice %248 {offsets = [0, 0], sizes = [8, 32], strides = [1, 1]} : vector<8x64xf32> to vector<8x32xf32>
    %250 = vector.extract_strided_slice %248 {offsets = [0, 32], sizes = [8, 32], strides = [1, 1]} : vector<8x64xf32> to vector<8x32xf32>
    %251 = arith.addf %223, %250 : vector<8x32xf32>
    %252 = arith.subf %223, %250 : vector<8x32xf32>
    %253 = arith.mulf %249, %252 : vector<8x32xf32>
    %254 = arith.addf %251, %253 : vector<8x32xf32>
    %cst_71 = arith.constant 5.000000e-01 : f32
    %255 = vector.broadcast %cst_71 : f32 to vector<8x32xf32>
    %256 = arith.mulf %255, %254 : vector<8x32xf32>
    %257 = arith.index_cast %c6_i32 : i32 to index
    %c0_72 = arith.constant 0 : index
    %c0_73 = arith.constant 0 : index
    %258 = vector.load %arg7[%257, %c0_72, %c0_73] : memref<8x8x32xf32, #tpu.memory_space<vmem>>, vector<1x8x32xf32>
    %259 = vector.shape_cast %258 : vector<1x8x32xf32> to vector<8x32xf32>
    %260 = vector.shape_cast %256 : vector<8x32xf32> to vector<1x8x32xf32>
    tpu.vector_store %arg7[%257, %c0_72, %c0_73], %260 {strides = array<i32>} : memref<8x8x32xf32, #tpu.memory_space<vmem>>, vector<1x8x32xf32>,
    %c7_i32 = arith.constant 7 : i32
    %cst_74 = arith.constant dense<0.000000e+00> : vector<8x160xf32>
    %261 = tpu.matmul %256, %26, %cst_74 {dimension_numbers = #tpu.dot_dimension_numbers<[1], [0], [0], [1], [0, 0, 1, 1], [], []>} : vector<8x32xf32>, vector<32x160xf32>, vector<8x160xf32> -> vector<8x160xf32>
    %262 = vector.extract_strided_slice %261 {offsets = [0, 0], sizes = [8, 96], strides = [1, 1]} : vector<8x160xf32> to vector<8x96xf32>
    %263 = arith.index_cast %c7_i32 : i32 to index
    %c0_75 = arith.constant 0 : index
    %c0_76 = arith.constant 0 : index
    %264 = vector.load %arg8[%263, %c0_75, %c0_76] : memref<8x8x96xf32, #tpu.memory_space<vmem>>, vector<1x8x96xf32>
    %265 = vector.shape_cast %264 : vector<1x8x96xf32> to vector<8x96xf32>
    %266 = arith.addf %262, %265 : vector<8x96xf32>
    %267 = math.tanh %266 : vector<8x96xf32>
    %cst_77 = arith.constant 1.000000e+00 : f32
    %268 = vector.broadcast %cst_77 : f32 to vector<8x96xf32>
    %269 = arith.subf %268, %267 : vector<8x96xf32>
    %270 = arith.mulf %267, %269 : vector<8x96xf32>
    %271 = vector.extract_strided_slice %270 {offsets = [0, 0], sizes = [8, 32], strides = [1, 1]} : vector<8x96xf32> to vector<8x32xf32>
    %272 = vector.extract_strided_slice %270 {offsets = [0, 32], sizes = [8, 32], strides = [1, 1]} : vector<8x96xf32> to vector<8x32xf32>
    %273 = arith.mulf %271, %272 : vector<8x32xf32>
    %274 = vector.extract_strided_slice %270 {offsets = [0, 64], sizes = [8, 32], strides = [1, 1]} : vector<8x96xf32> to vector<8x32xf32>
    %275 = arith.mulf %273, %274 : vector<8x32xf32>
    %cst_78 = arith.constant dense<0.000000e+00> : vector<8x64xf32>
    %276 = tpu.matmul %275, %27, %cst_78 {dimension_numbers = #tpu.dot_dimension_numbers<[1], [0], [0], [1], [0, 0, 1, 1], [], []>} : vector<8x32xf32>, vector<32x64xf32>, vector<8x64xf32> -> vector<8x64xf32>
    %277 = vector.extract_strided_slice %261 {offsets = [0, 96], sizes = [8, 64], strides = [1, 1]} : vector<8x160xf32> to vector<8x64xf32>
    %278 = arith.addf %276, %277 : vector<8x64xf32>
    %279 = vector.broadcast %28 : vector<1x64xf32> to vector<8x64xf32>
    %280 = arith.addf %278, %279 : vector<8x64xf32>
    %281 = math.tanh %280 : vector<8x64xf32>
    %282 = vector.extract_strided_slice %281 {offsets = [0, 0], sizes = [8, 32], strides = [1, 1]} : vector<8x64xf32> to vector<8x32xf32>
    %283 = vector.extract_strided_slice %281 {offsets = [0, 32], sizes = [8, 32], strides = [1, 1]} : vector<8x64xf32> to vector<8x32xf32>
    %284 = arith.addf %256, %283 : vector<8x32xf32>
    %285 = arith.subf %256, %283 : vector<8x32xf32>
    %286 = arith.mulf %282, %285 : vector<8x32xf32>
    %287 = arith.addf %284, %286 : vector<8x32xf32>
    %cst_79 = arith.constant 5.000000e-01 : f32
    %288 = vector.broadcast %cst_79 : f32 to vector<8x32xf32>
    %289 = arith.mulf %288, %287 : vector<8x32xf32>
    %290 = arith.index_cast %c7_i32 : i32 to index
    %c0_80 = arith.constant 0 : index
    %c0_81 = arith.constant 0 : index
    %291 = vector.load %arg7[%290, %c0_80, %c0_81] : memref<8x8x32xf32, #tpu.memory_space<vmem>>, vector<1x8x32xf32>
    %292 = vector.shape_cast %291 : vector<1x8x32xf32> to vector<8x32xf32>
    %293 = vector.shape_cast %289 : vector<8x32xf32> to vector<1x8x32xf32>
    tpu.vector_store %arg7[%290, %c0_80, %c0_81], %293 {strides = array<i32>} : memref<8x8x32xf32, #tpu.memory_space<vmem>>, vector<1x8x32xf32>,
    %c8_i32 = arith.constant 8 : i32
    return
  }
}

</mosaic_0001>

<bundles_post_ra>
// kernel: custom_gru_sequence.1
= control target key start
LH: loop header
LB: loop body
LE: loop exit
PB: predicated region body
PF: predicated region fallthrough
CT: control target
= control target key end

     0   :  { %v3797_v1 = vmov 1   ;;  %v3798_v3 = vmov 0   ;;  %s4998_s0 = inlined_call_operand.vmem [shape: f32[8,8,2], index: 0, kind: input, shape index: {}]   ;;  %s4999_s1 = inlined_call_operand.vmem [shape: f32[8,32], index: 1, kind: input, shape index: {}]   ;;  %s5000_s2 = inlined_call_operand.vmem [shape: f32[32,160], index: 2, kind: input, shape index: {}]   ;;  %s5001_s3 = inlined_call_operand.vmem [shape: f32[32,64], index: 3, kind: input, shape index: {}]   ;;  %s5002_s4 = inlined_call_operand.vmem [shape: f32[3,32], index: 4, kind: input, shape index: {}]   ;;  %s5003_s5 = inlined_call_operand.vmem [shape: f32[1,96], index: 5, kind: input, shape index: {}]   ;;  %s5004_s6 = inlined_call_operand.vmem [shape: f32[1,64], index: 6, kind: input, shape index: {}]   ;;  %s5005_s7 = inlined_call_operand.hbm [shape: f32[8,8,32], index: 7, kind: output, shape index: {}]  }
   0x1   :  { %v3854_v0 = vld [vmem:[%s4998_s0] sm:$0xff]  ;;  %3695 = vset.pattern.permute.xlu0 %v3797_v1  ;;  %3696 = vset.pattern.permute.xlu1 %v3798_v3 }
   0x2   :  { %v90_v2 = vand.u32 2139095040, %v3854_v0  ;;  %40 = vperm.xlu1 %3696, %v3854_v0   ;;  %3698 = vset.pattern.permute.xlu2 %v3797_v1  ;;  %v87_v5 = vand.u32 2147483647, %v3854_v0 }
   0x4   :  { %v91_v4 = vshrl.u32 %v90_v2, 23 }
   0x6   :  { %v3609_v6 = vadd.s32 4294967169, %v91_v4 }
   0x7   :  { %12 = vsyncpa [#allocation4], 0  ;;  %v94_v8 = vand.u32 8388607, %v87_v5  ;;  %v3799_v14 = vmov 683565275  }
   0x8   :  { %v97_v7 = vadd.s32 1, %v3609_v6  ;;  %v3800_v16 = vmov 2475754826   ;;  %v3801_v18 = vmov 2131351028   ;;  %vm89_vm12 = vcmp.lt.s32.totalorder %v3854_v0, 0 }
   0x9   :  { %v95_v11 = vor.u32 8388608, %v94_v8  ;;  %v3802_v20 = vmov 2102212464   ;;  %v3803_v22 = vmov 920167782   ;;  %s3805_s22 = smov 32  }
   0xa   :  { %vm98_vm0 = vcmp.gt.s32.totalorder %v97_v7, 0  ;;  %3697 = vset.pattern.permute.xlu1 %v3797_v1  ;;  %v3804_v28 = vmov 1326507024   ;;  %vm3918_vm13 = vcmp.le.f32.partialorder %v87_v5, 0.7853982  ;;  %s3806_s25 = smov 64  }
   0xb   :  { %v99_v9 = vsel %vm98_vm0, %v97_v7, 0  ;;  %v3878_v30 = vshll.u32 %v95_v11, 8  ;;  %s3807_s30 = smov 96   ;;  %s3597_s8 = sshll.u32 %s5005_s7, 4  ;;  %s3598_s8 = int_to_ptr.hbm [resolvable:$true] %s3597_s8 }
   0xc   :  { %v101_v10 = vand.u32 31, %v99_v9  ;;  %v3865_v12 = vshrl.u32 %v99_v9, 5  ;;  %s3809_s9 = smov 128   ;;  %s3810_s10 = smov 8  }
   0xd   :  { %v136_v42 = vand.u32 65535, %v3878_v30  ;;  %v137_v43 = vshrl.u32 %v3878_v30, 16 }
   0xe   :  { %v102_v13 = vsub.s32 32, %v101_v10  ;;  %v104_v15 = vshll.u32 %v3799_v14, %v101_v10  ;;  %v107_v17 = vshll.u32 %v3800_v16, %v101_v10  ;;  %v110_v19 = vshll.u32 %v3801_v18, %v101_v10 }
   0xf   :  { %v113_v21 = vshll.u32 %v3802_v20, %v101_v10  ;;  %v116_v23 = vshll.u32 %v3803_v22, %v101_v10  ;;  %vm119_vm1 = vcmp.lt.s32.totalorder %v3865_v12, 1  ;;  %vm122_vm2 = vcmp.lt.s32.totalorder %v3865_v12, 4 }
  0x10   :  { %v105_v24 = vshrl.u32 %v3800_v16, %v102_v13  ;;  %v108_v25 = vshrl.u32 %v3801_v18, %v102_v13  ;;  %v111_v26 = vshrl.u32 %v3802_v20, %v102_v13  ;;  %v114_v27 = vshrl.u32 %v3803_v22, %v102_v13 }
  0x11   :  { %v117_v29 = vshrl.u32 %v3804_v28, %v102_v13  ;;  %vm121_vm3 = vcmp.lt.s32.totalorder %v3865_v12, 3  ;;  %vm120_vm4 = vcmp.lt.s32.totalorder %v3865_v12, 2  ;;  %v103_v50 = vshrl.u32 %v3799_v14, %v102_v13 }
  0x12   :  { %v106_v31 = vor.u32 %v105_v24, %v104_v15  ;;  %v109_v32 = vor.u32 %v108_v25, %v107_v17  ;;  %v112_v33 = vor.u32 %v111_v26, %v110_v19  ;;  %v115_v34 = vor.u32 %v114_v27, %v113_v21 }
  0x13   :  { %v118_v35 = vor.u32 %v117_v29, %v116_v23 }
  0x14   :  { %v127_v36 = vsel %vm119_vm1, %v106_v31, %v109_v32  ;;  %v131_v37 = vsel %vm119_vm1, %v109_v32, %v112_v33  ;;  %v128_v38 = vsel %vm122_vm2, %v115_v34, 920167782  ;;  %v123_v63 = vsel %vm119_vm1, %v103_v50, %v106_v31 }
  0x15   :  { %v132_v39 = vsel %vm122_vm2, %v118_v35, 1326507024  ;;  %v129_v40 = vsel %vm121_vm3, %v112_v33, %v128_v38  ;;  %v124_v4 = vsel %vm122_vm2, %v112_v33, 2102212464  ;;  %vm230_vm1 = vweird.f32 %v3854_v0 }
  0x16   :  { %v133_v41 = vsel %vm121_vm3, %v115_v34, %v132_v39  ;;  %v130_v44 = vsel %vm120_vm4, %v127_v36, %v129_v40  ;;  %v125_v17 = vsel %vm121_vm3, %v109_v32, %v124_v4 }
  0x17   :  { %v134_v45 = vsel %vm120_vm4, %v131_v37, %v133_v41  ;;  %v160_v48 = vand.u32 65535, %v130_v44  ;;  %v161_v49 = vshrl.u32 %v130_v44, 16  ;;  %v126_v29 = vsel %vm120_vm4, %v123_v63, %v125_v17 }
  0x18   :  { %v138_v46 = vand.u32 65535, %v134_v45  ;;  %v139_v47 = vshrl.u32 %v134_v45, 16  ;;  %v180_v35 = vmul.u32 %v3878_v30, %v126_v29 }
  0x19   :  { %v162_v54 = vmul.u32 %v160_v48, %v136_v42  ;;  %v163_v55 = vmul.u32 %v161_v49, %v136_v42  ;;  %v164_v56 = vmul.u32 %v160_v48, %v137_v43  ;;  %v165_v60 = vmul.u32 %v161_v49, %v137_v43 }
  0x1a   :  { %v140_v51 = vmul.u32 %v138_v46, %v136_v42  ;;  %v141_v52 = vmul.u32 %v139_v47, %v136_v42  ;;  %v142_v53 = vmul.u32 %v138_v46, %v137_v43  ;;  %v143_v57 = vmul.u32 %v139_v47, %v137_v43 }
  0x1b   :  { %v166_v61 = vshll.u32 %v163_v55, 16  ;;  %v168_v62 = vshll.u32 %v164_v56, 16  ;;  %v167_v13 = vshrl.u32 %v163_v55, 16  ;;  %v169_v24 = vshrl.u32 %v164_v56, 16 }
  0x1c   :  { %v144_v58 = vshll.u32 %v141_v52, 16  ;;  %v146_v59 = vshll.u32 %v142_v53, 16  ;;  %v145_v8 = vshrl.u32 %v141_v52, 16  ;;  %v147_v19 = vshrl.u32 %v142_v53, 16 }
  0x1d   :  { %vm170_vm6 = vc.u32 %v162_v54, %v166_v61  ;;  %v172_v7 = vadd.s32 %v166_v61, %v162_v54 }
  0x1e   :  { %vm148_vm5 = vc.u32 %v140_v51, %v144_v58  ;;  %v150_v2 = vadd.s32 %v144_v58, %v140_v51  ;;  %v171_v10 = vsel %vm170_vm6, 1, %v3798_v3  ;;  %vm2730_vm6 = vcmask 523264  }
  0x1f   :  { %v149_v6 = vsel %vm148_vm5, 1, %v3798_v3  ;;  %v173_v15 = vadd.s32 %v171_v10, %v165_v60  ;;  %vm174_vm8 = vc.u32 %v172_v7, %v168_v62  ;;  %v176_v27 = vadd.s32 %v172_v7, %v168_v62  ;;  %v3930_v60 = vld [vmem:[%s5000_s2 + $0x20] sm:$0xff] }
  0x20   :  { %v151_v9 = vadd.s32 %v149_v6, %v143_v57  ;;  %vm152_vm7 = vc.u32 %v150_v2, %v146_v59  ;;  %v175_v23 = vsel %vm174_vm8, 1, %v3798_v3  ;;  %v3925_v59 = vld [vmem:[%s5000_s2 + $0x30] sm:$0xff]  ;;  %vm2721_vm5 = vcmask 261120  }
  0x21   :  { %v153_v11 = vsel %vm152_vm7, 1, %v3798_v3  ;;  %v177_v25 = vadd.s32 %v175_v23, %v173_v15  ;;  %2789 = vmatpush.msra.mxu0 %v3925_v59  ;;  %2892 = vmatpush.msra.mxu3 %v3925_v59  ;;  %vm2751_vm7 = vcmask 785408  }
  0x22   :  { %v155_v21 = vadd.s32 %v153_v11, %v151_v9 }
  0x23   :  { %v178_v31 = vadd.s32 %v177_v25, %v167_v13  ;;  %2790 = vmatpush.msra.mxu0 %v3930_v60  ;;  %2893 = vmatpush.msra.mxu3 %v3930_v60 }
  0x24   :  { %v156_v26 = vadd.s32 %v155_v21, %v145_v8 }
  0x25   :  { %v179_v34 = vadd.s32 %v178_v31, %v169_v24 }
  0x26   :  { %v157_v33 = vadd.s32 %v156_v26, %v147_v19 }
  0x27   :  { %v183_v36 = vadd.s32 1, %v179_v34 }
  0x28   :  { %vm182_vm9 = vc.u32 %v157_v33, %v176_v27  ;;  %v181_v12 = vadd.s32 %v176_v27, %v157_v33 }
  0x29   :  { %v184_v37 = vsel %vm182_vm9, %v183_v36, %v179_v34 }
  0x2a   :  { %v185_v32 = vadd.s32 %v184_v37, %v180_v35 }
  0x2c   :  { %v186_v38 = vadd.s32 536870912, %v185_v32 }
  0x2e   :  { %v187_v39 = vshrl.u32 %v186_v38, 30 }
  0x30   :  { %v188_v40 = vshll.u32 %v187_v39, 30  ;;  %v211_v5 = vsub.s32 4, %v187_v39 }
  0x32   :  { %v189_v41 = vsub.s32 %v185_v32, %v188_v40  ;;  %v212_v6 = vsel %vm89_vm12, %v211_v5, %v187_v39  ;;  %v3946_v40 = vld [vmem:[%s5000_s2 + $0x10] sm:$0xff] }
  0x33   :  { %v214_v9 = vsel %vm3918_vm13, 0, %v212_v6  ;;  %2791 = vmatpush.msra.mxu0 %v3946_v40  ;;  %2894 = vmatpush.msra.mxu3 %v3946_v40 }
  0x34   :  { %vm190_vm10 = vcmp.lt.s32.totalorder %v189_v41, 0  ;;  %v191_v42 = vsub.s32 0, %v189_v41  ;;  %v231_v17 = vand.u32 3, %v214_v9  ;;  %v1512_v19 = vadd.s32 3, %v214_v9  ;;  %v4046_v9 = vld [vmem:[%s5001_s3 + $0x8] sm:$0xff] }
  0x36   :  { %v192_v43 = vsel %vm190_vm10, %v191_v42, %v189_v41  ;;  %vm236_vm14 = vcmp.eq.s32.totalorder %v231_v17, 2  ;;  %v1513_v26 = vand.u32 3, %v1512_v19  ;;  %vm233_vm15 = vcmp.eq.s32.totalorder %v231_v17, 0  ;;  %v3967_v42 = vld [vmem:[%s5000_s2 + $0x38] sm:$0xff]  ;;  %v4079_v19 = vld [vmem:[%s4998_s0 + $0x8] sm:$0xff] }
  0x37   :  { %v193_v44 = vclz %v192_v43  ;;  %vm232_vm0 = vcmp.lt.s32.totalorder %v231_v17, 2  ;;  %v3972_v43 = vld [vmem:[%s5000_s2 + $0x28] sm:$0xff]  ;;  %2809 = vmatpush.msra.mxu1 %v3967_v42 }
  0x38   :  { %vm1515_vm2 = vcmp.eq.s32.totalorder %v1513_v26, 0  ;;  %vm1518_vm3 = vcmp.eq.s32.totalorder %v1513_v26, 2  ;;  %vm1514_vm4 = vcmp.lt.s32.totalorder %v1513_v26, 2 }
  0x39   :  { %v3610_v45 = vadd.s32 4294967294, %v193_v44  ;;  %v3979_v44 = vld [vmem:[%s5000_s2 + $0x18] sm:$0xff]  ;;  %2810 = vmatpush.msra.mxu1 %v3972_v43 }
  0x3b   :  { %vm3611_vm11 = vcmp.lt.s32.totalorder %v3610_v45, 0  ;;  %2811 = vmatpush.msra.mxu1 %v3979_v44 }
  0x3c   :  { %v196_v46 = vsel %vm3611_vm11, 0, %v3610_v45  ;;  %v3987_v45 = vld [vmem:[%s5000_s2 + $0x8] sm:$0xff] }
  0x3d   :  { %v197_v47 = vsub.s32 32, %v196_v46  ;;  %v198_v48 = vshll.u32 %v189_v41, %v196_v46  ;;  %v201_v49 = vsub.s32 4294967266, %v196_v46  ;;  %v3959_v41 = vld [vmem:[%s4999_s1] sm:$0xff]  ;;  %2812 = vmatpush.msra.mxu1 %v3987_v45 }
  0x3e   :  { %3658 = vmatmul.msk.f32.vlgmr.msra.gmra.mxu1 %vm2721_vm5, %v3959_v41 }
  0x3f   :  { %v199_v30 = vshrl.u32 %v181_v12, %v197_v47  ;;  %v202_v50 = vadd.s32 127, %v201_v49  ;;  %v4001_v12 = vld [vmem:[%s5002_s4 + $0x1] ss:$0 sm:$0xff] }
  0x41   :  { %v200_v51 = vor.u32 %v199_v30, %v198_v48  ;;  %v203_v52 = vshll.u32 %v202_v50, 23  ;;  %v4008_v48 = vld [vmem:[%s5002_s4 + $0x2] ss:$0 sm:$0xff] }
  0x43   :  { %v204_v53 = vor.u32 4788187, %v203_v52  ;;  %v207_v54 = vcvt.s32.f32 %v200_v51  ;;  %v4016_v52 = vld [vmem:[%s5002_s4] ss:$0 sm:$0xff] }
  0x45   :  { %v205_v55 = vand.u32 2147483647, %v204_v53 }
  0x47   :  { %v208_v56 = vmul.f32 %v207_v54, %v205_v55  ;;  %v4022_v54 = vld [vmem:[%s5003_s5] ss:$0 sm:$0xff] }
  0x49   :  { %v209_v58 = vxor.u32 2147483648, %v208_v56 }
  0x4b   :  { %v210_v61 = vsel %vm89_vm12, %v209_v58, %v208_v56 }
  0x4c   :  { %v213_v62 = vsel %vm3918_vm13, %v3854_v0, %v210_v61  ;;  %v3952_v0 = vld [vmem:[%s5000_s2] sm:$0xff] }
  0x4d   :  { %v215_v63 = vmul.f32 %v213_v62, %v213_v62  ;;  %2792 = vmatpush.msra.mxu0 %v3952_v0  ;;  %2895 = vmatpush.msra.mxu3 %v3952_v0 }
  0x4e   :  { %3657 = vmatmul.msk.f32.vlgmr.msra.gmra.mxu0 %vm2721_vm5, %v3959_v41 }
  0x4f   :  { %v216_v2 = vmul.f32 -0.001358992, %v215_v63  ;;  %v223_v4 = vmul.f32 -0.00019511016, %v215_v63  ;;  %2912 = vmatpush.msrb.mxu0 %v3967_v42  ;;  %3014 = vmatpush.msrb.mxu3 %v3967_v42 }
  0x51   :  { %v217_v7 = vadd.f32 0.041655596, %v216_v2  ;;  %v224_v8 = vadd.f32 0.008332121, %v223_v4  ;;  %2913 = vmatpush.msrb.mxu0 %v3972_v43  ;;  %3015 = vmatpush.msrb.mxu3 %v3972_v43 }
  0x53   :  { %v218_v10 = vmul.f32 %v217_v7, %v215_v63  ;;  %v225_v11 = vmul.f32 %v224_v8, %v215_v63  ;;  %2914 = vmatpush.msrb.mxu0 %v3979_v44  ;;  %3016 = vmatpush.msrb.mxu3 %v3979_v44  ;;  %v4034_v7 = vld [vmem:[%s5001_s3 + $0x18] sm:$0xff]  ;;  %v4039_v8 = vld [vmem:[%s5001_s3 + $0x10] sm:$0xff] }
  0x54   :  { %2854 = vmatpush.msra.mxu2 %v4034_v7  ;;  %2958 = vmatpush.msrb.mxu1 %v4034_v7 }
  0x55   :  { %v219_v13 = vadd.f32 -0.4999988, %v218_v10  ;;  %v226_v15 = vadd.f32 -0.16666654, %v225_v11  ;;  %2915 = vmatpush.msrb.mxu0 %v3987_v45  ;;  %3017 = vmatpush.msrb.mxu3 %v3987_v45  ;;  %v4058_v10 = vld [vmem:[%s5001_s3] sm:$0xff] }
  0x56   :  { %2855 = vmatpush.msra.mxu2 %v4039_v8  ;;  %2959 = vmatpush.msrb.mxu1 %v4039_v8 }
  0x57   :  { %v220_v21 = vmul.f32 %v219_v13, %v215_v63  ;;  %v227_v23 = vmul.f32 %v226_v15, %v215_v63  ;;  %3060 = vmatpush.msra.mxu0 %v4034_v7 }
  0x58   :  { %2856 = vmatpush.msra.mxu2 %v4046_v9  ;;  %2960 = vmatpush.msrb.mxu1 %v4046_v9 }
  0x59   :  { %v221_v24 = vadd.f32 1.0, %v220_v21  ;;  %v228_v25 = vadd.f32 1.0, %v227_v23  ;;  %3061 = vmatpush.msra.mxu0 %v4039_v8  ;;  %v244_v21 = vand.u32 2139095040, %v4079_v19 }
  0x5a   :  { %2857 = vmatpush.msra.mxu2 %v4058_v10  ;;  %2961 = vmatpush.msrb.mxu1 %v4058_v10 }
  0x5b   :  { %v229_v27 = vmul.f32 %v228_v25, %v213_v62  ;;  %v237_v29 = vxor.u32 2147483648, %v221_v24  ;;  %3062 = vmatpush.msra.mxu0 %v4046_v9  ;;  %v245_v23 = vshrl.u32 %v244_v21, 23 }
  0x5c   :  { %2994 = vmatpush.msrb.mxu2 %v3925_v59  ;;  %3096 = vmatpush.msra.mxu1 %v3925_v59 }
  0x5d   :  { %v234_v31 = vxor.u32 2147483648, %v229_v27  ;;  %v238_v33 = vsel %vm236_vm14, %v237_v29, %v229_v27  ;;  %v1520_v32 = vsel %vm1518_vm3, %v237_v29, %v229_v27  ;;  %3063 = vmatpush.msra.mxu0 %v4058_v10 }
  0x5e   :  { %2995 = vmatpush.msrb.mxu2 %v3930_v60  ;;  %3097 = vmatpush.msra.mxu1 %v3930_v60 }
  0x5f   :  { %v235_v34 = vsel %vm233_vm15, %v221_v24, %v234_v31  ;;  %v1517_v37 = vsel %vm1515_vm2, %v221_v24, %v234_v31  ;;  %v3612_v24 = vadd.s32 4294967169, %v245_v23  ;;  %v241_v31 = vand.u32 2147483647, %v4079_v19 }
  0x60   :  { %v239_v35 = vsel %vm232_vm0, %v235_v34, %v238_v33  ;;  %v1521_v38 = vsel %vm1514_vm4, %v1517_v37, %v1520_v32  ;;  %2996 = vmatpush.msrb.mxu2 %v3946_v40  ;;  %3098 = vmatpush.msra.mxu1 %v3946_v40  ;;  %vm243_vm4 = vcmp.lt.s32.totalorder %v4079_v19, 0 }
  0x61   :  { %v240_v36 = vsel %vm230_vm1, nan, %v239_v35  ;;  %v1522_v39 = vsel %vm230_vm1, nan, %v1521_v38  ;;  %v251_v25 = vadd.s32 1, %v3612_v24  ;;  %v248_v35 = vand.u32 8388607, %v241_v31 }
  0x62   :  { %1321 = vperm.xlu0 %3695, %v240_v36   ;;  %2997 = vmatpush.msrb.mxu2 %v3952_v0 }
  0x63   :  { %3099 = vmatpush.msra.mxu1 %v3952_v0  ;;  %vm252_vm8 = vcmp.gt.s32.totalorder %v251_v25, 0 }
  0x64   :  { %v253_v26 = vsel %vm252_vm8, %v251_v25, 0  ;;  %vm242_vm8 = vcmp.le.f32.partialorder %v241_v31, 0.7853982 }
  0x65   :  { %v255_v27 = vand.u32 31, %v253_v26  ;;  %v4090_v36 = vshrl.u32 %v253_v26, 5 }
  0x67   :  { %v4082_v29 = vsub.s32 32, %v255_v27  ;;  %v267_v33 = vshll.u32 %v3802_v20, %v255_v27  ;;  %v258_v37 = vshll.u32 %v3799_v14, %v255_v27  ;;  %v261_v38 = vshll.u32 %v3800_v16, %v255_v27 }
  0x68   :  { %vm273_vm9 = vcmp.lt.s32.totalorder %v4090_v36, 1  ;;  %vm274_vm10 = vcmp.lt.s32.totalorder %v4090_v36, 2  ;;  %vm275_vm11 = vcmp.lt.s32.totalorder %v4090_v36, 3  ;;  %vm276_vm12 = vcmp.lt.s32.totalorder %v4090_v36, 4 }
  0x69   :  { %v268_v34 = vshrl.u32 %v3803_v22, %v4082_v29  ;;  %v259_v32 = vshrl.u32 %v3800_v16, %v4082_v29 }
  0x6a   :  { %2610 = vperm.xlu0 %3695, %v1522_v39   ;;  %v262_v39 = vshrl.u32 %v3801_v18, %v4082_v29 }
  0x72   :  { %3699 = vset.pattern.permute.xlu0 %v3798_v3 }
  0x74   :  { %v41_v51 = vpop.permute.xlu1 %40 }
  0x75   :  { %v79_v53 = vmul.f32 %v4016_v52, %v41_v51  ;;  %v270_v51 = vshll.u32 %v3803_v22, %v255_v27 }
  0xbb   :  { %v2814_v6 = vpop.f32.mrf.mxu1 }
  0xcb   :  { %v2794_v50 = vpop.f32.mrf.mxu0 }
  0xd4   :  { %v1322_v46 = vpop.permute.xlu0 %1321 }
  0xd5   :  { %v1360_v47 = vmul.f32 %v4001_v12, %v1322_v46  ;;  %v264_v46 = vshll.u32 %v3801_v18, %v255_v27 }
  0xd7   :  { %2665 = vrot.lane.b32.xlu1 %v1360_v47, %s3805_s22  ;;  %v265_v47 = vshrl.u32 %v3802_v20, %v4082_v29 }
  0xdc   :  { %v2611_v49 = vpop.permute.xlu0 %2610 }
  0xdd   :  { %v2649_v30 = vmul.f32 %v4008_v48, %v2611_v49  ;;  %v249_v49 = vor.u32 8388608, %v248_v35 }
  0xdf   :  { %2697 = vrot.lane.b32.xlu2 %v2649_v30, %s3806_s25  ;;  %2833 = vrot.lane.b32.xlu1 %v2794_v50, %s3805_s22  ;;  %v260_v30 = vor.u32 %v259_v32, %v258_v37 }
 0x139   :  { %v2698_v56 = vpop.permute.xlu2 %2697 }
 0x149   :  { %v2666_v55 = vpop.permute.xlu1 %2665 }
 0x14a   :  { %v2722_v57 = vsel %vm2721_vm5, %v79_v53, %v2666_v55  ;;  %v263_v53 = vor.u32 %v262_v39, %v261_v38  ;;  %v266_v55 = vor.u32 %v265_v47, %v264_v46 }
 0x14b   :  { %v2731_v58 = vsel %vm2730_vm6, %v2722_v57, %v2698_v56  ;;  %v271_v56 = vshrl.u32 %v3804_v28, %v4082_v29  ;;  %v289_v57 = vshll.u32 %v249_v49, 8 }
 0x14c   :  { %v2743_v61 = vadd.f32 %v4022_v54, %v2731_v58 }
 0x14d   :  { %v272_v58 = vor.u32 %v271_v56, %v270_v51 }
 0x14e   :  { %2752 = vst.msk [vmem:[#allocation2] sm:$0xff] %vm2751_vm7, %v2743_v61  ;;  %v281_v61 = vsel %vm273_vm9, %v260_v30, %v263_v53 }
 0x155   :  { %v2817_v5 = vld [vmem:[#allocation2] sm:$0xff] }
 0x156   :  { %v2818_v62 = vadd.f32 %v2817_v5, %v2794_v50  ;;  %v269_v50 = vor.u32 %v268_v34, %v267_v33 }
 0x158   :  { %3717 = vtanh.f32 %v2818_v62  ;;  %v282_v5 = vsel %vm276_vm12, %v269_v50, 920167782 }
 0x159   :  { %v283_v62 = vsel %vm275_vm11, %v266_v55, %v282_v5 }
 0x15e   :  { %v3718_v63 = vpop.eup %3717 }
 0x15f   :  { %v2820_v2 = vsub.f32 1.0, %v3718_v63 }
 0x161   :  { %v2821_v4 = vmul.f32 %v3718_v63, %v2820_v2  ;;  %v285_v63 = vsel %vm273_vm9, %v263_v53, %v266_v55  ;;  %v290_v2 = vand.u32 65535, %v289_v57 }
 0x163   :  { %2827 = vrot.lane.b32.xlu0 %v2821_v4, %s3806_s25  ;;  %2823 = vrot.lane.b32.xlu2 %v2821_v4, %s3807_s30 }
 0x16b   :  { %2835 = vrot.lane.b32.xlu2 %v2814_v6, %s3805_s22  ;;  %v286_v6 = vsel %vm276_vm12, %v272_v58, 1326507024 }
 0x1bd   :  { %v2824_v11 = vpop.permute.xlu2 %2823 }
 0x1be   :  { %v2826_v13 = vmul.f32 %v2824_v11, %v2821_v4  ;;  %v284_v4 = vsel %vm274_vm10, %v281_v61, %v283_v62  ;;  %v287_v11 = vsel %vm275_vm11, %v269_v50, %v286_v6 }
 0x1bf   :  { %v288_v21 = vsel %vm274_vm10, %v285_v63, %v287_v11 }
 0x1c0   :  { %v292_v23 = vand.u32 65535, %v288_v21  ;;  %v293_v24 = vshrl.u32 %v288_v21, 16 }
 0x1c2   :  { %v294_v33 = vmul.u32 %v292_v23, %v290_v2  ;;  %v295_v34 = vmul.u32 %v293_v24, %v290_v2 }
 0x1c4   :  { %v298_v46 = vshll.u32 %v295_v34, 16  ;;  %v299_v5 = vshrl.u32 %v295_v34, 16 }
 0x1c6   :  { %vm302_vm14 = vc.u32 %v294_v33, %v298_v46  ;;  %v304_v50 = vadd.s32 %v298_v46, %v294_v33 }
 0x1c7   :  { %v303_v56 = vsel %vm302_vm14, 1, %v3798_v3 }
 0x1d5   :  { %v2828_v15 = vpop.permute.xlu0 %2827 }
 0x1d6   :  { %v2830_v17 = vmul.f32 %v2828_v15, %v2826_v13  ;;  %v291_v13 = vshrl.u32 %v289_v57, 16  ;;  %v314_v15 = vand.u32 65535, %v284_v4 }
 0x1d8   :  { %3659 = vmatmul.msk.f32.vlgmr.msra.gmra.mxu2 %vm2721_vm5, %v2830_v17  ;;  %v315_v17 = vshrl.u32 %v284_v4, 16  ;;  %v316_v26 = vmul.u32 %v314_v15, %v290_v2  ;;  %v318_v27 = vmul.u32 %v314_v15, %v291_v13  ;;  %v296_v35 = vmul.u32 %v292_v23, %v291_v13 }
 0x1d9   :  { %3116 = vmatpush.msra.mxu2 %v3967_v42  ;;  %v297_v39 = vmul.u32 %v293_v24, %v291_v13 }
 0x1da   :  { %v317_v25 = vmul.u32 %v315_v17, %v290_v2  ;;  %v319_v37 = vmul.u32 %v315_v17, %v291_v13  ;;  %v322_v38 = vshll.u32 %v318_v27, 16  ;;  %v300_v47 = vshll.u32 %v296_v35, 16 }
 0x1db   :  { %3117 = vmatpush.msra.mxu2 %v3972_v43  ;;  %v305_v62 = vadd.s32 %v303_v56, %v297_v39  ;;  %v257_v2 = vshrl.u32 %v3799_v14, %v4082_v29  ;;  %v323_v6 = vshrl.u32 %v318_v27, 16  ;;  %v278_v13 = vsel %vm276_vm12, %v266_v55, 2102212464 }
 0x1dc   :  { %v320_v32 = vshll.u32 %v317_v25, 16  ;;  %v321_v58 = vshrl.u32 %v317_v25, 16  ;;  %vm306_vm0 = vc.u32 %v304_v50, %v300_v47  ;;  %v301_v15 = vshrl.u32 %v296_v35, 16 }
 0x1dd   :  { %3118 = vmatpush.msra.mxu2 %v3979_v44  ;;  %v307_v4 = vsel %vm306_vm0, 1, %v3798_v3  ;;  %v277_v21 = vsel %vm273_vm9, %v257_v2, %v260_v30  ;;  %v279_v23 = vsel %vm275_vm11, %v263_v53, %v278_v13 }
 0x1de   :  { %vm324_vm13 = vc.u32 %v316_v26, %v320_v32  ;;  %v326_v49 = vadd.s32 %v320_v32, %v316_v26  ;;  %v309_v17 = vadd.s32 %v307_v4, %v305_v62  ;;  %v280_v25 = vsel %vm274_vm10, %v277_v21, %v279_v23 }
 0x1df   :  { %3119 = vmatpush.msra.mxu2 %v3987_v45  ;;  %v325_v51 = vsel %vm324_vm13, 1, %v3798_v3  ;;  %v334_v34 = vmul.u32 %v289_v57, %v280_v25 }
 0x1e0   :  { %v327_v61 = vadd.s32 %v325_v51, %v319_v37  ;;  %vm328_vm15 = vc.u32 %v326_v49, %v322_v38  ;;  %v310_v29 = vadd.s32 %v309_v17, %v299_v5  ;;  %v330_v26 = vadd.s32 %v326_v49, %v322_v38 }
 0x1e1   :  { %v329_v63 = vsel %vm328_vm15, 1, %v3798_v3  ;;  %vm384_vm15 = vweird.f32 %v4079_v19 }
 0x1e2   :  { %v331_v11 = vadd.s32 %v329_v63, %v327_v61  ;;  %v311_v27 = vadd.s32 %v310_v29, %v301_v15 }
 0x1e4   :  { %v332_v24 = vadd.s32 %v331_v11, %v321_v58  ;;  %vm336_vm1 = vc.u32 %v311_v27, %v330_v26  ;;  %v335_v36 = vadd.s32 %v330_v26, %v311_v27 }
 0x1e6   :  { %v333_v33 = vadd.s32 %v332_v24, %v323_v6 }
 0x1e8   :  { %v337_v37 = vadd.s32 1, %v333_v33 }
 0x1ea   :  { %v338_v55 = vsel %vm336_vm1, %v337_v37, %v333_v33 }
 0x1eb   :  { %v339_v35 = vadd.s32 %v338_v55, %v334_v34 }
 0x1ed   :  { %v340_v32 = vadd.s32 536870912, %v339_v35 }
 0x1ef   :  { %v341_v39 = vshrl.u32 %v340_v32, 30 }
 0x1f1   :  { %v342_v46 = vshll.u32 %v341_v39, 30  ;;  %v365_v33 = vsub.s32 4, %v341_v39 }
 0x1f3   :  { %v343_v30 = vsub.s32 %v339_v35, %v342_v46  ;;  %v366_v37 = vsel %vm243_vm4, %v365_v33, %v341_v39 }
 0x1f4   :  { %v368_v55 = vsel %vm242_vm8, 0, %v366_v37 }
 0x1f5   :  { %vm344_vm2 = vcmp.lt.s32.totalorder %v343_v30, 0  ;;  %v345_v47 = vsub.s32 0, %v343_v30  ;;  %v385_v46 = vand.u32 3, %v368_v55  ;;  %v1667_v31 = vadd.s32 3, %v368_v55 }
 0x1f7   :  { %v346_v53 = vsel %vm344_vm2, %v345_v47, %v343_v30  ;;  %vm390_vm9 = vcmp.eq.s32.totalorder %v385_v46, 2  ;;  %vm386_vm10 = vcmp.lt.s32.totalorder %v385_v46, 2  ;;  %vm387_vm11 = vcmp.eq.s32.totalorder %v385_v46, 0 }
 0x1f8   :  { %v347_v50 = vclz %v346_v53  ;;  %v1668_v53 = vand.u32 3, %v1667_v31 }
 0x1fa   :  { %v3613_v51 = vadd.s32 4294967294, %v347_v50  ;;  %vm1670_vm12 = vcmp.eq.s32.totalorder %v1668_v53, 0  ;;  %vm1673_vm13 = vcmp.eq.s32.totalorder %v1668_v53, 2  ;;  %vm1669_vm14 = vcmp.lt.s32.totalorder %v1668_v53, 2 }
 0x1fc   :  { %vm3614_vm3 = vcmp.lt.s32.totalorder %v3613_v51, 0 }
 0x1fd   :  { %v350_v56 = vsel %vm3614_vm3, 0, %v3613_v51 }
 0x1fe   :  { %v351_v38 = vsub.s32 32, %v350_v56  ;;  %v355_v49 = vsub.s32 4294967266, %v350_v56  ;;  %v352_v58 = vshll.u32 %v343_v30, %v350_v56 }
 0x200   :  { %v353_v57 = vshrl.u32 %v335_v36, %v351_v38  ;;  %v356_v61 = vadd.s32 127, %v355_v49 }
 0x202   :  { %v354_v5 = vor.u32 %v353_v57, %v352_v58  ;;  %v357_v62 = vshll.u32 %v356_v61, 23 }
 0x204   :  { %v358_v63 = vor.u32 4788187, %v357_v62  ;;  %v361_v2 = vcvt.s32.f32 %v354_v5  ;;  %v2834_v62 = vpop.permute.xlu1 %2833 }
 0x206   :  { %v359_v4 = vand.u32 2147483647, %v358_v63  ;;  %v2836_v63 = vpop.permute.xlu2 %2835 }
 0x208   :  { %v362_v6 = vmul.f32 %v361_v2, %v359_v4  ;;  %v4146_v2 = vld [vmem:[%s5004_s6] ss:$0 sm:$0xff]  ;;  %v2837_v4 = vsel %vm2721_vm5, %v2834_v62, %v2836_v63 }
 0x20a   :  { %v363_v11 = vxor.u32 2147483648, %v362_v6 }
 0x20c   :  { %v364_v13 = vsel %vm243_vm4, %v363_v11, %v362_v6 }
 0x20d   :  { %v367_v15 = vsel %vm242_vm8, %v4079_v19, %v364_v13 }
 0x20e   :  { %v369_v17 = vmul.f32 %v367_v15, %v367_v15 }
 0x210   :  { %v370_v21 = vmul.f32 -0.001358992, %v369_v17  ;;  %v377_v23 = vmul.f32 -0.00019511016, %v369_v17 }
 0x212   :  { %v371_v24 = vadd.f32 0.041655596, %v370_v21  ;;  %v378_v25 = vadd.f32 0.008332121, %v377_v23 }
 0x214   :  { %v372_v29 = vmul.f32 %v371_v24, %v369_v17  ;;  %v379_v26 = vmul.f32 %v378_v25, %v369_v17 }
 0x216   :  { %v373_v27 = vadd.f32 -0.4999988, %v372_v29  ;;  %v380_v34 = vadd.f32 -0.16666654, %v379_v26 }
 0x218   :  { %v374_v35 = vmul.f32 %v373_v27, %v369_v17  ;;  %v381_v32 = vmul.f32 %v380_v34, %v369_v17 }
 0x21a   :  { %v375_v30 = vadd.f32 1.0, %v374_v35  ;;  %v382_v47 = vadd.f32 1.0, %v381_v32 }
 0x21c   :  { %v383_v50 = vmul.f32 %v382_v47, %v367_v15  ;;  %v391_v51 = vxor.u32 2147483648, %v375_v30 }
 0x21e   :  { %v388_v36 = vxor.u32 2147483648, %v383_v50  ;;  %v392_v56 = vsel %vm390_vm9, %v391_v51, %v383_v50  ;;  %v1675_v38 = vsel %vm1673_vm13, %v391_v51, %v383_v50 }
 0x220   :  { %v389_v39 = vsel %vm387_vm11, %v375_v30, %v388_v36  ;;  %v1672_v49 = vsel %vm1670_vm12, %v375_v30, %v388_v36 }
 0x221   :  { %v393_v58 = vsel %vm386_vm10, %v389_v39, %v392_v56  ;;  %v1676_v57 = vsel %vm1669_vm14, %v1672_v49, %v1675_v38 }
 0x222   :  { %v394_v61 = vsel %vm384_vm15, nan, %v393_v58  ;;  %v1677_v5 = vsel %vm384_vm15, nan, %v1676_v57 }
 0x223   :  { %1326 = vperm.xlu1 %3697, %v394_v61   ;;  %2615 = vperm.xlu2 %3698, %v1677_v5  }
 0x22b   :  { %3701 = vset.pattern.permute.xlu2 %v3798_v3 }
 0x25b   :  { %v2859_v6 = vpop.f32.mrf.mxu2 }
 0x25c   :  { %v2860_v11 = vadd.f32 %v2859_v6, %v2837_v4 }
 0x25e   :  { %v2865_v13 = vadd.f32 %v4146_v2, %v2860_v11 }
 0x260   :  { %3719 = vtanh.f32 %v2865_v13 }
 0x266   :  { %v3720_v15 = vpop.eup %3719 }
 0x267   :  { %2868 = vrot.lane.b32.xlu0 %v3720_v15, %s3807_s30 }
 0x26f   :  { %45 = vperm.xlu0 %3699, %v4079_v19  }
 0x277   :  { %3700 = vset.pattern.permute.xlu0 %v3797_v1 }
 0x27d   :  { %v2616_v17 = vpop.permute.xlu2 %2615 }
 0x27e   :  { %v2650_v21 = vmul.f32 %v4008_v48, %v2616_v17 }
 0x280   :  { %2699 = vrot.lane.b32.xlu2 %v2650_v21, %s3806_s25 }
 0x295   :  { %v1327_v23 = vpop.permute.xlu1 %1326 }
 0x296   :  { %v1361_v24 = vmul.f32 %v4001_v12, %v1327_v23 }
 0x298   :  { %2667 = vrot.lane.b32.xlu1 %v1361_v24, %s3805_s22 }
 0x2d9   :  { %v2869_v25 = vpop.permute.xlu0 %2868 }
 0x2da   :  { %v2872_v29 = vsub.f32 %v3959_v41, %v2869_v25  ;;  %v2871_v26 = vadd.f32 %v2869_v25, %v3959_v41  ;;  %v4179_v41 = vld [vmem:[%s4998_s0 + $0x10] sm:$0xff] }
 0x2db   :  { %v398_v34 = vand.u32 2139095040, %v4179_v41  ;;  %vm397_vm15 = vcmp.lt.s32.totalorder %v4179_v41, 0 }
 0x2dc   :  { %v2873_v33 = vmul.f32 %v3720_v15, %v2872_v29 }
 0x2de   :  { %v2874_v27 = vadd.f32 %v2873_v33, %v2871_v26 }
 0x2e0   :  { %v4160_v19 = vmul.f32 0.5, %v2874_v27 }
 0x2e2   :  { %2876 = vst.msk [vmem:[#allocation3] sm:$0xff] %vm2721_vm5, %v4160_v19  ;;  %3660 = vmatmul.msk.f32.vlgmr.msra.gmra.mxu3 %vm2721_vm5, %v4160_v19  ;;  %3661 = vmatmul.msk.f32.vlgmr.msrb.gmra.mxu0 %vm2721_vm5, %v4160_v19 }
 0x2e3   :  { %3162 = vmatpush.msra.mxu3 %v4034_v7  ;;  %3198 = vmatpush.msrb.mxu0 %v3925_v59  ;;  %v399_v59 = vshrl.u32 %v398_v34, 23 }
 0x2e5   :  { %3163 = vmatpush.msra.mxu3 %v4039_v8  ;;  %3199 = vmatpush.msrb.mxu0 %v3930_v60  ;;  %v3615_v37 = vadd.s32 4294967169, %v399_v59 }
 0x2e7   :  { %3164 = vmatpush.msra.mxu3 %v4046_v9  ;;  %3200 = vmatpush.msrb.mxu0 %v3946_v40  ;;  %v405_v55 = vadd.s32 1, %v3615_v37  ;;  %v395_v40 = vand.u32 2147483647, %v4179_v41 }
 0x2e9   :  { %3165 = vmatpush.msra.mxu3 %v4058_v10  ;;  %3201 = vmatpush.msrb.mxu0 %v3952_v0  ;;  %vm406_vm0 = vcmp.gt.s32.totalorder %v405_v55, 0  ;;  %v402_v31 = vand.u32 8388607, %v395_v40 }
 0x2ea   :  { %v407_v60 = vsel %vm406_vm0, %v405_v55, 0  ;;  %vm4246_vm0 = vcmp.le.f32.partialorder %v395_v40, 0.7853982 }
 0x2eb   :  { %v409_v35 = vand.u32 31, %v407_v60  ;;  %v4190_v30 = vshrl.u32 %v407_v60, 5  ;;  %v403_v38 = vor.u32 8388608, %v402_v31 }
 0x2ed   :  { %v4182_v32 = vsub.s32 32, %v409_v35  ;;  %v421_v46 = vshll.u32 %v3802_v20, %v409_v35  ;;  %v412_v47 = vshll.u32 %v3799_v14, %v409_v35  ;;  %v415_v50 = vshll.u32 %v3800_v16, %v409_v35 }
 0x2ee   :  { %v418_v36 = vshll.u32 %v3801_v18, %v409_v35  ;;  %v424_v58 = vshll.u32 %v3803_v22, %v409_v35  ;;  %vm427_vm1 = vcmp.lt.s32.totalorder %v4190_v30, 1  ;;  %vm428_vm2 = vcmp.lt.s32.totalorder %v4190_v30, 2 }
 0x2ef   :  { %v422_v0 = vshrl.u32 %v3803_v22, %v4182_v32  ;;  %v413_v53 = vshrl.u32 %v3800_v16, %v4182_v32  ;;  %v416_v51 = vshrl.u32 %v3801_v18, %v4182_v32  ;;  %v419_v56 = vshrl.u32 %v3802_v20, %v4182_v32 }
 0x2f0   :  { %v425_v5 = vshrl.u32 %v3804_v28, %v4182_v32  ;;  %vm429_vm3 = vcmp.lt.s32.totalorder %v4190_v30, 3  ;;  %vm430_vm4 = vcmp.lt.s32.totalorder %v4190_v30, 4  ;;  %v443_v62 = vshll.u32 %v403_v38, 8 }
 0x2f1   :  { %v414_v39 = vor.u32 %v413_v53, %v412_v47  ;;  %v423_v49 = vor.u32 %v422_v0, %v421_v46  ;;  %v417_v57 = vor.u32 %v416_v51, %v415_v50  ;;  %v420_v61 = vor.u32 %v419_v56, %v418_v36 }
 0x2f2   :  { %v426_v63 = vor.u32 %v425_v5, %v424_v58  ;;  %v444_v15 = vand.u32 65535, %v443_v62  ;;  %v445_v24 = vshrl.u32 %v443_v62, 16 }
 0x2f3   :  { %v435_v4 = vsel %vm427_vm1, %v414_v39, %v417_v57  ;;  %v436_v6 = vsel %vm430_vm4, %v423_v49, 920167782  ;;  %v439_v13 = vsel %vm427_vm1, %v417_v57, %v420_v61 }
 0x2f4   :  { %v437_v11 = vsel %vm429_vm3, %v420_v61, %v436_v6  ;;  %v440_v21 = vsel %vm430_vm4, %v426_v63, 1326507024  ;;  %v411_v6 = vshrl.u32 %v3799_v14, %v4182_v32 }
 0x2f5   :  { %v438_v17 = vsel %vm428_vm2, %v435_v4, %v437_v11  ;;  %v441_v23 = vsel %vm429_vm3, %v423_v49, %v440_v21 }
 0x2f6   :  { %v468_v25 = vand.u32 65535, %v438_v17  ;;  %v469_v29 = vshrl.u32 %v438_v17, 16  ;;  %v442_v26 = vsel %vm428_vm2, %v439_v13, %v441_v23  ;;  %v432_v17 = vsel %vm430_vm4, %v420_v61, 2102212464 }
 0x2f7   :  { %v446_v33 = vand.u32 65535, %v442_v26  ;;  %v447_v27 = vshrl.u32 %v442_v26, 16  ;;  %vm538_vm4 = vweird.f32 %v4179_v41 }
 0x2f8   :  { %v471_v34 = vmul.u32 %v469_v29, %v444_v15  ;;  %v470_v59 = vmul.u32 %v468_v25, %v444_v15  ;;  %v472_v37 = vmul.u32 %v468_v25, %v445_v24  ;;  %v473_v46 = vmul.u32 %v469_v29, %v445_v24 }
 0x2f9   :  { %v448_v55 = vmul.u32 %v446_v33, %v444_v15  ;;  %v449_v60 = vmul.u32 %v447_v27, %v444_v15  ;;  %v450_v35 = vmul.u32 %v446_v33, %v445_v24  ;;  %v451_v47 = vmul.u32 %v447_v27, %v445_v24 }
 0x2fa   :  { %v474_v0 = vshll.u32 %v471_v34, 16  ;;  %v476_v31 = vshll.u32 %v472_v37, 16  ;;  %v475_v49 = vshrl.u32 %v471_v34, 16  ;;  %v477_v13 = vshrl.u32 %v472_v37, 16 }
 0x2fb   :  { %v452_v53 = vshll.u32 %v449_v60, 16  ;;  %v454_v50 = vshll.u32 %v450_v35, 16  ;;  %v453_v5 = vshrl.u32 %v449_v60, 16  ;;  %v455_v21 = vshrl.u32 %v450_v35, 16 }
 0x2fc   :  { %vm478_vm8 = vc.u32 %v470_v59, %v474_v0  ;;  %v480_v51 = vadd.s32 %v474_v0, %v470_v59  ;;  %v431_v24 = vsel %vm427_vm1, %v411_v6, %v414_v39  ;;  %v433_v25 = vsel %vm429_vm3, %v417_v57, %v432_v17  ;;  %v46_v39 = vpop.permute.xlu0 %45 }
 0x2fd   :  { %vm456_vm9 = vc.u32 %v448_v55, %v452_v53  ;;  %v458_v36 = vadd.s32 %v452_v53, %v448_v55  ;;  %v479_v56 = vsel %vm478_vm8, 1, %v3798_v3  ;;  %v434_v26 = vsel %vm428_vm2, %v431_v24, %v433_v25  ;;  %v2700_v53 = vpop.permute.xlu2 %2699 }
 0x2fe   :  { %v457_v38 = vsel %vm456_vm9, 1, %v3798_v3  ;;  %v481_v58 = vadd.s32 %v479_v56, %v473_v46  ;;  %vm482_vm10 = vc.u32 %v480_v51, %v476_v31  ;;  %v484_v33 = vadd.s32 %v480_v51, %v476_v31 }
 0x2ff   :  { %v459_v63 = vadd.s32 %v457_v38, %v451_v47  ;;  %vm460_vm11 = vc.u32 %v458_v36, %v454_v50  ;;  %v483_v4 = vsel %vm482_vm10, 1, %v3798_v3  ;;  %v488_v59 = vmul.u32 %v443_v62, %v434_v26 }
 0x300   :  { %v461_v11 = vsel %vm460_vm11, 1, %v3798_v3  ;;  %v485_v15 = vadd.s32 %v483_v4, %v481_v58  ;;  %v80_v47 = vmul.f32 %v4016_v52, %v46_v39 }
 0x301   :  { %v463_v23 = vadd.s32 %v461_v11, %v459_v63 }
 0x302   :  { %v486_v29 = vadd.s32 %v485_v15, %v475_v49 }
 0x303   :  { %v464_v32 = vadd.s32 %v463_v23, %v453_v5 }
 0x304   :  { %v487_v27 = vadd.s32 %v486_v29, %v477_v13 }
 0x305   :  { %v465_v34 = vadd.s32 %v464_v32, %v455_v21 }
 0x306   :  { %v491_v37 = vadd.s32 1, %v487_v27 }
 0x307   :  { %vm490_vm12 = vc.u32 %v465_v34, %v484_v33  ;;  %v489_v38 = vadd.s32 %v484_v33, %v465_v34 }
 0x308   :  { %v492_v61 = vsel %vm490_vm12, %v491_v37, %v487_v27 }
 0x309   :  { %v493_v55 = vadd.s32 %v492_v61, %v488_v59 }
 0x30a   :  { %v2668_v31 = vpop.permute.xlu1 %2667 }
 0x30b   :  { %v494_v60 = vadd.s32 536870912, %v493_v55  ;;  %v2723_v51 = vsel %vm2721_vm5, %v80_v47, %v2668_v31 }
 0x30c   :  { %v2732_v36 = vsel %vm2730_vm6, %v2723_v51, %v2700_v53 }
 0x30d   :  { %v495_v35 = vshrl.u32 %v494_v60, 30  ;;  %v2744_v56 = vadd.f32 %v4022_v54, %v2732_v36 }
 0x30f   :  { %v496_v46 = vshll.u32 %v495_v35, 30  ;;  %2753 = vst.msk [vmem:[#allocation2 + $0x8] sm:$0xff] %vm2751_vm7, %v2744_v56  ;;  %v519_v60 = vsub.s32 4, %v495_v35 }
 0x311   :  { %v497_v0 = vsub.s32 %v493_v55, %v496_v46 }
 0x313   :  { %vm498_vm13 = vcmp.lt.s32.totalorder %v497_v0, 0  ;;  %v499_v57 = vsub.s32 0, %v497_v0 }
 0x315   :  { %v500_v30 = vsel %vm498_vm13, %v499_v57, %v497_v0 }
 0x316   :  { %v501_v50 = vclz %v500_v30  ;;  %v2921_v61 = vld [vmem:[#allocation2 + $0x8] sm:$0xff] }
 0x318   :  { %v3616_v62 = vadd.s32 4294967294, %v501_v50 }
 0x31a   :  { %vm3617_vm14 = vcmp.lt.s32.totalorder %v3616_v62, 0 }
 0x31b   :  { %v504_v49 = vsel %vm3617_vm14, 0, %v3616_v62 }
 0x31c   :  { %v505_v58 = vsub.s32 32, %v504_v49  ;;  %v509_v5 = vsub.s32 4294967266, %v504_v49  ;;  %v506_v63 = vshll.u32 %v497_v0, %v504_v49  ;;  %v520_v0 = vsel %vm397_vm15, %v519_v60, %v495_v35 }
 0x31d   :  { %v522_v30 = vsel %vm4246_vm0, 0, %v520_v0 }
 0x31e   :  { %v507_v4 = vshrl.u32 %v489_v38, %v505_v58  ;;  %v510_v6 = vadd.s32 127, %v509_v5  ;;  %v1822_v62 = vadd.s32 3, %v522_v30 }
 0x320   :  { %v508_v11 = vor.u32 %v507_v4, %v506_v63  ;;  %v511_v13 = vshll.u32 %v510_v6, 23  ;;  %v1823_v49 = vand.u32 3, %v1822_v62 }
 0x322   :  { %v512_v15 = vor.u32 4788187, %v511_v13  ;;  %v515_v17 = vcvt.s32.f32 %v508_v11  ;;  %vm1825_vm1 = vcmp.eq.s32.totalorder %v1823_v49, 0  ;;  %vm1828_vm2 = vcmp.eq.s32.totalorder %v1823_v49, 2 }
 0x323   :  { %vm1824_vm3 = vcmp.lt.s32.totalorder %v1823_v49, 2  ;;  %v539_v13 = vand.u32 3, %v522_v30 }
 0x324   :  { %v513_v21 = vand.u32 2147483647, %v512_v15 }
 0x325   :  { %vm540_vm8 = vcmp.lt.s32.totalorder %v539_v13, 2  ;;  %vm541_vm9 = vcmp.eq.s32.totalorder %v539_v13, 0  ;;  %vm544_vm10 = vcmp.eq.s32.totalorder %v539_v13, 2 }
 0x326   :  { %v516_v23 = vmul.f32 %v515_v17, %v513_v21 }
 0x328   :  { %v517_v24 = vxor.u32 2147483648, %v516_v23 }
 0x32a   :  { %v518_v29 = vsel %vm397_vm15, %v517_v24, %v516_v23 }
 0x32b   :  { %v521_v26 = vsel %vm4246_vm0, %v4179_v41, %v518_v29 }
 0x32c   :  { %v523_v32 = vmul.f32 %v521_v26, %v521_v26 }
 0x32e   :  { %v531_v33 = vmul.f32 -0.00019511016, %v523_v32  ;;  %v524_v27 = vmul.f32 -0.001358992, %v523_v32 }
 0x330   :  { %v532_v34 = vadd.f32 0.008332121, %v531_v33  ;;  %v525_v59 = vadd.f32 0.041655596, %v524_v27 }
 0x332   :  { %v533_v37 = vmul.f32 %v532_v34, %v523_v32  ;;  %v526_v46 = vmul.f32 %v525_v59, %v523_v32 }
 0x334   :  { %v534_v39 = vadd.f32 -0.16666654, %v533_v37  ;;  %v527_v57 = vadd.f32 -0.4999988, %v526_v46 }
 0x336   :  { %v535_v47 = vmul.f32 %v534_v39, %v523_v32  ;;  %v528_v50 = vmul.f32 %v527_v57, %v523_v32  ;;  %v4301_v57 = vld [vmem:[%s5000_s2 + $0x20] sm:$0xff] }
 0x338   :  { %v536_v31 = vadd.f32 1.0, %v535_v47  ;;  %v529_v56 = vadd.f32 1.0, %v528_v50 }
 0x33a   :  { %v537_v38 = vmul.f32 %v536_v31, %v521_v26  ;;  %v545_v35 = vxor.u32 2147483648, %v529_v56 }
 0x33c   :  { %v542_v58 = vxor.u32 2147483648, %v537_v38  ;;  %v1830_v4 = vsel %vm1828_vm2, %v545_v35, %v537_v38  ;;  %v546_v17 = vsel %vm544_vm10, %v545_v35, %v537_v38 }
 0x33e   :  { %v1827_v63 = vsel %vm1825_vm1, %v529_v56, %v542_v58  ;;  %v543_v15 = vsel %vm541_vm9, %v529_v56, %v542_v58 }
 0x33f   :  { %v1831_v6 = vsel %vm1824_vm3, %v1827_v63, %v1830_v4  ;;  %v547_v21 = vsel %vm540_vm8, %v543_v15, %v546_v17 }
 0x340   :  { %v1832_v11 = vsel %vm538_vm4, nan, %v1831_v6  ;;  %v548_v23 = vsel %vm538_vm4, nan, %v547_v21 }
 0x35f   :  { %v2917_v5 = vpop.f32.mrf.mxu0 }
 0x365   :  { %v2897_v55 = vpop.f32.mrf.mxu3 }
 0x366   :  { %v2922_v40 = vadd.f32 %v2921_v61, %v2897_v55  ;;  %2937 = vrot.lane.b32.xlu0 %v2897_v55, %s3805_s22 }
 0x368   :  { %3721 = vtanh.f32 %v2922_v40 }
 0x36e   :  { %v3722_v53 = vpop.eup %3721  ;;  %1331 = vperm.xlu0 %3700, %v548_v23  }
 0x36f   :  { %v2924_v51 = vsub.f32 1.0, %v3722_v53 }
 0x371   :  { %v2925_v36 = vmul.f32 %v3722_v53, %v2924_v51  ;;  %v4325_v53 = vld [vmem:[%s4998_s0 + $0x18] sm:$0xff] }
 0x372   :  { %v549_v38 = vand.u32 2147483647, %v4325_v53  ;;  %vm551_vm10 = vcmp.lt.s32.totalorder %v4325_v53, 0 }
 0x373   :  { %2931 = vrot.lane.b32.xlu2 %v2925_v36, %s3806_s25  ;;  %2927 = vrot.lane.b32.xlu1 %v2925_v36, %s3807_s30 }
 0x374   :  { %v556_v58 = vand.u32 8388607, %v549_v38 }
 0x376   :  { %v557_v15 = vor.u32 8388608, %v556_v58 }
 0x37b   :  { %2939 = vrot.lane.b32.xlu1 %v2917_v5, %s3805_s22 }
 0x383   :  { %2620 = vperm.xlu1 %3697, %v1832_v11  }
 0x38b   :  { %3703 = vset.pattern.permute.xlu1 %v3798_v3 }
 0x3cd   :  { %v2932_v29 = vpop.permute.xlu2 %2931 }
 0x3d8   :  { %v2938_v32 = vpop.permute.xlu0 %2937 }
 0x3e0   :  { %v1332_v33 = vpop.permute.xlu0 %1331 }
 0x3e1   :  { %v1362_v27 = vmul.f32 %v4001_v12, %v1332_v33 }
 0x3e3   :  { %2669 = vrot.lane.b32.xlu1 %v1362_v27, %s3805_s22 }
 0x3e5   :  { %v2928_v24 = vpop.permute.xlu1 %2927 }
 0x3e6   :  { %v2930_v25 = vmul.f32 %v2928_v24, %v2925_v36 }
 0x3e8   :  { %v2934_v26 = vmul.f32 %v2932_v29, %v2930_v25 }
 0x3ea   :  { %3662 = vmatmul.msk.f32.vlgmr.msrb.gmra.mxu1 %vm2721_vm5, %v2934_v26  ;;  %v597_v26 = vshll.u32 %v557_v15, 8 }
 0x3eb   :  { %3218 = vmatpush.msrb.mxu1 %v3967_v42 }
 0x3ed   :  { %3219 = vmatpush.msrb.mxu1 %v3972_v43  ;;  %v2940_v34 = vpop.permute.xlu1 %2939 }
 0x3ee   :  { %v2941_v59 = vsel %vm2721_vm5, %v2938_v32, %v2940_v34 }
 0x3ef   :  { %3220 = vmatpush.msrb.mxu1 %v3979_v44 }
 0x3f1   :  { %3221 = vmatpush.msrb.mxu1 %v3987_v45 }
 0x3f5   :  { %v2621_v43 = vpop.permute.xlu1 %2620 }
 0x3f6   :  { %v2651_v44 = vmul.f32 %v4008_v48, %v2621_v43  ;;  %v599_v43 = vshrl.u32 %v597_v26, 16 }
 0x467   :  { %v2963_v37 = vpop.f32.mrf.mxu1 }
 0x468   :  { %v2964_v61 = vadd.f32 %v2963_v37, %v2941_v59  ;;  %v598_v37 = vand.u32 65535, %v597_v26 }
 0x46a   :  { %v2966_v55 = vadd.f32 %v4146_v2, %v2964_v61 }
 0x46c   :  { %3723 = vtanh.f32 %v2966_v55 }
 0x472   :  { %v3724_v42 = vpop.eup %3723 }
 0x473   :  { %2969 = vrot.lane.b32.xlu2 %v3724_v42, %s3807_s30 }
 0x47b   :  { %50 = vperm.xlu2 %3701, %v4179_v41   ;;  %v2670_v41 = vpop.permute.xlu1 %2669 }
 0x483   :  { %2701 = vrot.lane.b32.xlu2 %v2651_v44, %s3806_s25 }
 0x484   :  { %3702 = vset.pattern.permute.xlu2 %v3797_v1 }
 0x4cd   :  { %v2970_v45 = vpop.permute.xlu2 %2969 }
 0x4ce   :  { %v2973_v12 = vsub.f32 %v4160_v19, %v2970_v45  ;;  %v2972_v60 = vadd.f32 %v2970_v45, %v4160_v19  ;;  %v4294_v19 = vld [vmem:[%s5000_s2 + $0x30] sm:$0xff] }
 0x4d0   :  { %v2974_v40 = vmul.f32 %v3724_v42, %v2973_v12 }
 0x4d2   :  { %v2975_v46 = vadd.f32 %v2974_v40, %v2972_v60 }
 0x4d4   :  { %v4281_v39 = vmul.f32 0.5, %v2975_v46 }
 0x4d5   :  { %v51_v0 = vpop.permute.xlu2 %50 }
 0x4d6   :  { %2978 = vst.msk [vmem:[#allocation3 + $0x8] sm:$0xff] %vm2721_vm5, %v4281_v39  ;;  %3663 = vmatmul.msk.f32.vlgmr.msrb.gmra.mxu2 %vm2721_vm5, %v4281_v39  ;;  %3664 = vmatmul.msk.f32.vlgmr.msrb.gmra.mxu3 %vm2721_vm5, %v4281_v39  ;;  %v81_v48 = vmul.f32 %v4016_v52, %v51_v0 }
 0x4d7   :  { %3264 = vmatpush.msrb.mxu2 %v4034_v7  ;;  %3300 = vmatpush.msrb.mxu3 %v4294_v19  ;;  %v4309_v7 = vld [vmem:[%s5000_s2 + $0x10] sm:$0xff] }
 0x4d8   :  { %v2724_v52 = vsel %vm2721_vm5, %v81_v48, %v2670_v41 }
 0x4d9   :  { %3265 = vmatpush.msrb.mxu2 %v4039_v8  ;;  %3301 = vmatpush.msrb.mxu3 %v4301_v57  ;;  %v4316_v8 = vld [vmem:[%s5000_s2] sm:$0xff] }
 0x4db   :  { %3266 = vmatpush.msrb.mxu2 %v4046_v9  ;;  %3302 = vmatpush.msrb.mxu3 %v4309_v7 }
 0x4dd   :  { %v2702_v47 = vpop.permute.xlu2 %2701  ;;  %3267 = vmatpush.msrb.mxu2 %v4058_v10  ;;  %3303 = vmatpush.msrb.mxu3 %v4316_v8  ;;  %v552_v10 = vand.u32 2139095040, %v4325_v53 }
 0x4de   :  { %v2733_v30 = vsel %vm2730_vm6, %v2724_v52, %v2702_v47 }
 0x4df   :  { %v2745_v9 = vadd.f32 %v4022_v54, %v2733_v30  ;;  %v553_v50 = vshrl.u32 %v552_v10, 23 }
 0x4e1   :  { %2754 = vst.msk [vmem:[#allocation2 + $0x10] sm:$0xff] %vm2751_vm7, %v2745_v9  ;;  %v3618_v31 = vadd.s32 4294967169, %v553_v50 }
 0x4e3   :  { %v559_v51 = vadd.s32 1, %v3618_v31 }
 0x4e5   :  { %vm560_vm11 = vcmp.gt.s32.totalorder %v559_v51, 0 }
 0x4e6   :  { %v561_v62 = vsel %vm560_vm11, %v559_v51, 0  ;;  %vm4387_vm11 = vcmp.le.f32.partialorder %v549_v38, 0.7853982 }
 0x4e7   :  { %v563_v36 = vand.u32 31, %v561_v62  ;;  %v4336_v35 = vshrl.u32 %v561_v62, 5 }
 0x4e9   :  { %v4328_v56 = vsub.s32 32, %v563_v36  ;;  %v575_v54 = vshll.u32 %v3802_v20, %v563_v36  ;;  %v566_v5 = vshll.u32 %v3799_v14, %v563_v36  ;;  %v569_v4 = vshll.u32 %v3800_v16, %v563_v36 }
 0x4ea   :  { %v572_v11 = vshll.u32 %v3801_v18, %v563_v36  ;;  %v578_v23 = vshll.u32 %v3803_v22, %v563_v36  ;;  %vm581_vm12 = vcmp.lt.s32.totalorder %v4336_v35, 1  ;;  %vm582_vm13 = vcmp.lt.s32.totalorder %v4336_v35, 2 }
 0x4eb   :  { %v576_v49 = vshrl.u32 %v3803_v22, %v4328_v56  ;;  %v567_v63 = vshrl.u32 %v3800_v16, %v4328_v56  ;;  %v570_v6 = vshrl.u32 %v3801_v18, %v4328_v56  ;;  %v573_v13 = vshrl.u32 %v3802_v20, %v4328_v56 }
 0x4ec   :  { %v579_v29 = vshrl.u32 %v3804_v28, %v4328_v56  ;;  %vm583_vm14 = vcmp.lt.s32.totalorder %v4336_v35, 3  ;;  %vm584_vm15 = vcmp.lt.s32.totalorder %v4336_v35, 4 }
 0x4ed   :  { %v568_v17 = vor.u32 %v567_v63, %v566_v5  ;;  %v577_v21 = vor.u32 %v576_v49, %v575_v54  ;;  %v571_v24 = vor.u32 %v570_v6, %v569_v4  ;;  %v574_v25 = vor.u32 %v573_v13, %v572_v11 }
 0x4ee   :  { %v580_v32 = vor.u32 %v579_v29, %v578_v23  ;;  %v565_v11 = vshrl.u32 %v3799_v14, %v4328_v56 }
 0x4ef   :  { %v589_v33 = vsel %vm581_vm12, %v568_v17, %v571_v24  ;;  %v590_v27 = vsel %vm584_vm15, %v577_v21, 920167782  ;;  %v593_v59 = vsel %vm581_vm12, %v571_v24, %v574_v25  ;;  %v586_v23 = vsel %vm584_vm15, %v574_v25, 2102212464 }
 0x4f0   :  { %v591_v34 = vsel %vm583_vm14, %v574_v25, %v590_v27  ;;  %v594_v55 = vsel %vm584_vm15, %v580_v32, 1326507024  ;;  %v587_v27 = vsel %vm583_vm14, %v571_v24, %v586_v23  ;;  %vm692_vm15 = vweird.f32 %v4325_v53 }
 0x4f1   :  { %v592_v61 = vsel %vm582_vm13, %v589_v33, %v591_v34  ;;  %v595_v42 = vsel %vm583_vm14, %v577_v21, %v594_v55  ;;  %v585_v33 = vsel %vm581_vm12, %v565_v11, %v568_v17 }
 0x4f2   :  { %v622_v44 = vand.u32 65535, %v592_v61  ;;  %v623_v45 = vshrl.u32 %v592_v61, 16  ;;  %v596_v12 = vsel %vm582_vm13, %v593_v59, %v595_v42  ;;  %v588_v59 = vsel %vm582_vm13, %v585_v33, %v587_v27 }
 0x4f3   :  { %v600_v60 = vand.u32 65535, %v596_v12  ;;  %v601_v40 = vshrl.u32 %v596_v12, 16  ;;  %v642_v42 = vmul.u32 %v597_v26, %v588_v59 }
 0x4f4   :  { %v625_v46 = vmul.u32 %v623_v45, %v598_v37  ;;  %v624_v0 = vmul.u32 %v622_v44, %v598_v37  ;;  %v626_v48 = vmul.u32 %v622_v44, %v599_v43  ;;  %v627_v30 = vmul.u32 %v623_v45, %v599_v43 }
 0x4f5   :  { %v602_v41 = vmul.u32 %v600_v60, %v598_v37  ;;  %v603_v52 = vmul.u32 %v601_v40, %v598_v37  ;;  %v604_v47 = vmul.u32 %v600_v60, %v599_v43  ;;  %v605_v50 = vmul.u32 %v601_v40, %v599_v43 }
 0x4f6   :  { %v628_v9 = vshll.u32 %v625_v46, 16  ;;  %v630_v10 = vshll.u32 %v626_v48, 16  ;;  %v629_v58 = vshrl.u32 %v625_v46, 16  ;;  %v631_v15 = vshrl.u32 %v626_v48, 16 }
 0x4f7   :  { %v606_v31 = vshll.u32 %v603_v52, 16  ;;  %v608_v51 = vshll.u32 %v604_v47, 16  ;;  %v607_v63 = vshrl.u32 %v603_v52, 16  ;;  %v609_v29 = vshrl.u32 %v604_v47, 16 }
 0x4f8   :  { %vm632_vm0 = vc.u32 %v624_v0, %v628_v9  ;;  %v634_v62 = vadd.s32 %v628_v9, %v624_v0 }
 0x4f9   :  { %vm610_vm1 = vc.u32 %v602_v41, %v606_v31  ;;  %v612_v36 = vadd.s32 %v606_v31, %v602_v41  ;;  %v633_v54 = vsel %vm632_vm0, 1, %v3798_v3 }
 0x4fa   :  { %v611_v49 = vsel %vm610_vm1, 1, %v3798_v3  ;;  %v635_v5 = vadd.s32 %v633_v54, %v627_v30  ;;  %vm636_vm2 = vc.u32 %v634_v62, %v630_v10  ;;  %v638_v37 = vadd.s32 %v634_v62, %v630_v10 }
 0x4fb   :  { %v613_v4 = vadd.s32 %v611_v49, %v605_v50  ;;  %vm614_vm3 = vc.u32 %v612_v36, %v608_v51  ;;  %v637_v6 = vsel %vm636_vm2, 1, %v3798_v3 }
 0x4fc   :  { %v615_v13 = vsel %vm614_vm3, 1, %v3798_v3  ;;  %v639_v21 = vadd.s32 %v637_v6, %v635_v5 }
 0x4fd   :  { %v617_v32 = vadd.s32 %v615_v13, %v613_v4 }
 0x4fe   :  { %v640_v34 = vadd.s32 %v639_v21, %v629_v58  ;;  %v3023_v21 = vld [vmem:[#allocation2 + $0x10] sm:$0xff] }
 0x4ff   :  { %v618_v56 = vadd.s32 %v617_v32, %v607_v63 }
 0x500   :  { %v641_v61 = vadd.s32 %v640_v34, %v631_v15 }
 0x501   :  { %v619_v55 = vadd.s32 %v618_v56, %v609_v29 }
 0x502   :  { %v645_v43 = vadd.s32 1, %v641_v61 }
 0x503   :  { %vm644_vm4 = vc.u32 %v619_v55, %v638_v37  ;;  %v643_v35 = vadd.s32 %v638_v37, %v619_v55 }
 0x504   :  { %v646_v25 = vsel %vm644_vm4, %v645_v43, %v641_v61 }
 0x505   :  { %v647_v44 = vadd.s32 %v646_v25, %v642_v42 }
 0x507   :  { %v648_v45 = vadd.s32 536870912, %v647_v44 }
 0x509   :  { %v649_v12 = vshrl.u32 %v648_v45, 30 }
 0x50b   :  { %v650_v60 = vshll.u32 %v649_v12, 30  ;;  %v673_v23 = vsub.s32 4, %v649_v12 }
 0x50d   :  { %v651_v17 = vsub.s32 %v647_v44, %v650_v60  ;;  %v674_v33 = vsel %vm551_vm10, %v673_v23, %v649_v12 }
 0x50e   :  { %v676_v59 = vsel %vm4387_vm11, 0, %v674_v33 }
 0x50f   :  { %vm652_vm8 = vcmp.lt.s32.totalorder %v651_v17, 0  ;;  %v653_v40 = vsub.s32 0, %v651_v17  ;;  %v1977_v42 = vadd.s32 3, %v676_v59 }
 0x511   :  { %v654_v24 = vsel %vm652_vm8, %v653_v40, %v651_v17  ;;  %v1978_v45 = vand.u32 3, %v1977_v42  ;;  %v4478_v42 = vld [vmem:[%s5001_s3 + $0x10] sm:$0xff] }
 0x512   :  { %v655_v46 = vclz %v654_v24 }
 0x513   :  { %vm1980_vm12 = vcmp.eq.s32.totalorder %v1978_v45, 0  ;;  %vm1983_vm13 = vcmp.eq.s32.totalorder %v1978_v45, 2  ;;  %vm1979_vm14 = vcmp.lt.s32.totalorder %v1978_v45, 2  ;;  %v4496_v45 = vld [vmem:[%s5001_s3 + $0x8] sm:$0xff] }
 0x514   :  { %v3619_v0 = vadd.s32 4294967294, %v655_v46 }
 0x516   :  { %vm3620_vm9 = vcmp.lt.s32.totalorder %v3619_v0, 0 }
 0x517   :  { %v658_v48 = vsel %vm3620_vm9, 0, %v3619_v0 }
 0x518   :  { %v659_v41 = vsub.s32 32, %v658_v48  ;;  %v663_v52 = vsub.s32 4294967266, %v658_v48  ;;  %v660_v47 = vshll.u32 %v651_v17, %v658_v48 }
 0x51a   :  { %v661_v26 = vshrl.u32 %v643_v35, %v659_v41  ;;  %v664_v30 = vadd.s32 127, %v663_v52  ;;  %v693_v35 = vand.u32 3, %v676_v59 }
 0x51c   :  { %v662_v9 = vor.u32 %v661_v26, %v660_v47  ;;  %v665_v10 = vshll.u32 %v664_v30, 23  ;;  %vm694_vm0 = vcmp.lt.s32.totalorder %v693_v35, 2  ;;  %vm695_vm1 = vcmp.eq.s32.totalorder %v693_v35, 0 }
 0x51d   :  { %vm698_vm2 = vcmp.eq.s32.totalorder %v693_v35, 2 }
 0x51e   :  { %v666_v50 = vor.u32 4788187, %v665_v10  ;;  %v669_v31 = vcvt.s32.f32 %v662_v9 }
 0x520   :  { %v667_v51 = vand.u32 2147483647, %v666_v50  ;;  %v4410_v50 = vld [vmem:[%s5000_s2 + $0x38] sm:$0xff] }
 0x522   :  { %v670_v62 = vmul.f32 %v669_v31, %v667_v51  ;;  %v4416_v51 = vld [vmem:[%s5000_s2 + $0x28] sm:$0xff] }
 0x524   :  { %v671_v36 = vxor.u32 2147483648, %v670_v62 }
 0x526   :  { %v672_v49 = vsel %vm551_vm10, %v671_v36, %v670_v62  ;;  %v4422_v62 = vld [vmem:[%s5000_s2 + $0x18] sm:$0xff]  ;;  %v4428_v36 = vld [vmem:[%s5000_s2 + $0x8] sm:$0xff] }
 0x527   :  { %v675_v58 = vsel %vm4387_vm11, %v4325_v53, %v672_v49  ;;  %v4434_v49 = vld [vmem:[%s5002_s4 + $0x2] ss:$0 sm:$0xff] }
 0x528   :  { %v677_v5 = vmul.f32 %v675_v58, %v675_v58 }
 0x52a   :  { %v685_v63 = vmul.f32 -0.00019511016, %v677_v5  ;;  %v678_v4 = vmul.f32 -0.001358992, %v677_v5 }
 0x52c   :  { %v686_v6 = vadd.f32 0.008332121, %v685_v63  ;;  %v679_v11 = vadd.f32 0.041655596, %v678_v4  ;;  %v4441_v4 = vld [vmem:[%s5002_s4 + $0x1] ss:$0 sm:$0xff] }
 0x52e   :  { %v687_v13 = vmul.f32 %v686_v6, %v677_v5  ;;  %v680_v29 = vmul.f32 %v679_v11, %v677_v5 }
 0x530   :  { %v688_v32 = vadd.f32 -0.16666654, %v687_v13  ;;  %v681_v27 = vadd.f32 -0.4999988, %v680_v29 }
 0x532   :  { %v689_v34 = vmul.f32 %v688_v32, %v677_v5  ;;  %v682_v37 = vmul.f32 %v681_v27, %v677_v5 }
 0x534   :  { %v690_v61 = vadd.f32 1.0, %v689_v34  ;;  %v683_v25 = vadd.f32 1.0, %v682_v37 }
 0x536   :  { %v691_v44 = vmul.f32 %v690_v61, %v675_v58  ;;  %v699_v12 = vxor.u32 2147483648, %v683_v25 }
 0x538   :  { %v696_v60 = vxor.u32 2147483648, %v691_v44  ;;  %v1985_v24 = vsel %vm1983_vm13, %v699_v12, %v691_v44  ;;  %v700_v41 = vsel %vm698_vm2, %v699_v12, %v691_v44  ;;  %v4491_v44 = vld [vmem:[%s4998_s0 + $0x20] sm:$0xff] }
 0x539   :  { %v4505_v12 = vld [vmem:[%s5001_s3] sm:$0xff]  ;;  %vm705_vm2 = vcmp.lt.s32.totalorder %v4491_v44, 0 }
 0x53a   :  { %v1982_v40 = vsel %vm1980_vm12, %v683_v25, %v696_v60  ;;  %v697_v48 = vsel %vm695_vm1, %v683_v25, %v696_v60  ;;  %v706_v60 = vand.u32 2139095040, %v4491_v44 }
 0x53b   :  { %v1986_v46 = vsel %vm1979_vm14, %v1982_v40, %v1985_v24  ;;  %v701_v52 = vsel %vm694_vm0, %v697_v48, %v700_v41  ;;  %v703_v48 = vand.u32 2147483647, %v4491_v44 }
 0x53c   :  { %v1987_v0 = vsel %vm692_vm15, nan, %v1986_v46  ;;  %v702_v47 = vsel %vm692_vm15, nan, %v701_v52 }
 0x559   :  { %v2999_v15 = vpop.f32.mrf.mxu2  ;;  %v3019_v17 = vpop.f32.mrf.mxu3 }
 0x55a   :  { %v3024_v38 = vadd.f32 %v3023_v21, %v2999_v15  ;;  %3039 = vrot.lane.b32.xlu2 %v2999_v15, %s3805_s22 }
 0x55c   :  { %3725 = vtanh.f32 %v3024_v38 }
 0x562   :  { %v3726_v56 = vpop.eup %3725  ;;  %1336 = vperm.xlu2 %3702, %v702_v47   ;;  %v710_v47 = vand.u32 8388607, %v703_v48 }
 0x563   :  { %v3026_v55 = vsub.f32 1.0, %v3726_v56 }
 0x565   :  { %v3027_v43 = vmul.f32 %v3726_v56, %v3026_v55 }
 0x567   :  { %3033 = vrot.lane.b32.xlu1 %v3027_v43, %s3806_s25  ;;  %3029 = vrot.lane.b32.xlu0 %v3027_v43, %s3807_s30 }
 0x56a   :  { %3705 = vset.pattern.permute.xlu2 %v3798_v3 }
 0x56f   :  { %3041 = vrot.lane.b32.xlu0 %v3019_v17, %s3805_s22  ;;  %v707_v17 = vshrl.u32 %v706_v60, 23 }
 0x571   :  { %v3621_v40 = vadd.s32 4294967169, %v707_v17 }
 0x573   :  { %v713_v24 = vadd.s32 1, %v3621_v40 }
 0x575   :  { %vm714_vm3 = vcmp.gt.s32.totalorder %v713_v24, 0 }
 0x576   :  { %v715_v46 = vsel %vm714_vm3, %v713_v24, 0  ;;  %vm4568_vm3 = vcmp.le.f32.partialorder %v703_v48, 0.7853982 }
 0x577   :  { %2625 = vperm.xlu0 %3700, %v1987_v0   ;;  %v717_v0 = vand.u32 31, %v715_v46 }
 0x579   :  { %v4509_v35 = vsub.s32 32, %v717_v0  ;;  %v729_v41 = vshll.u32 %v3802_v20, %v717_v0 }
 0x57b   :  { %v730_v52 = vshrl.u32 %v3803_v22, %v4509_v35 }
 0x5b4   :  { %v3040_v5 = vpop.permute.xlu2 %3039 }
 0x5bc   :  { %v1337_v63 = vpop.permute.xlu2 %1336 }
 0x5bd   :  { %v1363_v6 = vmul.f32 %v4441_v4, %v1337_v63 }
 0x5bf   :  { %2671 = vrot.lane.b32.xlu2 %v1363_v6, %s3805_s22  ;;  %v731_v6 = vor.u32 %v730_v52, %v729_v41 }
 0x5d9   :  { %v3030_v26 = vpop.permute.xlu0 %3029  ;;  %v3034_v9 = vpop.permute.xlu1 %3033 }
 0x5da   :  { %v3032_v30 = vmul.f32 %v3030_v26, %v3027_v43  ;;  %v4485_v43 = vld [vmem:[%s5003_s5] ss:$0 sm:$0xff]  ;;  %v4517_v26 = vshrl.u32 %v715_v46, 5 }
 0x5dc   :  { %v3036_v10 = vmul.f32 %v3034_v9, %v3032_v30  ;;  %v720_v30 = vshll.u32 %v3799_v14, %v717_v0  ;;  %v721_v9 = vshrl.u32 %v3800_v16, %v4509_v35  ;;  %vm735_vm4 = vcmp.lt.s32.totalorder %v4517_v26, 1 }
 0x5dd   :  { %vm736_vm8 = vcmp.lt.s32.totalorder %v4517_v26, 2  ;;  %vm737_vm9 = vcmp.lt.s32.totalorder %v4517_v26, 3  ;;  %vm738_vm10 = vcmp.lt.s32.totalorder %v4517_v26, 4 }
 0x5de   :  { %3665 = vmatmul.msk.f32.vlgmr.msra.gmra.mxu0 %vm2721_vm5, %v3036_v10  ;;  %v723_v10 = vshll.u32 %v3800_v16, %v717_v0  ;;  %v722_v63 = vor.u32 %v721_v9, %v720_v30 }
 0x5df   :  { %3320 = vmatpush.msra.mxu0 %v4410_v50 }
 0x5e1   :  { %v3042_v31 = vpop.permute.xlu0 %3041  ;;  %3321 = vmatpush.msra.mxu0 %v4416_v51 }
 0x5e2   :  { %v3043_v11 = vsel %vm2721_vm5, %v3040_v5, %v3042_v31  ;;  %v724_v31 = vshrl.u32 %v3801_v18, %v4509_v35  ;;  %v711_v5 = vor.u32 8388608, %v710_v47 }
 0x5e3   :  { %3322 = vmatpush.msra.mxu0 %v4422_v62 }
 0x5e5   :  { %3323 = vmatpush.msra.mxu0 %v4428_v36 }
 0x5e9   :  { %v2626_v54 = vpop.permute.xlu0 %2625 }
 0x5ea   :  { %v2652_v58 = vmul.f32 %v4434_v49, %v2626_v54  ;;  %v726_v54 = vshll.u32 %v3801_v18, %v717_v0 }
 0x5ec   :  { %2703 = vrot.lane.b32.xlu0 %v2652_v58, %s3806_s25  ;;  %v727_v58 = vshrl.u32 %v3802_v20, %v4509_v35 }
 0x619   :  { %v2672_v56 = vpop.permute.xlu2 %2671 }
 0x65b   :  { %v3065_v13 = vpop.f32.mrf.mxu0 }
 0x65c   :  { %v3066_v15 = vadd.f32 %v3065_v13, %v3043_v11  ;;  %v732_v11 = vshll.u32 %v3803_v22, %v717_v0  ;;  %v725_v13 = vor.u32 %v724_v31, %v723_v10 }
 0x65e   :  { %v3068_v21 = vadd.f32 %v4146_v2, %v3066_v15  ;;  %v4459_v2 = vld [vmem:[%s5002_s4] ss:$0 sm:$0xff]  ;;  %v2704_v37 = vpop.permute.xlu0 %2703  ;;  %v728_v15 = vor.u32 %v727_v58, %v726_v54 }
 0x660   :  { %3727 = vtanh.f32 %v3068_v21  ;;  %v733_v21 = vshrl.u32 %v3804_v28, %v4509_v35 }
 0x666   :  { %v3728_v23 = vpop.eup %3727 }
 0x667   :  { %3071 = vrot.lane.b32.xlu1 %v3728_v23, %s3807_s30 }
 0x66f   :  { %55 = vperm.xlu1 %3703, %v4325_v53  }
 0x677   :  { %3704 = vset.pattern.permute.xlu1 %v3797_v1 }
 0x6d9   :  { %v3072_v38 = vpop.permute.xlu1 %3071 }
 0x6da   :  { %v3075_v29 = vsub.f32 %v4281_v39, %v3072_v38  ;;  %v3074_v32 = vadd.f32 %v3072_v38, %v4281_v39  ;;  %v4469_v39 = vld [vmem:[%s5001_s3 + $0x18] sm:$0xff]  ;;  %v734_v38 = vor.u32 %v733_v21, %v732_v11 }
 0x6dc   :  { %v3076_v33 = vmul.f32 %v3728_v23, %v3075_v29  ;;  %v751_v23 = vshll.u32 %v711_v5, 8  ;;  %v743_v29 = vsel %vm735_vm4, %v722_v63, %v725_v13 }
 0x6de   :  { %v3077_v27 = vadd.f32 %v3076_v33, %v3074_v32  ;;  %v744_v32 = vsel %vm738_vm10, %v731_v6, 920167782 }
 0x6df   :  { %v745_v33 = vsel %vm737_vm9, %v728_v15, %v744_v32 }
 0x6e0   :  { %v4452_v34 = vmul.f32 0.5, %v3077_v27  ;;  %v747_v27 = vsel %vm735_vm4, %v725_v13, %v728_v15 }
 0x6e1   :  { %v56_v59 = vpop.permute.xlu1 %55 }
 0x6e2   :  { %3080 = vst.msk [vmem:[#allocation3 + $0x10] sm:$0xff] %vm2721_vm5, %v4452_v34  ;;  %v82_v53 = vmul.f32 %v4459_v2, %v56_v59  ;;  %3666 = vmatmul.msk.f32.vlgmr.msra.gmra.mxu1 %vm2721_vm5, %v4452_v34  ;;  %3667 = vmatmul.msk.f32.vlgmr.msra.gmra.mxu2 %vm2721_vm5, %v4452_v34  ;;  %v752_v59 = vand.u32 65535, %v751_v23 }
 0x6e3   :  { %3366 = vmatpush.msra.mxu1 %v4469_v39  ;;  %3402 = vmatpush.msra.mxu2 %v4294_v19 }
 0x6e4   :  { %v2725_v61 = vsel %vm2721_vm5, %v82_v53, %v2672_v56  ;;  %v746_v56 = vsel %vm736_vm8, %v743_v29, %v745_v33  ;;  %v748_v53 = vsel %vm738_vm10, %v734_v38, 1326507024 }
 0x6e5   :  { %v2734_v55 = vsel %vm2730_vm6, %v2725_v61, %v2704_v37  ;;  %3367 = vmatpush.msra.mxu1 %v4478_v42  ;;  %3403 = vmatpush.msra.mxu2 %v4301_v57  ;;  %v749_v37 = vsel %vm737_vm9, %v731_v6, %v748_v53  ;;  %v753_v61 = vshrl.u32 %v751_v23, 16 }
 0x6e6   :  { %v2746_v25 = vadd.f32 %v4485_v43, %v2734_v55  ;;  %v776_v55 = vand.u32 65535, %v746_v56  ;;  %v750_v60 = vsel %vm736_vm8, %v747_v27, %v749_v37 }
 0x6e7   :  { %3368 = vmatpush.msra.mxu1 %v4496_v45  ;;  %3404 = vmatpush.msra.mxu2 %v4309_v7  ;;  %v754_v17 = vand.u32 65535, %v750_v60  ;;  %v755_v40 = vshrl.u32 %v750_v60, 16 }
 0x6e8   :  { %2755 = vst.msk [vmem:[#allocation2 + $0x18] sm:$0xff] %vm2751_vm7, %v2746_v25  ;;  %v777_v25 = vshrl.u32 %v746_v56, 16  ;;  %v778_v46 = vmul.u32 %v776_v55, %v752_v59  ;;  %v780_v0 = vmul.u32 %v776_v55, %v753_v61 }
 0x6e9   :  { %3369 = vmatpush.msra.mxu1 %v4505_v12  ;;  %3405 = vmatpush.msra.mxu2 %v4316_v8  ;;  %v756_v41 = vmul.u32 %v754_v17, %v752_v59  ;;  %v757_v52 = vmul.u32 %v755_v40, %v752_v59  ;;  %v758_v47 = vmul.u32 %v754_v17, %v753_v61 }
 0x6ea   :  { %v779_v24 = vmul.u32 %v777_v25, %v752_v59  ;;  %v781_v30 = vmul.u32 %v777_v25, %v753_v61  ;;  %v784_v10 = vshll.u32 %v780_v0, 16  ;;  %v759_v31 = vmul.u32 %v755_v40, %v753_v61 }
 0x6eb   :  { %v760_v54 = vshll.u32 %v757_v52, 16  ;;  %v762_v58 = vshll.u32 %v758_v47, 16  ;;  %v761_v32 = vshrl.u32 %v757_v52, 16  ;;  %v719_v59 = vshrl.u32 %v3799_v14, %v4509_v35 }
 0x6ec   :  { %v782_v9 = vshll.u32 %v779_v24, 16  ;;  %v783_v38 = vshrl.u32 %v779_v24, 16  ;;  %v785_v53 = vshrl.u32 %v780_v0, 16  ;;  %v740_v61 = vsel %vm738_vm10, %v728_v15, 2102212464 }
 0x6ed   :  { %vm764_vm12 = vc.u32 %v756_v41, %v760_v54  ;;  %v766_v6 = vadd.s32 %v760_v54, %v756_v41  ;;  %v763_v55 = vshrl.u32 %v758_v47, 16  ;;  %v739_v60 = vsel %vm735_vm4, %v719_v59, %v722_v63 }
 0x6ee   :  { %vm786_vm11 = vc.u32 %v778_v46, %v782_v9  ;;  %v788_v5 = vadd.s32 %v782_v9, %v778_v46  ;;  %v765_v21 = vsel %vm764_vm12, 1, %v3798_v3  ;;  %v741_v17 = vsel %vm737_vm9, %v725_v13, %v740_v61 }
 0x6ef   :  { %v787_v11 = vsel %vm786_vm11, 1, %v3798_v3  ;;  %v767_v33 = vadd.s32 %v765_v21, %v759_v31  ;;  %vm768_vm14 = vc.u32 %v766_v6, %v762_v58  ;;  %v742_v24 = vsel %vm736_vm8, %v739_v60, %v741_v17 }
 0x6f0   :  { %v789_v29 = vadd.s32 %v787_v11, %v781_v30  ;;  %vm790_vm13 = vc.u32 %v788_v5, %v784_v10  ;;  %v769_v56 = vsel %vm768_vm14, 1, %v3798_v3  ;;  %v792_v46 = vadd.s32 %v788_v5, %v784_v10 }
 0x6f1   :  { %v791_v27 = vsel %vm790_vm13, 1, %v3798_v3  ;;  %v771_v25 = vadd.s32 %v769_v56, %v767_v33  ;;  %v796_v52 = vmul.u32 %v751_v23, %v742_v24  ;;  %vm846_vm10 = vweird.f32 %v4491_v44 }
 0x6f2   :  { %v793_v37 = vadd.s32 %v791_v27, %v789_v29 }
 0x6f3   :  { %v772_v35 = vadd.s32 %v771_v25, %v761_v32 }
 0x6f4   :  { %v794_v40 = vadd.s32 %v793_v37, %v783_v38 }
 0x6f5   :  { %v773_v0 = vadd.s32 %v772_v35, %v763_v55 }
 0x6f6   :  { %v795_v41 = vadd.s32 %v794_v40, %v785_v53 }
 0x6f7   :  { %vm798_vm15 = vc.u32 %v773_v0, %v792_v46  ;;  %v797_v26 = vadd.s32 %v792_v46, %v773_v0 }
 0x6f8   :  { %v799_v30 = vadd.s32 1, %v795_v41 }
 0x6fa   :  { %v800_v15 = vsel %vm798_vm15, %v799_v30, %v795_v41 }
 0x6fb   :  { %v801_v47 = vadd.s32 %v800_v15, %v796_v52 }
 0x6fd   :  { %v802_v9 = vadd.s32 536870912, %v801_v47 }
 0x6ff   :  { %v803_v31 = vshrl.u32 %v802_v9, 30 }
 0x701   :  { %v804_v54 = vshll.u32 %v803_v31, 30  ;;  %v827_v52 = vsub.s32 4, %v803_v31 }
 0x703   :  { %v805_v63 = vsub.s32 %v801_v47, %v804_v54  ;;  %v828_v15 = vsel %vm705_vm2, %v827_v52, %v803_v31 }
 0x704   :  { %v830_v54 = vsel %vm4568_vm3, 0, %v828_v15 }
 0x705   :  { %vm806_vm0 = vcmp.lt.s32.totalorder %v805_v63, 0  ;;  %v807_v58 = vsub.s32 0, %v805_v63 }
 0x707   :  { %v808_v13 = vsel %vm806_vm0, %v807_v58, %v805_v63 }
 0x708   :  { %v809_v6 = vclz %v808_v13  ;;  %v847_v13 = vand.u32 3, %v830_v54 }
 0x70a   :  { %v3622_v11 = vadd.s32 4294967294, %v809_v6  ;;  %vm849_vm4 = vcmp.eq.s32.totalorder %v847_v13, 0  ;;  %vm852_vm8 = vcmp.eq.s32.totalorder %v847_v13, 2  ;;  %vm848_vm9 = vcmp.lt.s32.totalorder %v847_v13, 2 }
 0x70c   :  { %vm3623_vm1 = vcmp.lt.s32.totalorder %v3622_v11, 0 }
 0x70d   :  { %v812_v21 = vsel %vm3623_vm1, 0, %v3622_v11 }
 0x70e   :  { %v813_v10 = vsub.s32 32, %v812_v21  ;;  %v817_v5 = vsub.s32 4294967266, %v812_v21  ;;  %v814_v38 = vshll.u32 %v805_v63, %v812_v21  ;;  %v3125_v21 = vld [vmem:[#allocation2 + $0x18] sm:$0xff] }
 0x710   :  { %v815_v23 = vshrl.u32 %v797_v26, %v813_v10  ;;  %v818_v29 = vadd.s32 127, %v817_v5 }
 0x712   :  { %v816_v32 = vor.u32 %v815_v23, %v814_v38  ;;  %v819_v33 = vshll.u32 %v818_v29, 23 }
 0x714   :  { %v820_v27 = vor.u32 4788187, %v819_v33  ;;  %v823_v59 = vcvt.s32.f32 %v816_v32 }
 0x716   :  { %v821_v56 = vand.u32 2147483647, %v820_v27 }
 0x718   :  { %v824_v53 = vmul.f32 %v823_v59, %v821_v56  ;;  %v2132_v59 = vadd.s32 3, %v830_v54 }
 0x71a   :  { %v825_v37 = vxor.u32 2147483648, %v824_v53  ;;  %v2133_v56 = vand.u32 3, %v2132_v59 }
 0x71c   :  { %v826_v55 = vsel %vm705_vm2, %v825_v37, %v824_v53  ;;  %vm2134_vm11 = vcmp.lt.s32.totalorder %v2133_v56, 2  ;;  %vm2135_vm12 = vcmp.eq.s32.totalorder %v2133_v56, 0  ;;  %vm2138_vm13 = vcmp.eq.s32.totalorder %v2133_v56, 2 }
 0x71d   :  { %v829_v25 = vsel %vm4568_vm3, %v4491_v44, %v826_v55 }
 0x71e   :  { %v831_v60 = vmul.f32 %v829_v25, %v829_v25 }
 0x720   :  { %v839_v17 = vmul.f32 -0.00019511016, %v831_v60  ;;  %v832_v40 = vmul.f32 -0.001358992, %v831_v60 }
 0x722   :  { %v840_v24 = vadd.f32 0.008332121, %v839_v17  ;;  %v833_v35 = vadd.f32 0.041655596, %v832_v40 }
 0x724   :  { %v841_v46 = vmul.f32 %v840_v24, %v831_v60  ;;  %v834_v41 = vmul.f32 %v833_v35, %v831_v60 }
 0x726   :  { %v842_v0 = vadd.f32 -0.16666654, %v841_v46  ;;  %v835_v48 = vadd.f32 -0.4999988, %v834_v41 }
 0x728   :  { %v843_v30 = vmul.f32 %v842_v0, %v831_v60  ;;  %v836_v47 = vmul.f32 %v835_v48, %v831_v60 }
 0x72a   :  { %v844_v9 = vadd.f32 1.0, %v843_v30  ;;  %v837_v63 = vadd.f32 1.0, %v836_v47  ;;  %v4604_v47 = vld [vmem:[%s5004_s6] ss:$0 sm:$0xff] }
 0x72c   :  { %v845_v58 = vmul.f32 %v844_v9, %v829_v25  ;;  %v853_v11 = vxor.u32 2147483648, %v837_v63 }
 0x72e   :  { %v850_v6 = vxor.u32 2147483648, %v845_v58  ;;  %v854_v5 = vsel %vm852_vm8, %v853_v11, %v845_v58  ;;  %v2140_v37 = vsel %vm2138_vm13, %v853_v11, %v845_v58 }
 0x730   :  { %v851_v10 = vsel %vm849_vm4, %v837_v63, %v850_v6  ;;  %v2137_v53 = vsel %vm2135_vm12, %v837_v63, %v850_v6 }
 0x731   :  { %v855_v31 = vsel %vm848_vm9, %v851_v10, %v854_v5  ;;  %v2141_v61 = vsel %vm2134_vm11, %v2137_v53, %v2140_v37 }
 0x732   :  { %v856_v23 = vsel %vm846_vm10, nan, %v855_v31  ;;  %v2142_v55 = vsel %vm846_vm10, nan, %v2141_v61 }
 0x75f   :  { %v3101_v26 = vpop.f32.mrf.mxu1 }
 0x760   :  { %v3126_v38 = vadd.f32 %v3125_v21, %v3101_v26  ;;  %3141 = vrot.lane.b32.xlu0 %v3101_v26, %s3805_s22 }
 0x762   :  { %3729 = vtanh.f32 %v3126_v38 }
 0x765   :  { %v3121_v27 = vpop.f32.mrf.mxu2 }
 0x768   :  { %v3730_v29 = vpop.eup %3729  ;;  %1341 = vperm.xlu0 %3700, %v856_v23   ;;  %v4631_v23 = vld [vmem:[%s4998_s0 + $0x28] sm:$0xff] }
 0x769   :  { %v3128_v32 = vsub.f32 1.0, %v3730_v29  ;;  %v857_v56 = vand.u32 2147483647, %v4631_v23  ;;  %vm859_vm13 = vcmp.lt.s32.totalorder %v4631_v23, 0 }
 0x76b   :  { %v3129_v33 = vmul.f32 %v3730_v29, %v3128_v32  ;;  %v864_v37 = vand.u32 8388607, %v857_v56 }
 0x76d   :  { %3135 = vrot.lane.b32.xlu2 %v3129_v33, %s3806_s25  ;;  %3131 = vrot.lane.b32.xlu1 %v3129_v33, %s3807_s30 }
 0x770   :  { %3707 = vset.pattern.permute.xlu0 %v3798_v3 }
 0x775   :  { %3143 = vrot.lane.b32.xlu1 %v3121_v27, %s3805_s22 }
 0x77d   :  { %2630 = vperm.xlu1 %3704, %v2142_v55  }
 0x7c7   :  { %v3136_v35 = vpop.permute.xlu2 %3135 }
 0x7d2   :  { %v3142_v25 = vpop.permute.xlu0 %3141 }
 0x7da   :  { %v1342_v60 = vpop.permute.xlu0 %1341 }
 0x7db   :  { %v1364_v17 = vmul.f32 %v4441_v4, %v1342_v60 }
 0x7dd   :  { %2673 = vrot.lane.b32.xlu0 %v1364_v17, %s3805_s22 }
 0x7df   :  { %v3132_v40 = vpop.permute.xlu1 %3131 }
 0x7e0   :  { %v3134_v24 = vmul.f32 %v3132_v40, %v3129_v33 }
 0x7e2   :  { %v3138_v46 = vmul.f32 %v3136_v35, %v3134_v24  ;;  %v865_v24 = vor.u32 8388608, %v864_v37 }
 0x7e4   :  { %3668 = vmatmul.msk.f32.vlgmr.msra.gmra.mxu3 %vm2721_vm5, %v3138_v46 }
 0x7e5   :  { %3422 = vmatpush.msra.mxu3 %v4410_v50 }
 0x7e7   :  { %3423 = vmatpush.msra.mxu3 %v4416_v51  ;;  %v3144_v41 = vpop.permute.xlu1 %3143 }
 0x7e8   :  { %v3145_v48 = vsel %vm2721_vm5, %v3142_v25, %v3144_v41 }
 0x7e9   :  { %3424 = vmatpush.msra.mxu3 %v4422_v62 }
 0x7eb   :  { %3425 = vmatpush.msra.mxu3 %v4428_v36 }
 0x7ef   :  { %v2631_v0 = vpop.permute.xlu1 %2630 }
 0x7f0   :  { %v2653_v52 = vmul.f32 %v4434_v49, %v2631_v0 }
 0x7f2   :  { %2705 = vrot.lane.b32.xlu1 %v2653_v52, %s3806_s25 }
 0x84f   :  { %v2674_v5 = vpop.permute.xlu0 %2673 }
 0x867   :  { %v3167_v30 = vpop.f32.mrf.mxu3 }
 0x868   :  { %v3168_v15 = vadd.f32 %v3167_v30, %v3145_v48  ;;  %v905_v30 = vshll.u32 %v865_v24, 8 }
 0x86a   :  { %v3170_v9 = vadd.f32 %v4604_v47, %v3168_v15 }
 0x86c   :  { %3731 = vtanh.f32 %v3170_v9 }
 0x872   :  { %v3732_v54 = vpop.eup %3731 }
 0x873   :  { %3173 = vrot.lane.b32.xlu2 %v3732_v54, %s3807_s30 }
 0x87b   :  { %60 = vperm.xlu2 %3705, %v4491_v44   ;;  %v2706_v44 = vpop.permute.xlu1 %2705 }
 0x883   :  { %3706 = vset.pattern.permute.xlu2 %v3797_v1 }
 0x8cd   :  { %v3174_v63 = vpop.permute.xlu2 %3173 }
 0x8ce   :  { %v3177_v58 = vsub.f32 %v4452_v34, %v3174_v63  ;;  %v3176_v13 = vadd.f32 %v3174_v63, %v4452_v34 }
 0x8d0   :  { %v3178_v6 = vmul.f32 %v3732_v54, %v3177_v58 }
 0x8d2   :  { %v3179_v11 = vadd.f32 %v3178_v6, %v3176_v13  ;;  %v906_v13 = vand.u32 65535, %v905_v30 }
 0x8d4   :  { %v4612_v26 = vmul.f32 0.5, %v3179_v11 }
 0x8d5   :  { %v61_v21 = vpop.permute.xlu2 %60 }
 0x8d6   :  { %3182 = vst.msk [vmem:[#allocation3 + $0x18] sm:$0xff] %vm2721_vm5, %v4612_v26  ;;  %v83_v10 = vmul.f32 %v4459_v2, %v61_v21  ;;  %3669 = vmatmul.msk.f32.vlgmr.msrb.gmra.mxu0 %vm2721_vm5, %v4612_v26  ;;  %3670 = vmatmul.msk.f32.vlgmr.msrb.gmra.mxu1 %vm2721_vm5, %v4612_v26 }
 0x8d7   :  { %3468 = vmatpush.msrb.mxu0 %v4469_v39  ;;  %3504 = vmatpush.msrb.mxu1 %v4294_v19  ;;  %v860_v19 = vand.u32 2139095040, %v4631_v23 }
 0x8d8   :  { %v2726_v34 = vsel %vm2721_vm5, %v83_v10, %v2674_v5  ;;  %v907_v10 = vshrl.u32 %v905_v30, 16 }
 0x8d9   :  { %v2735_v38 = vsel %vm2730_vm6, %v2726_v34, %v2706_v44  ;;  %3469 = vmatpush.msrb.mxu0 %v4478_v42  ;;  %3505 = vmatpush.msrb.mxu1 %v4301_v57  ;;  %v861_v57 = vshrl.u32 %v860_v19, 23 }
 0x8da   :  { %v2747_v31 = vadd.f32 %v4485_v43, %v2735_v38 }
 0x8db   :  { %3470 = vmatpush.msrb.mxu0 %v4496_v45  ;;  %3506 = vmatpush.msrb.mxu1 %v4309_v7  ;;  %v3624_v29 = vadd.s32 4294967169, %v861_v57 }
 0x8dc   :  { %2756 = vst.msk [vmem:[#allocation2 + $0x20] sm:$0xff] %vm2751_vm7, %v2747_v31 }
 0x8dd   :  { %3471 = vmatpush.msrb.mxu0 %v4505_v12  ;;  %3507 = vmatpush.msrb.mxu1 %v4316_v8  ;;  %v867_v32 = vadd.s32 1, %v3624_v29 }
 0x8df   :  { %vm868_vm14 = vcmp.gt.s32.totalorder %v867_v32, 0 }
 0x8e0   :  { %v869_v33 = vsel %vm868_vm14, %v867_v32, 0  ;;  %vm4698_vm14 = vcmp.le.f32.partialorder %v857_v56, 0.7853982 }
 0x8e1   :  { %v871_v27 = vand.u32 31, %v869_v33  ;;  %v4647_v61 = vshrl.u32 %v869_v33, 5 }
 0x8e3   :  { %v4639_v59 = vsub.s32 32, %v871_v27  ;;  %v883_v7 = vshll.u32 %v3802_v20, %v871_v27  ;;  %v874_v8 = vshll.u32 %v3799_v14, %v871_v27  ;;  %v877_v25 = vshll.u32 %v3800_v16, %v871_v27 }
 0x8e4   :  { %v880_v17 = vshll.u32 %v3801_v18, %v871_v27  ;;  %v886_v41 = vshll.u32 %v3803_v22, %v871_v27  ;;  %vm889_vm15 = vcmp.lt.s32.totalorder %v4647_v61, 1  ;;  %vm890_vm0 = vcmp.lt.s32.totalorder %v4647_v61, 2 }
 0x8e5   :  { %v884_v53 = vshrl.u32 %v3803_v22, %v4639_v59  ;;  %v875_v55 = vshrl.u32 %v3800_v16, %v4639_v59  ;;  %v878_v60 = vshrl.u32 %v3801_v18, %v4639_v59  ;;  %v881_v40 = vshrl.u32 %v3802_v20, %v4639_v59 }
 0x8e6   :  { %v887_v48 = vshrl.u32 %v3804_v28, %v4639_v59  ;;  %vm891_vm1 = vcmp.lt.s32.totalorder %v4647_v61, 3  ;;  %vm892_vm2 = vcmp.lt.s32.totalorder %v4647_v61, 4 }
 0x8e7   :  { %v876_v35 = vor.u32 %v875_v55, %v874_v8  ;;  %v885_v46 = vor.u32 %v884_v53, %v883_v7  ;;  %v879_v0 = vor.u32 %v878_v60, %v877_v25  ;;  %v882_v52 = vor.u32 %v881_v40, %v880_v17 }
 0x8e8   :  { %v888_v15 = vor.u32 %v887_v48, %v886_v41 }
 0x8e9   :  { %v897_v9 = vsel %vm889_vm15, %v876_v35, %v879_v0  ;;  %v898_v54 = vsel %vm892_vm2, %v885_v46, 920167782  ;;  %v901_v58 = vsel %vm889_vm15, %v879_v0, %v882_v52 }
 0x8ea   :  { %v899_v63 = vsel %vm891_vm1, %v882_v52, %v898_v54  ;;  %v902_v11 = vsel %vm892_vm2, %v888_v15, 1326507024  ;;  %v873_v54 = vshrl.u32 %v3799_v14, %v4639_v59 }
 0x8eb   :  { %v900_v6 = vsel %vm890_vm0, %v897_v9, %v899_v63  ;;  %v903_v21 = vsel %vm891_vm1, %v885_v46, %v902_v11 }
 0x8ec   :  { %v930_v44 = vand.u32 65535, %v900_v6  ;;  %v931_v5 = vshrl.u32 %v900_v6, 16  ;;  %v904_v34 = vsel %vm890_vm0, %v901_v58, %v903_v21  ;;  %v894_v6 = vsel %vm892_vm2, %v882_v52, 2102212464 }
 0x8ed   :  { %v908_v38 = vand.u32 65535, %v904_v34  ;;  %v909_v31 = vshrl.u32 %v904_v34, 16  ;;  %vm1000_vm2 = vweird.f32 %v4631_v23 }
 0x8ee   :  { %v933_v19 = vmul.u32 %v931_v5, %v906_v13  ;;  %v932_v57 = vmul.u32 %v930_v44, %v906_v13  ;;  %v934_v29 = vmul.u32 %v930_v44, %v907_v10  ;;  %v935_v7 = vmul.u32 %v931_v5, %v907_v10 }
 0x8ef   :  { %v910_v32 = vmul.u32 %v908_v38, %v906_v13  ;;  %v911_v33 = vmul.u32 %v909_v31, %v906_v13  ;;  %v912_v27 = vmul.u32 %v908_v38, %v907_v10  ;;  %v913_v8 = vmul.u32 %v909_v31, %v907_v10 }
 0x8f0   :  { %v936_v53 = vshll.u32 %v933_v19, 16  ;;  %v938_v37 = vshll.u32 %v934_v29, 16  ;;  %v937_v46 = vshrl.u32 %v933_v19, 16  ;;  %v939_v58 = vshrl.u32 %v934_v29, 16 }
 0x8f1   :  { %v914_v55 = vshll.u32 %v911_v33, 16  ;;  %v916_v25 = vshll.u32 %v912_v27, 16  ;;  %v915_v48 = vshrl.u32 %v911_v33, 16  ;;  %v917_v11 = vshrl.u32 %v912_v27, 16 }
 0x8f2   :  { %vm940_vm3 = vc.u32 %v932_v57, %v936_v53  ;;  %v942_v60 = vadd.s32 %v936_v53, %v932_v57  ;;  %v893_v10 = vsel %vm889_vm15, %v873_v54, %v876_v35  ;;  %v895_v44 = vsel %vm891_vm1, %v879_v0, %v894_v6 }
 0x8f3   :  { %vm918_vm4 = vc.u32 %v910_v32, %v914_v55  ;;  %v920_v17 = vadd.s32 %v914_v55, %v910_v32  ;;  %v941_v40 = vsel %vm940_vm3, 1, %v3798_v3  ;;  %v896_v34 = vsel %vm890_vm0, %v893_v10, %v895_v44 }
 0x8f4   :  { %v919_v24 = vsel %vm918_vm4, 1, %v3798_v3  ;;  %v943_v41 = vadd.s32 %v941_v40, %v935_v7  ;;  %vm944_vm8 = vc.u32 %v942_v60, %v938_v37  ;;  %v946_v38 = vadd.s32 %v942_v60, %v938_v37 }
 0x8f5   :  { %v921_v15 = vadd.s32 %v919_v24, %v913_v8  ;;  %vm922_vm9 = vc.u32 %v920_v17, %v916_v25  ;;  %v945_v9 = vsel %vm944_vm8, 1, %v3798_v3  ;;  %v950_v57 = vmul.u32 %v905_v30, %v896_v34 }
 0x8f6   :  { %v923_v63 = vsel %vm922_vm9, 1, %v3798_v3  ;;  %v947_v13 = vadd.s32 %v945_v9, %v943_v41 }
 0x8f7   :  { %v925_v21 = vadd.s32 %v923_v63, %v921_v15 }
 0x8f8   :  { %v948_v5 = vadd.s32 %v947_v13, %v937_v46 }
 0x8f9   :  { %v926_v59 = vadd.s32 %v925_v21, %v915_v48 }
 0x8fa   :  { %v949_v31 = vadd.s32 %v948_v5, %v939_v58 }
 0x8fb   :  { %v927_v19 = vadd.s32 %v926_v59, %v917_v11 }
 0x8fc   :  { %v953_v29 = vadd.s32 1, %v949_v31 }
 0x8fd   :  { %vm952_vm10 = vc.u32 %v927_v19, %v946_v38  ;;  %v951_v61 = vadd.s32 %v946_v38, %v927_v19 }
 0x8fe   :  { %v954_v52 = vsel %vm952_vm10, %v953_v29, %v949_v31 }
 0x8ff   :  { %v955_v32 = vadd.s32 %v954_v52, %v950_v57 }
 0x901   :  { %v956_v33 = vadd.s32 536870912, %v955_v32 }
 0x903   :  { %v957_v27 = vshrl.u32 %v956_v33, 30 }
 0x905   :  { %v958_v7 = vshll.u32 %v957_v27, 30  ;;  %v981_v38 = vsub.s32 4, %v957_v27 }
 0x907   :  { %v959_v35 = vsub.s32 %v955_v32, %v958_v7  ;;  %v982_v19 = vsel %vm859_vm13, %v981_v38, %v957_v27 }
 0x908   :  { %v984_v52 = vsel %vm4698_vm14, 0, %v982_v19 }
 0x909   :  { %vm960_vm11 = vcmp.lt.s32.totalorder %v959_v35, 0  ;;  %v961_v53 = vsub.s32 0, %v959_v35  ;;  %v1001_v7 = vand.u32 3, %v984_v52 }
 0x90b   :  { %v962_v0 = vsel %vm960_vm11, %v961_v53, %v959_v35  ;;  %vm1003_vm15 = vcmp.eq.s32.totalorder %v1001_v7, 0  ;;  %vm1006_vm0 = vcmp.eq.s32.totalorder %v1001_v7, 2  ;;  %vm1002_vm1 = vcmp.lt.s32.totalorder %v1001_v7, 2 }
 0x90c   :  { %v963_v8 = vclz %v962_v0 }
 0x90e   :  { %v3625_v55 = vadd.s32 4294967294, %v963_v8  ;;  %v3227_v8 = vld [vmem:[#allocation2 + $0x20] sm:$0xff] }
 0x910   :  { %vm3626_vm12 = vcmp.lt.s32.totalorder %v3625_v55, 0 }
 0x911   :  { %v966_v25 = vsel %vm3626_vm12, 0, %v3625_v55 }
 0x912   :  { %v967_v37 = vsub.s32 32, %v966_v25  ;;  %v971_v60 = vsub.s32 4294967266, %v966_v25  ;;  %v968_v17 = vshll.u32 %v959_v35, %v966_v25 }
 0x914   :  { %v969_v30 = vshrl.u32 %v951_v61, %v967_v37  ;;  %v972_v40 = vadd.s32 127, %v971_v60 }
 0x916   :  { %v970_v24 = vor.u32 %v969_v30, %v968_v17  ;;  %v973_v46 = vshll.u32 %v972_v40, 23 }
 0x918   :  { %v974_v41 = vor.u32 4788187, %v973_v46  ;;  %v977_v48 = vcvt.s32.f32 %v970_v24  ;;  %v2287_v24 = vadd.s32 3, %v984_v52 }
 0x91a   :  { %v975_v15 = vand.u32 2147483647, %v974_v41  ;;  %v2288_v46 = vand.u32 3, %v2287_v24 }
 0x91c   :  { %v978_v9 = vmul.f32 %v977_v48, %v975_v15  ;;  %vm2289_vm3 = vcmp.lt.s32.totalorder %v2288_v46, 2  ;;  %vm2290_vm4 = vcmp.eq.s32.totalorder %v2288_v46, 0  ;;  %vm2293_vm8 = vcmp.eq.s32.totalorder %v2288_v46, 2 }
 0x91e   :  { %v979_v54 = vxor.u32 2147483648, %v978_v9 }
 0x920   :  { %v980_v58 = vsel %vm859_vm13, %v979_v54, %v978_v9 }
 0x921   :  { %v983_v13 = vsel %vm4698_vm14, %v4631_v23, %v980_v58 }
 0x922   :  { %v985_v6 = vmul.f32 %v983_v13, %v983_v13 }
 0x924   :  { %v993_v11 = vmul.f32 -0.00019511016, %v985_v6  ;;  %v986_v21 = vmul.f32 -0.001358992, %v985_v6 }
 0x926   :  { %v994_v10 = vadd.f32 0.008332121, %v993_v11  ;;  %v987_v44 = vadd.f32 0.041655596, %v986_v21 }
 0x928   :  { %v995_v5 = vmul.f32 %v994_v10, %v985_v6  ;;  %v988_v34 = vmul.f32 %v987_v44, %v985_v6 }
 0x92a   :  { %v996_v59 = vadd.f32 -0.16666654, %v995_v5  ;;  %v989_v56 = vadd.f32 -0.4999988, %v988_v34 }
 0x92c   :  { %v997_v31 = vmul.f32 %v996_v59, %v985_v6  ;;  %v990_v57 = vmul.f32 %v989_v56, %v985_v6 }
 0x92e   :  { %v998_v29 = vadd.f32 1.0, %v997_v31  ;;  %v991_v32 = vadd.f32 1.0, %v990_v57 }
 0x930   :  { %v999_v33 = vmul.f32 %v998_v29, %v983_v13  ;;  %v1007_v53 = vxor.u32 2147483648, %v991_v32 }
 0x932   :  { %v1004_v35 = vxor.u32 2147483648, %v999_v33  ;;  %v1008_v61 = vsel %vm1006_vm0, %v1007_v53, %v999_v33  ;;  %v2295_v48 = vsel %vm2293_vm8, %v1007_v53, %v999_v33 }
 0x934   :  { %v1005_v55 = vsel %vm1003_vm15, %v991_v32, %v1004_v35  ;;  %v2292_v41 = vsel %vm2290_vm4, %v991_v32, %v1004_v35 }
 0x935   :  { %v1009_v27 = vsel %vm1002_vm1, %v1005_v55, %v1008_v61  ;;  %v2296_v15 = vsel %vm2289_vm3, %v2292_v41, %v2295_v48 }
 0x936   :  { %v1010_v37 = vsel %vm1000_vm2, nan, %v1009_v27  ;;  %v2297_v9 = vsel %vm1000_vm2, nan, %v2296_v15 }
 0x953   :  { %v3203_v0 = vpop.f32.mrf.mxu0  ;;  %v3223_v40 = vpop.f32.mrf.mxu1 }
 0x954   :  { %v3228_v25 = vadd.f32 %v3227_v8, %v3203_v0  ;;  %3243 = vrot.lane.b32.xlu1 %v3203_v0, %s3805_s22 }
 0x956   :  { %3733 = vtanh.f32 %v3228_v25 }
 0x95c   :  { %v3734_v60 = vpop.eup %3733  ;;  %1346 = vperm.xlu1 %3704, %v1010_v37  }
 0x95d   :  { %v3230_v17 = vsub.f32 1.0, %v3734_v60 }
 0x95f   :  { %v3231_v30 = vmul.f32 %v3734_v60, %v3230_v17 }
 0x961   :  { %3237 = vrot.lane.b32.xlu0 %v3231_v30, %s3806_s25  ;;  %3233 = vrot.lane.b32.xlu2 %v3231_v30, %s3807_s30 }
 0x969   :  { %3245 = vrot.lane.b32.xlu2 %v3223_v40, %s3805_s22 }
 0x971   :  { %2635 = vperm.xlu2 %3706, %v2297_v9  }
 0x979   :  { %3709 = vset.pattern.permute.xlu2 %v3798_v3 }
 0x9bb   :  { %v3234_v58 = vpop.permute.xlu2 %3233 }
 0x9bc   :  { %v3236_v6 = vmul.f32 %v3234_v58, %v3231_v30 }
 0x9c3   :  { %v3246_v10 = vpop.permute.xlu2 %3245 }
 0x9c6   :  { %v3244_v54 = vpop.permute.xlu1 %3243 }
 0x9cb   :  { %v2636_v44 = vpop.permute.xlu2 %2635 }
 0x9cc   :  { %v2654_v5 = vmul.f32 %v4434_v49, %v2636_v44 }
 0x9ce   :  { %v1347_v63 = vpop.permute.xlu1 %1346  ;;  %2707 = vrot.lane.b32.xlu2 %v2654_v5, %s3806_s25 }
 0x9cf   :  { %v1365_v13 = vmul.f32 %v4441_v4, %v1347_v63  ;;  %v3247_v4 = vsel %vm2721_vm5, %v3244_v54, %v3246_v10 }
 0x9d1   :  { %2675 = vrot.lane.b32.xlu1 %v1365_v13, %s3805_s22 }
 0x9d3   :  { %v3238_v11 = vpop.permute.xlu0 %3237 }
 0x9d4   :  { %v3240_v21 = vmul.f32 %v3238_v11, %v3236_v6 }
 0x9d6   :  { %3671 = vmatmul.msk.f32.vlgmr.msrb.gmra.mxu2 %vm2721_vm5, %v3240_v21 }
 0x9d7   :  { %3524 = vmatpush.msrb.mxu2 %v4410_v50 }
 0x9d9   :  { %3525 = vmatpush.msrb.mxu2 %v4416_v51 }
 0x9db   :  { %3526 = vmatpush.msrb.mxu2 %v4422_v62 }
 0x9dd   :  { %3527 = vmatpush.msrb.mxu2 %v4428_v36 }
 0xa43   :  { %v2676_v29 = vpop.permute.xlu1 %2675 }
 0xa59   :  { %v3269_v34 = vpop.f32.mrf.mxu2 }
 0xa5a   :  { %v3270_v59 = vadd.f32 %v3269_v34, %v3247_v4 }
 0xa5c   :  { %v3272_v38 = vadd.f32 %v4604_v47, %v3270_v59 }
 0xa5e   :  { %3735 = vtanh.f32 %v3272_v38 }
 0xa64   :  { %v3736_v50 = vpop.eup %3735 }
 0xa65   :  { %3275 = vrot.lane.b32.xlu0 %v3736_v50, %s3807_s30 }
 0xa6d   :  { %65 = vperm.xlu0 %3707, %v4631_v23   ;;  %v2708_v23 = vpop.permute.xlu2 %2707 }
 0xa75   :  { %3708 = vset.pattern.permute.xlu0 %v3797_v1 }
 0xad7   :  { %v3276_v51 = vpop.permute.xlu0 %3275 }
 0xad8   :  { %v3279_v62 = vsub.f32 %v4612_v26, %v3276_v51  ;;  %v3278_v36 = vadd.f32 %v3276_v51, %v4612_v26 }
 0xada   :  { %v3280_v49 = vmul.f32 %v3736_v50, %v3279_v62 }
 0xadc   :  { %v3281_v56 = vadd.f32 %v3280_v49, %v3278_v36 }
 0xade   :  { %v4737_v31 = vmul.f32 0.5, %v3281_v56 }
 0xadf   :  { %v66_v19 = vpop.permute.xlu0 %65 }
 0xae0   :  { %3284 = vst.msk [vmem:[#allocation3 + $0x20] sm:$0xff] %vm2721_vm5, %v4737_v31  ;;  %v84_v57 = vmul.f32 %v4459_v2, %v66_v19  ;;  %3672 = vmatmul.msk.f32.vlgmr.msrb.gmra.mxu3 %vm2721_vm5, %v4737_v31  ;;  %3673 = vmatmul.msk.f32.vlgmr.msra.gmra.mxu0 %vm2721_vm5, %v4737_v31  ;;  %v4757_v2 = vld [vmem:[%s4998_s0 + $0x30] sm:$0xff] }
 0xae1   :  { %3570 = vmatpush.msrb.mxu3 %v4469_v39  ;;  %v1014_v39 = vand.u32 2139095040, %v4757_v2  ;;  %vm1013_vm8 = vcmp.lt.s32.totalorder %v4757_v2, 0 }
 0xae2   :  { %v2727_v26 = vsel %vm2721_vm5, %v84_v57, %v2676_v29 }
 0xae3   :  { %v2736_v52 = vsel %vm2730_vm6, %v2727_v26, %v2708_v23  ;;  %3571 = vmatpush.msrb.mxu3 %v4478_v42  ;;  %v1015_v33 = vshrl.u32 %v1014_v39, 23 }
 0xae4   :  { %v2748_v32 = vadd.f32 %v4485_v43, %v2736_v52 }
 0xae5   :  { %3572 = vmatpush.msrb.mxu3 %v4496_v45  ;;  %v3627_v7 = vadd.s32 4294967169, %v1015_v33  ;;  %v1011_v45 = vand.u32 2147483647, %v4757_v2 }
 0xae6   :  { %2757 = vst.msk [vmem:[#allocation2 + $0x28] sm:$0xff] %vm2751_vm7, %v2748_v32 }
 0xae7   :  { %3573 = vmatpush.msrb.mxu3 %v4505_v12  ;;  %v1021_v35 = vadd.s32 1, %v3627_v7  ;;  %v1018_v8 = vand.u32 8388607, %v1011_v45 }
 0xae9   :  { %vm1022_vm9 = vcmp.gt.s32.totalorder %v1021_v35, 0  ;;  %v1019_v30 = vor.u32 8388608, %v1018_v8 }
 0xaea   :  { %v1023_v42 = vsel %vm1022_vm9, %v1021_v35, 0  ;;  %vm4819_vm9 = vcmp.le.f32.partialorder %v1011_v45, 0.7853982 }
 0xaeb   :  { %v1025_v53 = vand.u32 31, %v1023_v42  ;;  %v4768_v55 = vshrl.u32 %v1023_v42, 5  ;;  %v1059_v9 = vshll.u32 %v1019_v30, 8 }
 0xaed   :  { %v4760_v43 = vsub.s32 32, %v1025_v53  ;;  %v1037_v0 = vshll.u32 %v3802_v20, %v1025_v53  ;;  %v1028_v61 = vshll.u32 %v3799_v14, %v1025_v53  ;;  %v1031_v27 = vshll.u32 %v3800_v16, %v1025_v53 }
 0xaee   :  { %v1034_v60 = vshll.u32 %v3801_v18, %v1025_v53  ;;  %v1040_v46 = vshll.u32 %v3803_v22, %v1025_v53  ;;  %vm1043_vm10 = vcmp.lt.s32.totalorder %v4768_v55, 1  ;;  %vm1044_vm11 = vcmp.lt.s32.totalorder %v4768_v55, 2 }
 0xaef   :  { %v1038_v12 = vshrl.u32 %v3803_v22, %v4760_v43  ;;  %v1029_v25 = vshrl.u32 %v3800_v16, %v4760_v43  ;;  %v1032_v37 = vshrl.u32 %v3801_v18, %v4760_v43  ;;  %v1035_v17 = vshrl.u32 %v3802_v20, %v4760_v43 }
 0xaf0   :  { %v1041_v15 = vshrl.u32 %v3804_v28, %v4760_v43  ;;  %vm1045_vm12 = vcmp.lt.s32.totalorder %v4768_v55, 3  ;;  %vm1046_vm13 = vcmp.lt.s32.totalorder %v4768_v55, 4  ;;  %v1060_v11 = vand.u32 65535, %v1059_v9 }
 0xaf1   :  { %v1030_v40 = vor.u32 %v1029_v25, %v1028_v61  ;;  %v1039_v24 = vor.u32 %v1038_v12, %v1037_v0  ;;  %v1033_v41 = vor.u32 %v1032_v37, %v1031_v27  ;;  %v1036_v48 = vor.u32 %v1035_v17, %v1034_v60 }
 0xaf2   :  { %v1042_v54 = vor.u32 %v1041_v15, %v1040_v46  ;;  %v1061_v5 = vshrl.u32 %v1059_v9, 16  ;;  %v1027_v61 = vshrl.u32 %v3799_v14, %v4760_v43 }
 0xaf3   :  { %v1051_v63 = vsel %vm1043_vm10, %v1030_v40, %v1033_v41  ;;  %v1052_v58 = vsel %vm1046_vm13, %v1039_v24, 920167782  ;;  %v1055_v6 = vsel %vm1043_vm10, %v1033_v41, %v1036_v48  ;;  %v1048_v60 = vsel %vm1046_vm13, %v1036_v48, 2102212464 }
 0xaf4   :  { %v1053_v13 = vsel %vm1045_vm12, %v1036_v48, %v1052_v58  ;;  %v1056_v10 = vsel %vm1046_vm13, %v1042_v54, 1326507024  ;;  %v1049_v46 = vsel %vm1045_vm12, %v1033_v41, %v1048_v60  ;;  %vm1154_vm13 = vweird.f32 %v4757_v2 }
 0xaf5   :  { %v1054_v21 = vsel %vm1044_vm11, %v1051_v63, %v1053_v13  ;;  %v1057_v44 = vsel %vm1045_vm12, %v1039_v24, %v1056_v10  ;;  %v1047_v24 = vsel %vm1043_vm10, %v1027_v61, %v1030_v40 }
 0xaf6   :  { %v1084_v4 = vand.u32 65535, %v1054_v21  ;;  %v1085_v34 = vshrl.u32 %v1054_v21, 16  ;;  %v1058_v59 = vsel %vm1044_vm11, %v1055_v6, %v1057_v44  ;;  %v1050_v54 = vsel %vm1044_vm11, %v1047_v24, %v1049_v46 }
 0xaf7   :  { %v1062_v38 = vand.u32 65535, %v1058_v59  ;;  %v1063_v50 = vshrl.u32 %v1058_v59, 16  ;;  %v1104_v6 = vmul.u32 %v1059_v9, %v1050_v54 }
 0xaf8   :  { %v1087_v51 = vmul.u32 %v1085_v34, %v1060_v11  ;;  %v1086_v62 = vmul.u32 %v1084_v4, %v1060_v11  ;;  %v1088_v36 = vmul.u32 %v1084_v4, %v1061_v5  ;;  %v1089_v57 = vmul.u32 %v1085_v34, %v1061_v5 }
 0xaf9   :  { %v1064_v49 = vmul.u32 %v1062_v38, %v1060_v11  ;;  %v1065_v56 = vmul.u32 %v1063_v50, %v1060_v11  ;;  %v1066_v19 = vmul.u32 %v1062_v38, %v1061_v5  ;;  %v1067_v26 = vmul.u32 %v1063_v50, %v1061_v5 }
 0xafa   :  { %v1090_v23 = vshll.u32 %v1087_v51, 16  ;;  %v1092_v29 = vshll.u32 %v1088_v36, 16  ;;  %v1091_v42 = vshrl.u32 %v1087_v51, 16  ;;  %v1093_v27 = vshrl.u32 %v1088_v36, 16 }
 0xafb   :  { %v1068_v52 = vshll.u32 %v1065_v56, 16  ;;  %v1070_v32 = vshll.u32 %v1066_v19, 16  ;;  %v1069_v0 = vshrl.u32 %v1065_v56, 16  ;;  %v1071_v17 = vshrl.u32 %v1066_v19, 16 }
 0xafc   :  { %vm1094_vm14 = vc.u32 %v1086_v62, %v1090_v23  ;;  %v1096_v39 = vadd.s32 %v1090_v23, %v1086_v62 }
 0xafd   :  { %vm1072_vm15 = vc.u32 %v1064_v49, %v1068_v52  ;;  %v1074_v33 = vadd.s32 %v1068_v52, %v1064_v49  ;;  %v1095_v7 = vsel %vm1094_vm14, 1, %v3798_v3 }
 0xafe   :  { %v1073_v35 = vsel %vm1072_vm15, 1, %v3798_v3  ;;  %v1097_v53 = vadd.s32 %v1095_v7, %v1089_v57  ;;  %vm1098_vm0 = vc.u32 %v1096_v39, %v1092_v29  ;;  %v1100_v63 = vadd.s32 %v1096_v39, %v1092_v29 }
 0xaff   :  { %v1075_v12 = vadd.s32 %v1073_v35, %v1067_v26  ;;  %vm1076_vm1 = vc.u32 %v1074_v33, %v1070_v32  ;;  %v1099_v8 = vsel %vm1098_vm0, 1, %v3798_v3 }
 0xb00   :  { %v1077_v25 = vsel %vm1076_vm1, 1, %v3798_v3  ;;  %v1101_v37 = vadd.s32 %v1099_v8, %v1097_v53  ;;  %v3329_v8 = vld [vmem:[#allocation2 + $0x28] sm:$0xff] }
 0xb01   :  { %v1079_v30 = vadd.s32 %v1077_v25, %v1075_v12 }
 0xb02   :  { %v1102_v15 = vadd.s32 %v1101_v37, %v1091_v42 }
 0xb03   :  { %v1080_v43 = vadd.s32 %v1079_v30, %v1069_v0 }
 0xb04   :  { %v1103_v58 = vadd.s32 %v1102_v15, %v1093_v27 }
 0xb05   :  { %v1081_v13 = vadd.s32 %v1080_v43, %v1071_v17 }
 0xb06   :  { %v1107_v11 = vadd.s32 1, %v1103_v58 }
 0xb07   :  { %vm1106_vm2 = vc.u32 %v1081_v13, %v1100_v63  ;;  %v1105_v55 = vadd.s32 %v1100_v63, %v1081_v13 }
 0xb08   :  { %v1108_v48 = vsel %vm1106_vm2, %v1107_v11, %v1103_v58 }
 0xb09   :  { %v1109_v21 = vadd.s32 %v1108_v48, %v1104_v6 }
 0xb0b   :  { %v1110_v10 = vadd.s32 536870912, %v1109_v21 }
 0xb0d   :  { %v1111_v44 = vshrl.u32 %v1110_v10, 30 }
 0xb0f   :  { %v1112_v5 = vshll.u32 %v1111_v44, 30  ;;  %v1135_v61 = vsub.s32 4, %v1111_v44 }
 0xb11   :  { %v1113_v40 = vsub.s32 %v1109_v21, %v1112_v5  ;;  %v1136_v37 = vsel %vm1013_vm8, %v1135_v61, %v1111_v44 }
 0xb12   :  { %v1138_v30 = vsel %vm4819_vm9, 0, %v1136_v37  ;;  %v4886_v37 = vld [vmem:[%s4998_s0 + $0x38] sm:$0xff] }
 0xb13   :  { %vm1114_vm3 = vcmp.lt.s32.totalorder %v1113_v40, 0  ;;  %v1115_v4 = vsub.s32 0, %v1113_v40  ;;  %v2442_v43 = vadd.s32 3, %v1138_v30 }
 0xb15   :  { %v1116_v41 = vsel %vm1114_vm3, %v1115_v4, %v1113_v40  ;;  %v2443_v6 = vand.u32 3, %v2442_v43  ;;  %v1155_v4 = vand.u32 3, %v1138_v30  ;;  %v1165_v43 = vand.u32 2147483647, %v4886_v37 }
 0xb16   :  { %v1117_v34 = vclz %v1116_v41 }
 0xb17   :  { %vm2445_vm10 = vcmp.eq.s32.totalorder %v2443_v6, 0  ;;  %vm2448_vm11 = vcmp.eq.s32.totalorder %v2443_v6, 2  ;;  %vm2444_vm12 = vcmp.lt.s32.totalorder %v2443_v6, 2  ;;  %vm1156_vm14 = vcmp.lt.s32.totalorder %v1155_v4, 2 }
 0xb18   :  { %v3628_v59 = vadd.s32 4294967294, %v1117_v34  ;;  %vm1157_vm15 = vcmp.eq.s32.totalorder %v1155_v4, 0  ;;  %vm1160_vm0 = vcmp.eq.s32.totalorder %v1155_v4, 2 }
 0xb1a   :  { %vm3629_vm4 = vcmp.lt.s32.totalorder %v3628_v59, 0 }
 0xb1b   :  { %v1120_v38 = vsel %vm3629_vm4, 0, %v3628_v59 }
 0xb1c   :  { %v1121_v50 = vsub.s32 32, %v1120_v38  ;;  %v1125_v51 = vsub.s32 4294967266, %v1120_v38  ;;  %v1122_v62 = vshll.u32 %v1113_v40, %v1120_v38 }
 0xb1e   :  { %v1123_v9 = vshrl.u32 %v1105_v55, %v1121_v50  ;;  %v1126_v36 = vadd.s32 127, %v1125_v51 }
 0xb20   :  { %v1124_v49 = vor.u32 %v1123_v9, %v1122_v62  ;;  %v1127_v56 = vshll.u32 %v1126_v36, 23 }
 0xb22   :  { %v1128_v19 = vor.u32 4788187, %v1127_v56  ;;  %v1131_v57 = vcvt.s32.f32 %v1124_v49  ;;  %v4842_v49 = vld [vmem:[%s5002_s4 + $0x1] ss:$0 sm:$0xff] }
 0xb24   :  { %v1129_v23 = vand.u32 2147483647, %v1128_v19 }
 0xb26   :  { %v1132_v29 = vmul.f32 %v1131_v57, %v1129_v23 }
 0xb28   :  { %v1133_v26 = vxor.u32 2147483648, %v1132_v29 }
 0xb2a   :  { %v1134_v32 = vsel %vm1013_vm8, %v1133_v26, %v1132_v29 }
 0xb2b   :  { %v1137_v39 = vsel %vm4819_vm9, %v4757_v2, %v1134_v32 }
 0xb2c   :  { %v1139_v33 = vmul.f32 %v1137_v39, %v1137_v39 }
 0xb2e   :  { %v1147_v7 = vmul.f32 -0.00019511016, %v1139_v33  ;;  %v1140_v35 = vmul.f32 -0.001358992, %v1139_v33 }
 0xb30   :  { %v1148_v42 = vadd.f32 0.008332121, %v1147_v7  ;;  %v1141_v53 = vadd.f32 0.041655596, %v1140_v35 }
 0xb32   :  { %v1149_v0 = vmul.f32 %v1148_v42, %v1139_v33  ;;  %v1142_v25 = vmul.f32 %v1141_v53, %v1139_v33 }
 0xb34   :  { %v1150_v27 = vadd.f32 -0.16666654, %v1149_v0  ;;  %v1143_v60 = vadd.f32 -0.4999988, %v1142_v25  ;;  %v4879_v25 = vld [vmem:[%s5003_s5] ss:$0 sm:$0xff] }
 0xb36   :  { %v1151_v17 = vmul.f32 %v1150_v27, %v1139_v33  ;;  %v1144_v46 = vmul.f32 %v1143_v60, %v1139_v33  ;;  %v1168_v60 = vand.u32 2139095040, %v4886_v37 }
 0xb38   :  { %v1152_v15 = vadd.f32 1.0, %v1151_v17  ;;  %v1145_v58 = vadd.f32 1.0, %v1144_v46  ;;  %v1169_v17 = vshrl.u32 %v1168_v60, 23 }
 0xb3a   :  { %v1153_v13 = vmul.f32 %v1152_v15, %v1137_v39  ;;  %v1161_v48 = vxor.u32 2147483648, %v1145_v58  ;;  %v4853_v39 = vld [vmem:[%s5002_s4 + $0x2] ss:$0 sm:$0xff]  ;;  %v3630_v30 = vadd.s32 4294967169, %v1169_v17 }
 0xb3c   :  { %v1158_v11 = vxor.u32 2147483648, %v1153_v13  ;;  %v2450_v44 = vsel %vm2448_vm11, %v1161_v48, %v1153_v13  ;;  %v1162_v34 = vsel %vm1160_vm0, %v1161_v48, %v1153_v13  ;;  %v1172_v13 = vand.u32 8388607, %v1165_v43 }
 0xb3d   :  { %vm1167_vm0 = vcmp.lt.s32.totalorder %v4886_v37, 0 }
 0xb3e   :  { %v2447_v10 = vsel %vm2445_vm10, %v1145_v58, %v1158_v11  ;;  %v1159_v41 = vsel %vm1157_vm15, %v1145_v58, %v1158_v11 }
 0xb3f   :  { %v2451_v5 = vsel %vm2444_vm12, %v2447_v10, %v2450_v44  ;;  %v1163_v59 = vsel %vm1156_vm14, %v1159_v41, %v1162_v34 }
 0xb40   :  { %v2452_v40 = vsel %vm1154_vm13, nan, %v2451_v5  ;;  %v1164_v55 = vsel %vm1154_vm13, nan, %v1163_v59 }
 0xb5d   :  { %v3325_v21 = vpop.f32.mrf.mxu0 }
 0xb63   :  { %v3305_v12 = vpop.f32.mrf.mxu3 }
 0xb64   :  { %v3330_v45 = vadd.f32 %v3329_v8, %v3305_v12  ;;  %3345 = vrot.lane.b32.xlu0 %v3305_v12, %s3805_s22 }
 0xb66   :  { %3737 = vtanh.f32 %v3330_v45 }
 0xb6c   :  { %v3738_v24 = vpop.eup %3737  ;;  %1351 = vperm.xlu0 %3708, %v1164_v55  }
 0xb6d   :  { %v3332_v54 = vsub.f32 1.0, %v3738_v24 }
 0xb6f   :  { %v3333_v63 = vmul.f32 %v3738_v24, %v3332_v54  ;;  %v1175_v24 = vadd.s32 1, %v3630_v30 }
 0xb71   :  { %3339 = vrot.lane.b32.xlu2 %v3333_v63, %s3806_s25  ;;  %3335 = vrot.lane.b32.xlu1 %v3333_v63, %s3807_s30  ;;  %vm1176_vm1 = vcmp.gt.s32.totalorder %v1175_v24, 0 }
 0xb72   :  { %v1177_v46 = vsel %vm1176_vm1, %v1175_v24, 0  ;;  %vm4948_vm1 = vcmp.le.f32.partialorder %v1165_v43, 0.7853982 }
 0xb73   :  { %v1179_v15 = vand.u32 31, %v1177_v46  ;;  %v4897_v6 = vshrl.u32 %v1177_v46, 5 }
 0xb75   :  { %v4889_v54 = vsub.s32 32, %v1179_v15  ;;  %v1182_v11 = vshll.u32 %v3799_v14, %v1179_v15  ;;  %v1188_v44 = vshll.u32 %v3801_v18, %v1179_v15  ;;  %v1194_v34 = vshll.u32 %v3803_v22, %v1179_v15 }
 0xb76   :  { %vm1197_vm2 = vcmp.lt.s32.totalorder %v4897_v6, 1  ;;  %vm1198_vm3 = vcmp.lt.s32.totalorder %v4897_v6, 2  ;;  %vm1199_vm4 = vcmp.lt.s32.totalorder %v4897_v6, 3  ;;  %vm1200_vm8 = vcmp.lt.s32.totalorder %v4897_v6, 4 }
 0xb77   :  { %v1192_v58 = vshrl.u32 %v3803_v22, %v4889_v54  ;;  %v1183_v48 = vshrl.u32 %v3800_v16, %v4889_v54  ;;  %v1186_v10 = vshrl.u32 %v3801_v18, %v4889_v54  ;;  %v1189_v5 = vshrl.u32 %v3802_v20, %v4889_v54 }
 0xb79   :  { %3347 = vrot.lane.b32.xlu1 %v3325_v21, %s3805_s22  ;;  %v1185_v21 = vshll.u32 %v3800_v16, %v1179_v15  ;;  %v1184_v4 = vor.u32 %v1183_v48, %v1182_v11  ;;  %v1190_v55 = vor.u32 %v1189_v5, %v1188_v44 }
 0xb7b   :  { %v1187_v59 = vor.u32 %v1186_v10, %v1185_v21  ;;  %v1202_v48 = vsel %vm1200_vm8, %v1190_v55, 2102212464 }
 0xb7d   :  { %v1203_v5 = vsel %vm1199_vm4, %v1187_v59, %v1202_v48 }
 0xb81   :  { %2640 = vperm.xlu1 %3704, %v2452_v40   ;;  %v1173_v40 = vor.u32 8388608, %v1172_v13 }
 0xb83   :  { %v1213_v16 = vshll.u32 %v1173_v40, 8 }
 0xb89   :  { %3711 = vset.pattern.permute.xlu1 %v3798_v3 }
 0xbcb   :  { %v3340_v51 = vpop.permute.xlu2 %3339 }
 0xbd6   :  { %v3346_v9 = vpop.permute.xlu0 %3345 }
 0xbde   :  { %v1352_v36 = vpop.permute.xlu0 %1351 }
 0xbdf   :  { %v1366_v56 = vmul.f32 %v4842_v49, %v1352_v36 }
 0xbe1   :  { %2677 = vrot.lane.b32.xlu1 %v1366_v56, %s3805_s22  ;;  %v1215_v56 = vshrl.u32 %v1213_v16, 16 }
 0xbe3   :  { %v3336_v38 = vpop.permute.xlu1 %3335 }
 0xbe4   :  { %v3338_v50 = vmul.f32 %v3336_v38, %v3333_v63  ;;  %v1191_v63 = vshll.u32 %v3802_v20, %v1179_v15  ;;  %v1195_v38 = vshrl.u32 %v3804_v28, %v4889_v54  ;;  %v1205_v20 = vsel %vm1197_vm2, %v1184_v4, %v1187_v59 }
 0xbe5   :  { %v1209_v28 = vsel %vm1197_vm2, %v1187_v59, %v1190_v55 }
 0xbe6   :  { %v3342_v62 = vmul.f32 %v3340_v51, %v3338_v50  ;;  %v1193_v41 = vor.u32 %v1192_v58, %v1191_v63  ;;  %v1196_v18 = vor.u32 %v1195_v38, %v1194_v34  ;;  %v1214_v51 = vand.u32 65535, %v1213_v16 }
 0xbe7   :  { %v1181_v63 = vshrl.u32 %v3799_v14, %v4889_v54 }
 0xbe8   :  { %3674 = vmatmul.msk.f32.vlgmr.msra.gmra.mxu1 %vm2721_vm5, %v3342_v62  ;;  %v1206_v22 = vsel %vm1200_vm8, %v1193_v41, 920167782 }
 0xbe9   :  { %v1207_v50 = vsel %vm1199_vm4, %v1190_v55, %v1206_v22  ;;  %v1201_v44 = vsel %vm1197_vm2, %v1181_v63, %v1184_v4 }
 0xbea   :  { %v1208_v62 = vsel %vm1198_vm3, %v1205_v20, %v1207_v50 }
 0xbeb   :  { %v3348_v19 = vpop.permute.xlu1 %3347 }
 0xbec   :  { %v3349_v57 = vsel %vm2721_vm5, %v3346_v9, %v3348_v19  ;;  %v1210_v9 = vsel %vm1200_vm8, %v1196_v18, 1326507024  ;;  %v1238_v19 = vand.u32 65535, %v1208_v62  ;;  %vm1308_vm8 = vweird.f32 %v4886_v37 }
 0xbed   :  { %v1211_v36 = vsel %vm1199_vm4, %v1193_v41, %v1210_v9  ;;  %v1204_v41 = vsel %vm1198_vm3, %v1201_v44, %v1203_v5 }
 0xbee   :  { %v1258_v38 = vmul.u32 %v1213_v16, %v1204_v41 }
 0xbf3   :  { %v2641_v32 = vpop.permute.xlu1 %2640 }
 0xbf4   :  { %v2655_v33 = vmul.f32 %v4853_v39, %v2641_v32  ;;  %v1240_v32 = vmul.u32 %v1238_v19, %v1214_v51 }
 0xc53   :  { %v2678_v12 = vpop.permute.xlu1 %2677 }
 0xc65   :  { %v3371_v23 = vpop.f32.mrf.mxu1 }
 0xc66   :  { %v3372_v29 = vadd.f32 %v3371_v23, %v3349_v57  ;;  %v1239_v57 = vshrl.u32 %v1208_v62, 16  ;;  %v1212_v23 = vsel %vm1198_vm3, %v1209_v28, %v1211_v36 }
 0xc68   :  { %v3374_v26 = vadd.f32 %v4604_v47, %v3372_v29  ;;  %v1216_v29 = vand.u32 65535, %v1212_v23 }
 0xc6a   :  { %3739 = vtanh.f32 %v3374_v26  ;;  %v1217_v26 = vshrl.u32 %v1212_v23, 16 }
 0xc70   :  { %v3740_v52 = vpop.eup %3739 }
 0xc71   :  { %3377 = vrot.lane.b32.xlu2 %v3740_v52, %s3807_s30 }
 0xc79   :  { %70 = vperm.xlu2 %3709, %v4757_v2  }
 0xc81   :  { %2709 = vrot.lane.b32.xlu2 %v2655_v33, %s3806_s25  ;;  %v1242_v33 = vmul.u32 %v1238_v19, %v1215_v56 }
 0xc82   :  { %3710 = vset.pattern.permute.xlu2 %v3797_v1  ;;  %v4871_v1 = vld [vmem:[%s5002_s4] ss:$0 sm:$0xff] }
 0xc83   :  { %v1247_v13 = vshrl.u32 %v1242_v33, 16 }
 0xccb   :  { %v3378_v7 = vpop.permute.xlu2 %3377 }
 0xccc   :  { %v3381_v47 = vsub.f32 %v4737_v31, %v3378_v7  ;;  %v3380_v35 = vadd.f32 %v3378_v7, %v4737_v31  ;;  %v1218_v7 = vmul.u32 %v1216_v29, %v1214_v51 }
 0xcce   :  { %v3382_v42 = vmul.f32 %v3740_v52, %v3381_v47  ;;  %v1241_v52 = vmul.u32 %v1239_v57, %v1214_v51  ;;  %v1219_v47 = vmul.u32 %v1217_v26, %v1214_v51 }
 0xcd0   :  { %v3383_v53 = vadd.f32 %v3382_v42, %v3380_v35  ;;  %v1220_v35 = vmul.u32 %v1216_v29, %v1215_v56  ;;  %v1243_v42 = vmul.u32 %v1239_v57, %v1215_v56  ;;  %v1245_v17 = vshrl.u32 %v1241_v52, 16 }
 0xcd1   :  { %v1223_v24 = vshrl.u32 %v1219_v47, 16 }
 0xcd2   :  { %v4860_v2 = vmul.f32 0.5, %v3383_v53  ;;  %v1244_v53 = vshll.u32 %v1241_v52, 16  ;;  %v1225_v21 = vshrl.u32 %v1220_v35, 16 }
 0xcd3   :  { %v71_v0 = vpop.permute.xlu2 %70 }
 0xcd4   :  { %3386 = vst.msk [vmem:[#allocation3 + $0x28] sm:$0xff] %vm2721_vm5, %v4860_v2  ;;  %3675 = vmatmul.msk.f32.vlgmr.msra.gmra.mxu2 %vm2721_vm5, %v4860_v2  ;;  %3676 = vmatmul.msk.f32.vlgmr.msra.gmra.mxu3 %vm2721_vm5, %v4860_v2  ;;  %v85_v31 = vmul.f32 %v4871_v1, %v71_v0  ;;  %v1246_v0 = vshll.u32 %v1242_v33, 16  ;;  %vm1248_vm9 = vc.u32 %v1240_v32, %v1244_v53 }
 0xcd6   :  { %v2728_v8 = vsel %vm2721_vm5, %v85_v31, %v2678_v12  ;;  %v1221_v31 = vmul.u32 %v1217_v26, %v1215_v56  ;;  %v1222_v12 = vshll.u32 %v1219_v47, 16 }
 0xcd8   :  { %vm1226_vm10 = vc.u32 %v1218_v7, %v1222_v12 }
 0xcd9   :  { %v1227_v60 = vsel %vm1226_vm10, 1, %v3798_v3 }
 0xcda   :  { %v1229_v46 = vadd.s32 %v1227_v60, %v1221_v31 }
 0xcdb   :  { %v2710_v61 = vpop.permute.xlu2 %2709 }
 0xcdc   :  { %v2737_v45 = vsel %vm2730_vm6, %v2728_v8, %v2710_v61  ;;  %v1224_v8 = vshll.u32 %v1220_v35, 16  ;;  %v1250_v61 = vadd.s32 %v1244_v53, %v1240_v32 }
 0xcdd   :  { %v2749_v27 = vadd.f32 %v4879_v25, %v2737_v45  ;;  %v1228_v45 = vadd.s32 %v1222_v12, %v1218_v7 }
 0xcde   :  { %vm1252_vm11 = vc.u32 %v1250_v61, %v1246_v0  ;;  %v1254_v54 = vadd.s32 %v1250_v61, %v1246_v0 }
 0xcdf   :  { %2758 = vst.msk [vmem:[#allocation2 + $0x30] sm:$0xff] %vm2751_vm7, %v2749_v27  ;;  %v1249_v27 = vsel %vm1248_vm9, 1, %v3798_v3  ;;  %vm1230_vm12 = vc.u32 %v1228_v45, %v1224_v8  ;;  %v1253_v15 = vsel %vm1252_vm11, 1, %v3798_v3 }
 0xce0   :  { %v1251_v30 = vadd.s32 %v1249_v27, %v1243_v42  ;;  %v1231_v58 = vsel %vm1230_vm12, 1, %v3798_v3 }
 0xce1   :  { %v1233_v10 = vadd.s32 %v1231_v58, %v1229_v46 }
 0xce2   :  { %v1255_v11 = vadd.s32 %v1253_v15, %v1251_v30 }
 0xce3   :  { %v1234_v14 = vadd.s32 %v1233_v10, %v1223_v24 }
 0xce4   :  { %v1256_v40 = vadd.s32 %v1255_v11, %v1245_v17 }
 0xce5   :  { %v1235_v34 = vadd.s32 %v1234_v14, %v1225_v21 }
 0xce6   :  { %v1257_v3 = vadd.s32 %v1256_v40, %v1247_v13  ;;  %v3431_v60 = vld [vmem:[#allocation2 + $0x30] sm:$0xff] }
 0xce7   :  { %vm1260_vm13 = vc.u32 %v1235_v34, %v1254_v54  ;;  %v1259_v6 = vadd.s32 %v1254_v54, %v1235_v34 }
 0xce8   :  { %v1261_v18 = vadd.s32 1, %v1257_v3 }
 0xcea   :  { %v1262_v55 = vsel %vm1260_vm13, %v1261_v18, %v1257_v3 }
 0xceb   :  { %v1263_v20 = vadd.s32 %v1262_v55, %v1258_v38 }
 0xced   :  { %v1264_v22 = vadd.s32 536870912, %v1263_v20 }
 0xcef   :  { %v1265_v50 = vshrl.u32 %v1264_v22, 30 }
 0xcf1   :  { %v1266_v28 = vshll.u32 %v1265_v50, 30  ;;  %v1289_v17 = vsub.s32 4, %v1265_v50 }
 0xcf3   :  { %v1267_v4 = vsub.s32 %v1263_v20, %v1266_v28  ;;  %v1290_v46 = vsel %vm1167_vm0, %v1289_v17, %v1265_v50 }
 0xcf4   :  { %v1292_v58 = vsel %vm4948_vm1, 0, %v1290_v46 }
 0xcf5   :  { %vm1268_vm14 = vcmp.lt.s32.totalorder %v1267_v4, 0  ;;  %v1269_v51 = vsub.s32 0, %v1267_v4  ;;  %v2597_v10 = vadd.s32 3, %v1292_v58  ;;  %v1309_v20 = vand.u32 3, %v1292_v58 }
 0xcf7   :  { %v1270_v59 = vsel %vm1268_vm14, %v1269_v51, %v1267_v4  ;;  %v2598_v41 = vand.u32 3, %v2597_v10  ;;  %vm1310_vm9 = vcmp.lt.s32.totalorder %v1309_v20, 2  ;;  %vm1311_vm10 = vcmp.eq.s32.totalorder %v1309_v20, 0 }
 0xcf8   :  { %v1271_v62 = vclz %v1270_v59  ;;  %vm1314_vm11 = vcmp.eq.s32.totalorder %v1309_v20, 2 }
 0xcf9   :  { %vm2600_vm2 = vcmp.eq.s32.totalorder %v2598_v41, 0  ;;  %vm2603_vm3 = vcmp.eq.s32.totalorder %v2598_v41, 2  ;;  %vm2599_vm4 = vcmp.lt.s32.totalorder %v2598_v41, 2 }
 0xcfa   :  { %v3631_v9 = vadd.s32 4294967294, %v1271_v62 }
 0xcfc   :  { %vm3632_vm15 = vcmp.lt.s32.totalorder %v3631_v9, 0 }
 0xcfd   :  { %v1274_v36 = vsel %vm3632_vm15, 0, %v3631_v9 }
 0xcfe   :  { %v1275_v56 = vsub.s32 32, %v1274_v36  ;;  %v1279_v19 = vsub.s32 4294967266, %v1274_v36  ;;  %v1276_v57 = vshll.u32 %v1267_v4, %v1274_v36 }
 0xd00   :  { %v1277_v16 = vshrl.u32 %v1259_v6, %v1275_v56  ;;  %v1280_v23 = vadd.s32 127, %v1279_v19 }
 0xd02   :  { %v1278_v29 = vor.u32 %v1277_v16, %v1276_v57  ;;  %v1281_v26 = vshll.u32 %v1280_v23, 23 }
 0xd04   :  { %v1282_v52 = vor.u32 4788187, %v1281_v26  ;;  %v1285_v32 = vcvt.s32.f32 %v1278_v29 }
 0xd06   :  { %v1283_v33 = vand.u32 2147483647, %v1282_v52  ;;  %v3770_v52 = vld [vmem:[%s5004_s6] ss:$0 sm:$0xff]  ;;  %s3808_s6 = smov [#allocation3]  }
 0xd08   :  { %v1286_v7 = vmul.f32 %v1285_v32, %v1283_v33 }
 0xd0a   :  { %v1287_v47 = vxor.u32 2147483648, %v1286_v7 }
 0xd0c   :  { %v1288_v42 = vsel %vm1167_vm0, %v1287_v47, %v1286_v7 }
 0xd0d   :  { %v1291_v53 = vsel %vm4948_vm1, %v4886_v37, %v1288_v42 }
 0xd0e   :  { %v1293_v0 = vmul.f32 %v1291_v53, %v1291_v53 }
 0xd10   :  { %v1301_v31 = vmul.f32 -0.00019511016, %v1293_v0  ;;  %v1294_v12 = vmul.f32 -0.001358992, %v1293_v0 }
 0xd12   :  { %v1302_v8 = vadd.f32 0.008332121, %v1301_v31  ;;  %v1295_v61 = vadd.f32 0.041655596, %v1294_v12 }
 0xd14   :  { %v1303_v45 = vmul.f32 %v1302_v8, %v1293_v0  ;;  %v1296_v30 = vmul.f32 %v1295_v61, %v1293_v0 }
 0xd16   :  { %v1304_v24 = vadd.f32 -0.16666654, %v1303_v45  ;;  %v1297_v15 = vadd.f32 -0.4999988, %v1296_v30 }
 0xd18   :  { %v1305_v63 = vmul.f32 %v1304_v24, %v1293_v0  ;;  %v1298_v11 = vmul.f32 %v1297_v15, %v1293_v0 }
 0xd1a   :  { %v1306_v48 = vadd.f32 1.0, %v1305_v63  ;;  %v1299_v5 = vadd.f32 1.0, %v1298_v11 }
 0xd1c   :  { %v1307_v40 = vmul.f32 %v1306_v48, %v1291_v53  ;;  %v1315_v54 = vxor.u32 2147483648, %v1299_v5 }
 0xd1e   :  { %v1312_v14 = vxor.u32 2147483648, %v1307_v40  ;;  %v2605_v38 = vsel %vm2603_vm3, %v1315_v54, %v1307_v40  ;;  %v1316_v50 = vsel %vm1314_vm11, %v1315_v54, %v1307_v40 }
 0xd20   :  { %v2602_v34 = vsel %vm2600_vm2, %v1299_v5, %v1312_v14  ;;  %v1313_v22 = vsel %vm1311_vm10, %v1299_v5, %v1312_v14 }
 0xd21   :  { %v2606_v18 = vsel %vm2599_vm4, %v2602_v34, %v2605_v38  ;;  %v1317_v28 = vsel %vm1310_vm9, %v1313_v22, %v1316_v50 }
 0xd22   :  { %v2607_v55 = vsel %vm1308_vm8, nan, %v2606_v18  ;;  %v1318_v4 = vsel %vm1308_vm8, nan, %v1317_v28 }
 0xd57   :  { %v3407_v27 = vpop.f32.mrf.mxu2  ;;  %v3427_v3 = vpop.f32.mrf.mxu3 }
 0xd58   :  { %v3432_v43 = vadd.f32 %v3431_v60, %v3407_v27  ;;  %3447 = vrot.lane.b32.xlu2 %v3407_v27, %s3805_s22 }
 0xd5a   :  { %3741 = vtanh.f32 %v3432_v43 }
 0xd60   :  { %v3742_v13 = vpop.eup %3741  ;;  %1356 = vperm.xlu2 %3710, %v1318_v4  }
 0xd61   :  { %v3434_v21 = vsub.f32 1.0, %v3742_v13 }
 0xd63   :  { %v3435_v44 = vmul.f32 %v3742_v13, %v3434_v21 }
 0xd65   :  { %3441 = vrot.lane.b32.xlu1 %v3435_v44, %s3806_s25  ;;  %3437 = vrot.lane.b32.xlu0 %v3435_v44, %s3807_s30 }
 0xd6d   :  { %3449 = vrot.lane.b32.xlu0 %v3427_v3, %s3805_s22 }
 0xd75   :  { %2645 = vperm.xlu0 %3708, %v2607_v55  }
 0xdb2   :  { %v3448_v19 = vpop.permute.xlu2 %3447 }
 0xdba   :  { %v1357_v57 = vpop.permute.xlu2 %1356 }
 0xdbb   :  { %v1367_v16 = vmul.f32 %v4842_v49, %v1357_v57 }
 0xdbd   :  { %2679 = vrot.lane.b32.xlu2 %v1367_v16, %s3805_s22 }
 0xdd7   :  { %v3438_v51 = vpop.permute.xlu0 %3437  ;;  %v3442_v62 = vpop.permute.xlu1 %3441 }
 0xdd8   :  { %v3440_v59 = vmul.f32 %v3438_v51, %v3435_v44 }
 0xdda   :  { %v3444_v9 = vmul.f32 %v3442_v62, %v3440_v59 }
 0xddc   :  { %3677 = vmatmul.msk.f32.vlgmr.msrb.gmra.mxu0 %vm2721_vm5, %v3444_v9 }
 0xddf   :  { %v3450_v6 = vpop.permute.xlu0 %3449 }
 0xde0   :  { %v3451_v23 = vsel %vm2721_vm5, %v3448_v19, %v3450_v6 }
 0xde7   :  { %v2646_v36 = vpop.permute.xlu0 %2645 }
 0xde8   :  { %v2656_v56 = vmul.f32 %v4853_v39, %v2646_v36 }
 0xdea   :  { %2711 = vrot.lane.b32.xlu0 %v2656_v56, %s3806_s25 }
 0xe17   :  { %v2680_v0 = vpop.permute.xlu2 %2679 }
 0xe59   :  { %v3473_v29 = vpop.f32.mrf.mxu0 }
 0xe5a   :  { %v3474_v26 = vadd.f32 %v3473_v29, %v3451_v23 }
 0xe5c   :  { %v3476_v32 = vadd.f32 %v3770_v52, %v3474_v26  ;;  %v2712_v12 = vpop.permute.xlu0 %2711 }
 0xe5e   :  { %3743 = vtanh.f32 %v3476_v32 }
 0xe64   :  { %v3744_v33 = vpop.eup %3743 }
 0xe65   :  { %3479 = vrot.lane.b32.xlu1 %v3744_v33, %s3807_s30 }
 0xe6d   :  { %75 = vperm.xlu1 %3711, %v4886_v37  }
 0xed7   :  { %v3480_v39 = vpop.permute.xlu1 %3479 }
 0xed8   :  { %v3483_v49 = vsub.f32 %v4860_v2, %v3480_v39  ;;  %v3482_v7 = vadd.f32 %v3480_v39, %v4860_v2 }
 0xeda   :  { %v3484_v47 = vmul.f32 %v3744_v33, %v3483_v49 }
 0xedc   :  { %v3485_v35 = vadd.f32 %v3484_v47, %v3482_v7 }
 0xede   :  { %v3486_v42 = vmul.f32 0.5, %v3485_v35 }
 0xedf   :  { %v76_v53 = vpop.permute.xlu1 %75 }
 0xee0   :  { %3488 = vst.msk [vmem:[#allocation3 + $0x30] sm:$0xff] %vm2721_vm5, %v3486_v42  ;;  %v86_v31 = vmul.f32 %v4871_v1, %v76_v53  ;;  %3678 = vmatmul.msk.f32.vlgmr.msrb.gmra.mxu1 %vm2721_vm5, %v3486_v42  ;;  %3679 = vmatmul.msk.f32.vlgmr.msrb.gmra.mxu2 %vm2721_vm5, %v3486_v42 }
 0xee2   :  { %v2729_v37 = vsel %vm2721_vm5, %v86_v31, %v2680_v0 }
 0xee3   :  { %v2738_v8 = vsel %vm2730_vm6, %v2729_v37, %v2712_v12 }
 0xee4   :  { %v2750_v2 = vadd.f32 %v4879_v25, %v2738_v8 }
 0xee6   :  { %2759 = vst.msk [vmem:[#allocation2 + $0x38] sm:$0xff] %vm2751_vm7, %v2750_v2 }
 0xeed   :  { %v3533_v45 = vld [vmem:[#allocation2 + $0x38] sm:$0xff] }
 0xf5d   :  { %v3509_v61 = vpop.f32.mrf.mxu1 }
 0xf5e   :  { %v3534_v27 = vadd.f32 %v3533_v45, %v3509_v61  ;;  %3549 = vrot.lane.b32.xlu0 %v3509_v61, %s3805_s22 }
 0xf60   :  { %3745 = vtanh.f32 %v3534_v27 }
 0xf63   :  { %v3529_v43 = vpop.f32.mrf.mxu2 }
 0xf66   :  { %v3746_v1 = vpop.eup %3745 }
 0xf67   :  { %v3536_v60 = vsub.f32 1.0, %v3746_v1 }
 0xf69   :  { %v3537_v17 = vmul.f32 %v3746_v1, %v3536_v60 }
 0xf6b   :  { %3543 = vrot.lane.b32.xlu2 %v3537_v17, %s3806_s25  ;;  %3539 = vrot.lane.b32.xlu1 %v3537_v17, %s3807_s30 }
 0xf73   :  { %3551 = vrot.lane.b32.xlu1 %v3529_v43, %s3805_s22  ;;  %s3595_s22 = sshll.u32 %s3808_s6, 4  ;;  %s3596_s22 = int_to_ptr.vmem [resolvable:$true] %s3595_s22 }
 0xfc5   :  { %v3544_v24 = vpop.permute.xlu2 %3543 }
 0xfd0   :  { %v3550_v63 = vpop.permute.xlu0 %3549 }
 0xfdd   :  { %v3540_v30 = vpop.permute.xlu1 %3539 }
 0xfde   :  { %v3542_v25 = vmul.f32 %v3540_v30, %v3537_v17 }
 0xfe0   :  { %v3546_v46 = vmul.f32 %v3544_v24, %v3542_v25 }
 0xfe2   :  { %3680 = vmatmul.msk.f32.vlgmr.msrb.gmra.mxu3 %vm2721_vm5, %v3546_v46 }
 0xfe5   :  { %v3552_v15 = vpop.permute.xlu1 %3551 }
 0xfe6   :  { %v3553_v58 = vsel %vm2721_vm5, %v3550_v63, %v3552_v15 }
0x1065   :  { %v3575_v13 = vpop.f32.mrf.mxu3 }
0x1066   :  { %v3576_v11 = vadd.f32 %v3575_v13, %v3553_v58 }
0x1068   :  { %v3578_v48 = vadd.f32 %v3770_v52, %v3576_v11 }
0x106a   :  { %3747 = vtanh.f32 %v3578_v48 }
0x1070   :  { %v3748_v21 = vpop.eup %3747 }
0x1071   :  { %3581 = vrot.lane.b32.xlu2 %v3748_v21, %s3807_s30 }
0x10cb   :  { %v3582_v10 = vpop.permute.xlu2 %3581 }
0x10cc   :  { %v3585_v44 = vsub.f32 %v3486_v42, %v3582_v10  ;;  %v3584_v5 = vadd.f32 %v3582_v10, %v3486_v42 }
0x10ce   :  { %v3586_v40 = vmul.f32 %v3748_v21, %v3585_v44 }
0x10d0   :  { %v3587_v41 = vadd.f32 %v3586_v40, %v3584_v5 }
0x10d2   :  { %v3588_v14 = vmul.f32 0.5, %v3587_v41 }
0x10d4   :  { %3590 = vst.msk [vmem:[#allocation3 + $0x38] sm:$0xff] %vm2721_vm5, %v3588_v14 }
0x10d5   :  { %3603 = dma.vmem_to_hbm [thread:$0]  %s3596_s22, 1024, %s3598_s8, [#allocation4], %s3809_s9, %s3809_s9, %s3810_s10  }
0x10d6   :  { %3795 = dma.done.wait [#allocation4], 1024  }
0x10d7   :  { %3796 = vsyncadd [#allocation4], 4294966272 }
0x10d8   :  { %3608 = vsyncpa [#allocation4], 1 }

</bundles_post_ra>
